<compile_context>
chip_gen: v7x
topology: tpu7x:2x2x1
jax: 0.10.0
libtpu: 0.0.40
codegen_flags: <defaults>
</compile_context>

<pallas_src>
import functools

import jax
import jax.numpy as jnp
from jax.experimental import pallas as pl
from jax.experimental.pallas import tpu as pltpu

HIDDEN = 1024  # hard-coded in the PyTorch module


def _vmem_limit_bytes():
    # Capacity-aware scoped-VMEM budget: ~half of physical VMEM, capped at 64 MiB.
    try:
        cap = pltpu.get_tpu_info().vmem_capacity_bytes
        return max(32 * 1024 * 1024, min(int(cap // 2), 64 * 1024 * 1024))
    except Exception:
        return 32 * 1024 * 1024


VMEM_LIMIT = _vmem_limit_bytes()


# ----------------------------------------------------------------------------
# Pallas kernels
# ----------------------------------------------------------------------------
def _linear_kernel(x_ref, w_ref, b_ref, o_ref, *, apply_sigmoid):
    # Weights are bf16; cast activations to bf16 at the dot, accumulate in f32.
    x = x_ref[...].astype(w_ref.dtype)
    y = jnp.dot(x, w_ref[...], preferred_element_type=jnp.float32)
    y = y + b_ref[...]
    if apply_sigmoid:
        y = jax.nn.sigmoid(y)
    o_ref[...] = y.astype(o_ref.dtype)


def _pick_tn(N):
    """Large N tiles; keep >=2 tiles when N is big so v7x can shard across TCs."""
    if N >= 1024 and (N // 2) % 128 == 0:
        return N // 2
    return N


def pallas_linear(x, w, b, *, sigmoid=False):
    """y = x @ w + b (optional sigmoid). Tiled over the output (lane) dim."""
    M, K = x.shape
    Kw, N = w.shape
    assert K == Kw
    tn = _pick_tn(N)
    grid = (N // tn,)
    return pl.pallas_call(
        functools.partial(_linear_kernel, apply_sigmoid=sigmoid),
        out_shape=jax.ShapeDtypeStruct((M, N), jnp.float32),
        grid_spec=pltpu.PrefetchScalarGridSpec(
            num_scalar_prefetch=0,
            grid=grid,
            in_specs=[
                pl.BlockSpec((M, K), lambda j: (0, 0)),
                pl.BlockSpec((K, tn), lambda j: (0, j)),
                pl.BlockSpec((1, tn), lambda j: (0, j)),
            ],
            out_specs=pl.BlockSpec((M, tn), lambda j: (0, j)),
        ),
        compiler_params=pltpu.CompilerParams(
            dimension_semantics=("parallel",),
            vmem_limit_bytes=VMEM_LIMIT,
        ),
    )(x, w, b.reshape(1, N))


def _mlp_kernel(x_ref, w0_ref, b0_ref, w1_ref, b1_ref, o_ref):
    # Fused lin0 -> sigmoid -> lin1 -> sigmoid, both weights resident in VMEM.
    x = x_ref[...].astype(w0_ref.dtype)
    t = jnp.dot(x, w0_ref[...], preferred_element_type=jnp.float32) + b0_ref[...]
    t = jax.nn.sigmoid(t)
    t = jnp.dot(t.astype(w1_ref.dtype), w1_ref[...],
                preferred_element_type=jnp.float32) + b1_ref[...]
    o_ref[...] = jax.nn.sigmoid(t).astype(o_ref.dtype)


def pallas_mlp(x, w0, b0, w1, b1):
    M = x.shape[0]
    N = w1.shape[1]
    return pl.pallas_call(
        _mlp_kernel,
        out_shape=jax.ShapeDtypeStruct((M, N), jnp.float32),
        compiler_params=pltpu.CompilerParams(vmem_limit_bytes=VMEM_LIMIT),
    )(x, w0, b0.reshape(1, -1), w1, b1.reshape(1, -1))


def _lstm_kernel(xp_ref, whh_ref, h0_ref, c0_ref, y_ref, h_scr, c_scr):
    t = pl.program_id(0)

    @pl.when(t == 0)
    def _():
        h_scr[...] = h0_ref[...]
        c_scr[...] = c0_ref[...]

    H = h_scr.shape[-1]
    gates = xp_ref[0] + jnp.dot(
        h_scr[...].astype(whh_ref.dtype), whh_ref[...],
        preferred_element_type=jnp.float32)
    i_g = jax.nn.sigmoid(gates[:, 0:H])
    f_g = jax.nn.sigmoid(gates[:, H:2 * H])
    g_g = jnp.tanh(gates[:, 2 * H:3 * H])
    o_g = jax.nn.sigmoid(gates[:, 3 * H:4 * H])
    c_new = f_g * c_scr[...] + i_g * g_g
    h_new = o_g * jnp.tanh(c_new)
    c_scr[...] = c_new
    h_scr[...] = h_new
    y_ref[0] = h_new.astype(y_ref.dtype)


def pallas_lstm_layer(xproj, w_hh, h0, c0):
    """One LSTM layer recurrence.

    xproj: (T, B, 4H) = x_t @ W_ih + b_ih + b_hh (precomputed via pallas_linear).
    w_hh is bf16 (8 MiB for H=1024) and is resident across the time grid
    (constant index_map), so VMEM stays well inside v7x's 64 MiB per TC.
    Returns all hidden states, time-major (T, B, H).
    """
    T, B, G = xproj.shape
    H = G // 4
    return pl.pallas_call(
        _lstm_kernel,
        out_shape=jax.ShapeDtypeStruct((T, B, H), jnp.float32),
        grid_spec=pltpu.PrefetchScalarGridSpec(
            num_scalar_prefetch=0,
            grid=(T,),
            in_specs=[
                pl.BlockSpec((1, B, G), lambda t: (t, 0, 0)),
                pl.BlockSpec((H, G), lambda t: (0, 0)),
                pl.BlockSpec((B, H), lambda t: (0, 0)),
                pl.BlockSpec((B, H), lambda t: (0, 0)),
            ],
            out_specs=pl.BlockSpec((1, B, H), lambda t: (t, 0, 0)),
            scratch_shapes=[
                pltpu.VMEM((B, H), jnp.float32),
                pltpu.VMEM((B, H), jnp.float32),
            ],
        ),
        compiler_params=pltpu.CompilerParams(
            dimension_semantics=("arbitrary",),
            vmem_limit_bytes=VMEM_LIMIT,
        ),
    )(xproj, w_hh, h0, c0)


# ----------------------------------------------------------------------------
# Parameters (deterministic synthetic init; large weights stored in bf16)
# ----------------------------------------------------------------------------
def init_params(key, n, long_, lat_, num_layers):
    ks = list(jax.random.split(key, 10 + num_layers))
    s = 0.02
    bf16 = jnp.bfloat16
    Ho, Wo = long_ - 49, lat_ - 49
    feat = 1024 + Ho * Wo * n
    p = {}
    p["w0"] = (jax.random.normal(ks[0], (n * long_ * lat_, 256), jnp.float32) * s).astype(bf16)
    p["b0"] = jax.random.normal(ks[1], (256,), jnp.float32) * s
    p["w1"] = (jax.random.normal(ks[2], (256, 1024), jnp.float32) * s).astype(bf16)
    p["b1"] = jax.random.normal(ks[3], (1024,), jnp.float32) * s
    p["wconv"] = jax.random.normal(ks[4], (n, n, 50, 50), jnp.float32) * s
    p["bconv"] = jax.random.normal(ks[5], (n,), jnp.float32) * s
    p["w2"] = (jax.random.normal(ks[6], (feat, 1024), jnp.float32) * s).astype(bf16)
    p["b2"] = jax.random.normal(ks[7], (1024,), jnp.float32) * s
    p["w3"] = jax.random.normal(ks[8], (1024, 1), jnp.float32) * s
    p["b3"] = jax.random.normal(ks[9], (1,), jnp.float32) * s
    lstm = []
    for l in range(num_layers):
        kk = jax.random.split(ks[10 + l], 4)
        wih = (jax.random.normal(kk[0], (HIDDEN, 4 * HIDDEN), jnp.float32) * s).astype(bf16)
        whh = (jax.random.normal(kk[1], (HIDDEN, 4 * HIDDEN), jnp.float32) * s).astype(bf16)
        bih = jax.random.normal(kk[2], (4 * HIDDEN,), jnp.float32) * s
        bhh = jax.random.normal(kk[3], (4 * HIDDEN,), jnp.float32) * s
        lstm.append((wih, whh, bih, bhh))
    p["lstm"] = lstm
    return p


# ----------------------------------------------------------------------------
# HailNet forward using the Pallas kernels
# ----------------------------------------------------------------------------
def hailnet_forward(x, params, h0, c0, num_layers):
    B, T, n, L, La = x.shape
    xt = x.reshape(B * T, n, L, La).astype(jnp.float32)

    # Fused lin0 -> sigmoid -> lin1 -> sigmoid (one Pallas launch, weights in VMEM).
    flat = xt.reshape(B * T, n * L * La)
    t4 = pallas_mlp(flat, params["w0"], params["b0"], params["w1"], params["b1"])

    # Conv2d(kernel=50, stride=1, pad=0): out_channels = n (lane-width 2) ->
    # lane-sparse and launch-dominated in Pallas, so run it in XLA.
    conv = jax.lax.conv_general_dilated(
        xt, params["wconv"], window_strides=(1, 1), padding="VALID",
        dimension_numbers=("NCHW", "OIHW", "NCHW"))
    conv = conv + params["bconv"].reshape(1, n, 1, 1)
    conv_flat = conv.reshape(B * T, -1)          # channel-major == torch .flatten(1)

    # Concat + zero-pad the conv feature block so lin2's K is a multiple of 128.
    f_conv = conv_flat.shape[1]
    pad = (-f_conv) % 128
    h = jnp.concatenate(
        [t4, conv_flat, jnp.zeros((B * T, pad), jnp.float32)], axis=1)
    w2p = jnp.pad(params["w2"], ((0, pad), (0, 0)))
    t = pallas_linear(h, w2p, params["b2"])      # (B*T, 1024)

    # LSTM (time-major internally)
    seq = t.reshape(B, T, HIDDEN).transpose(1, 0, 2)    # (T, B, 1024)
    for l in range(num_layers):
        wih, whh, bih, bhh = params["lstm"][l]
        xp = pallas_linear(seq.reshape(T * B, HIDDEN), wih, bih + bhh)
        xp = xp.reshape(T, B, 4 * HIDDEN)
        seq = pallas_lstm_layer(xp, whh, h0[l], c0[l])   # (T, B, 1024)

    # Final lin3 (1024 -> 1) is lane-width-1: plain XLA beats a Pallas launch.
    last = seq[-1]                                       # out[:, -1, :]
    out = jax.nn.sigmoid(last @ params["w3"] + params["b3"])  # (B, 1)
    return out


# ----------------------------------------------------------------------------
# Pure-JAX reference mirroring the PyTorch forward (for validation)
# ----------------------------------------------------------------------------
def reference_forward(x, params, h0, c0, num_layers):
    f32 = lambda a: a.astype(jnp.float32)
    B, T, n = x.shape[0], x.shape[1], x.shape[2]
    hs = []
    for i in range(T):
        t0 = x[:, i].astype(jnp.float32)
        t2 = jax.nn.sigmoid(t0.reshape(B, -1) @ f32(params["w0"]) + params["b0"])
        t4 = jax.nn.sigmoid(t2 @ f32(params["w1"]) + params["b1"])
        c2d = jax.lax.conv_general_dilated(
            t0, params["wconv"], window_strides=(1, 1), padding="VALID",
            dimension_numbers=("NCHW", "OIHW", "NCHW"))
        c2d = c2d + params["bconv"].reshape(1, n, 1, 1)
        h = jnp.concatenate([t4, c2d.reshape(B, -1)], axis=1)
        hs.append(h[:, None])
    t = jnp.concatenate(hs, axis=1)
    t = t @ f32(params["w2"]) + params["b2"]

    seq = t
    for l in range(num_layers):
        wih, whh, bih, bhh = params["lstm"][l]
        wih, whh = f32(wih), f32(whh)

        def step(carry, x_t):
            hh, cc = carry
            g = x_t @ wih + hh @ whh + bih + bhh
            H = hh.shape[-1]
            i_g = jax.nn.sigmoid(g[:, :H])
            f_g = jax.nn.sigmoid(g[:, H:2 * H])
            g_g = jnp.tanh(g[:, 2 * H:3 * H])
            o_g = jax.nn.sigmoid(g[:, 3 * H:])
            cc = f_g * cc + i_g * g_g
            hh = o_g * jnp.tanh(cc)
            return (hh, cc), hh

        _, ys = jax.lax.scan(step, (h0[l], c0[l]), jnp.swapaxes(seq, 0, 1))
        seq = jnp.swapaxes(ys, 0, 1)

    out = seq[:, -1, :]
    return jax.nn.sigmoid(out @ params["w3"] + params["b3"])


if __name__ == "__main__":
    B, T = 2, 4                    # batch, seq_len
    n, long_, lat_ = 2, 52, 52     # kernel_size=50 forces spatial >= 50
    num_layers = 1

    key = jax.random.PRNGKey(0)
    kx, kp, kh, kc = jax.random.split(key, 4)
    x = jax.random.normal(kx, (B, T, n, long_, lat_), jnp.float32)
    params = init_params(kp, n, long_, lat_, num_layers)
    # TODO(synk): PyTorch draws h0/c0 with torch.randn each forward (non-deterministic);
    # here they are drawn deterministically from a fixed JAX PRNG key.
    h0 = jax.random.normal(kh, (num_layers, B, HIDDEN), jnp.float32)
    c0 = jax.random.normal(kc, (num_layers, B, HIDDEN), jnp.float32)

    out = jax.block_until_ready(hailnet_forward(x, params, h0, c0, num_layers))
    ref = jax.block_until_ready(reference_forward(x, params, h0, c0, num_layers))
    err = float(jnp.max(jnp.abs(out - ref)))
    assert out.shape == (B, 1), out.shape
    assert err < 1e-2, f"max abs err {err}"
    print("KERNEL_OK")
</pallas_src>

<mosaic_0001>
module attributes {stable_mosaic.version = 11 : i64} {
  func.func @_mlp_kernel(%arg0: memref<8x5408xf32, #tpu.memory_space<vmem>>, %arg1: memref<5408x256xbf16, #tpu.memory_space<vmem>>, %arg2: memref<1x256xf32, #tpu.memory_space<vmem>>, %arg3: memref<256x1024xbf16, #tpu.memory_space<vmem>>, %arg4: memref<1x1024xf32, #tpu.memory_space<vmem>>, %arg5: memref<8x1024xf32, #tpu.memory_space<vmem>>) attributes {dimension_semantics = [], scalar_prefetch = 0 : i64, scratch_operands = 0 : i64, tpu.core_type = #tpu.core_type<tc>} {
    %c0 = arith.constant 0 : index
    %c0_0 = arith.constant 0 : index
    %0 = vector.load %arg0[%c0, %c0_0] : memref<8x5408xf32, #tpu.memory_space<vmem>>, vector<8x5408xf32>
    %1 = arith.truncf %0 : vector<8x5408xf32> to vector<8x5408xbf16>
    %c0_1 = arith.constant 0 : index
    %c0_2 = arith.constant 0 : index
    %2 = vector.load %arg1[%c0_1, %c0_2] : memref<5408x256xbf16, #tpu.memory_space<vmem>>, vector<5408x256xbf16>
    %cst = arith.constant dense<0.000000e+00> : vector<8x256xf32>
    %3 = tpu.matmul %1, %2, %cst {dimension_numbers = #tpu.dot_dimension_numbers<[1], [0], [0], [1], [0, 0, 1, 1], [], []>} : vector<8x5408xbf16>, vector<5408x256xbf16>, vector<8x256xf32> -> vector<8x256xf32>
    %c0_3 = arith.constant 0 : index
    %c0_4 = arith.constant 0 : index
    %4 = vector.load %arg2[%c0_3, %c0_4] : memref<1x256xf32, #tpu.memory_space<vmem>>, vector<1x256xf32>
    %5 = vector.broadcast %4 : vector<1x256xf32> to vector<8x256xf32>
    %6 = arith.addf %3, %5 : vector<8x256xf32>
    %7 = arith.negf %6 : vector<8x256xf32>
    %8 = math.exp %7 : vector<8x256xf32>
    %cst_5 = arith.constant 1.000000e+00 : f32
    %9 = vector.broadcast %cst_5 : f32 to vector<8x256xf32>
    %10 = arith.addf %9, %8 : vector<8x256xf32>
    %11 = arith.divf %9, %10 : vector<8x256xf32>
    %12 = arith.truncf %11 : vector<8x256xf32> to vector<8x256xbf16>
    %c0_6 = arith.constant 0 : index
    %c0_7 = arith.constant 0 : index
    %13 = vector.load %arg3[%c0_6, %c0_7] : memref<256x1024xbf16, #tpu.memory_space<vmem>>, vector<256x1024xbf16>
    %cst_8 = arith.constant dense<0.000000e+00> : vector<8x1024xf32>
    %14 = tpu.matmul %12, %13, %cst_8 {dimension_numbers = #tpu.dot_dimension_numbers<[1], [0], [0], [1], [0, 0, 1, 1], [], []>} : vector<8x256xbf16>, vector<256x1024xbf16>, vector<8x1024xf32> -> vector<8x1024xf32>
    %c0_9 = arith.constant 0 : index
    %c0_10 = arith.constant 0 : index
    %15 = vector.load %arg4[%c0_9, %c0_10] : memref<1x1024xf32, #tpu.memory_space<vmem>>, vector<1x1024xf32>
    %16 = vector.broadcast %15 : vector<1x1024xf32> to vector<8x1024xf32>
    %17 = arith.addf %14, %16 : vector<8x1024xf32>
    %18 = arith.negf %17 : vector<8x1024xf32>
    %19 = math.exp %18 : vector<8x1024xf32>
    %cst_11 = arith.constant 1.000000e+00 : f32
    %20 = vector.broadcast %cst_11 : f32 to vector<8x1024xf32>
    %21 = arith.addf %20, %19 : vector<8x1024xf32>
    %22 = arith.divf %20, %21 : vector<8x1024xf32>
    %c0_12 = arith.constant 0 : index
    %c0_13 = arith.constant 0 : index
    %23 = vector.load %arg5[%c0_12, %c0_13] : memref<8x1024xf32, #tpu.memory_space<vmem>>, vector<8x1024xf32>
    tpu.vector_store %arg5[%c0_12, %c0_13], %22 {strides = array<i32>} : memref<8x1024xf32, #tpu.memory_space<vmem>>, vector<8x1024xf32>,
    return
  }
}

</mosaic_0001>

<bundles_post_ra>
// kernel: tpu_custom_call.1
= control target key start
LH: loop header
LB: loop body
LE: loop exit
PB: predicated region body
PF: predicated region fallthrough
CT: control target
= control target key end

     0   :  { %10 = vsyncpa [#allocation3], 0  ;;  %s8468_s0 = inlined_call_operand.hbm [shape: f32[8,5408], index: 0, kind: input, shape index: {}]   ;;  %s8469_s1 = inlined_call_operand.hbm [shape: bf16[5408,256], index: 1, kind: input, shape index: {}]   ;;  %s8470_s2 = inlined_call_operand.hbm [shape: f32[1,256], index: 2, kind: input, shape index: {}]   ;;  %s8471_s3 = inlined_call_operand.hbm [shape: bf16[256,1024], index: 3, kind: input, shape index: {}]   ;;  %s8472_s4 = inlined_call_operand.hbm [shape: f32[1,1024], index: 4, kind: input, shape index: {}]   ;;  %s8473_s5 = inlined_call_operand.hbm [shape: f32[8,1024], index: 5, kind: output, shape index: {}]  }
   0x1   :  { %11 = vsyncpa [#allocation6], 0 }
   0x2   :  { %12 = vsyncpa [#allocation9], 0 }
   0x3   :  { %13 = vsyncpa [#allocation4], 0  ;;  %s8309_s18 = smov [#allocation5]   ;;  %s8169_s22 = scalar_lea.hbm %s8469_s1, 86528 }
   0x4   :  { %s29_s19 = sshll.u32 %s8309_s18, 4  ;;  %p8170_p0 = scmp.ne.s32.totalorder %s8469_s1, %s8169_s22  ;;  %s30_s19 = int_to_ptr.vmem [resolvable:$true] %s29_s19 }
   0x5   :  { %p8173_p1 = scmp.lt.u32.totalorder %s8169_s22, %s8469_s1 }
   0x7   :  { %p8175_p2 = pnand %p8173_p1, %p8170_p0 }
   0x9   :  { %8178 = shalt.err (!%p8175_p2)
}
   0xa   :  { %s8179_s27 = scalar_lea.vmem %s30_s19, 86528  ;;  %p8184_p4 = scmp.lt.s32.totalorder %s30_s19, %s30_s19 }
   0xb   :  { %p8180_p3 = scmp.ne.s32.totalorder %s30_s19, %s8179_s27  ;;  %p8185_p5 = scmp.lt.s32.totalorder %s8179_s27, %s8179_s27 }
   0xd   :  { %p8186_p6 = por %p8185_p5, %p8184_p4 }
   0xf   :  { %p8187_p7 = pnand %p8186_p6, %p8180_p3 }
  0x11   :  { %8190 = shalt.err (!%p8187_p7)
}
  0x12   :  { %s8310_s28 = smov 128   ;;  %s8311_s29 = smov 8  }
  0x13   :  { %35 = dma.hbm_to_vmem [thread:$0]  %s8469_s1, 86528, %s30_s19, [#allocation6], %s8310_s28, %s8310_s28, %s8311_s29  }
  0x14   :  { %s8312_s7 = smov [#allocation8]   ;;  %s8191_s11 = scalar_lea.hbm %s8471_s3, 16384 }
  0x15   :  { %s51_s8 = sshll.u32 %s8312_s7, 4  ;;  %p8192_p8 = scmp.ne.s32.totalorder %s8471_s3, %s8191_s11  ;;  %s52_s8 = int_to_ptr.vmem [resolvable:$true] %s51_s8 }
  0x16   :  { %p8195_p9 = scmp.lt.u32.totalorder %s8191_s11, %s8471_s3 }
  0x18   :  { %p8197_p10 = pnand %p8195_p9, %p8192_p8 }
  0x1a   :  { %8200 = shalt.err (!%p8197_p10)
}
  0x1b   :  { %s8201_s16 = scalar_lea.vmem %s52_s8, 16384  ;;  %p8206_p12 = scmp.lt.s32.totalorder %s52_s8, %s52_s8 }
  0x1c   :  { %p8202_p11 = scmp.ne.s32.totalorder %s52_s8, %s8201_s16  ;;  %p8207_p13 = scmp.lt.s32.totalorder %s8201_s16, %s8201_s16 }
  0x1e   :  { %p8208_p0 = por %p8207_p13, %p8206_p12 }
  0x20   :  { %p8209_p1 = pnand %p8208_p0, %p8202_p11 }
  0x22   :  { %8212 = shalt.err (!%p8209_p1)
}
  0x23   :  { %s8313_s1 = smov 512   ;;  %s8314_s17 = smov 32  }
  0x24   :  { %57 = dma.hbm_to_vmem [thread:$0]  %s8471_s3, 16384, %s52_s8, [#allocation9], %s8313_s1, %s8313_s1, %s8314_s17  }
  0x25   :  { %s8315_s20 = smov [#allocation2]   ;;  %s8316_s22 = smov [#allocation7]  }
  0x26   :  { %s20_s21 = sshll.u32 %s8315_s20, 4  ;;  %s42_s23 = sshll.u32 %s8316_s22, 4  ;;  %s21_s21 = int_to_ptr.vmem [resolvable:$true] %s20_s21  ;;  %s43_s23 = int_to_ptr.vmem [resolvable:$true] %s42_s23 }
  0x27   :  { %s8213_s26 = scalar_lea.hbm %s8468_s0, 5504 }
  0x28   :  { %p8214_p2 = scmp.ne.s32.totalorder %s8468_s0, %s8213_s26  ;;  %p8217_p3 = scmp.lt.u32.totalorder %s8213_s26, %s8468_s0 }
  0x2a   :  { %p8219_p4 = pnand %p8217_p3, %p8214_p2 }
  0x2c   :  { %8222 = shalt.err (!%p8219_p4)
}
  0x2d   :  { %s8223_s3 = scalar_lea.vmem %s21_s21, 5504  ;;  %p8228_p6 = scmp.lt.s32.totalorder %s21_s21, %s21_s21 }
  0x2e   :  { %p8224_p5 = scmp.ne.s32.totalorder %s21_s21, %s8223_s3  ;;  %p8229_p7 = scmp.lt.s32.totalorder %s8223_s3, %s8223_s3 }
  0x30   :  { %p8230_p8 = por %p8229_p7, %p8228_p6 }
  0x32   :  { %p8231_p9 = pnand %p8230_p8, %p8224_p5 }
  0x34   :  { %8234 = shalt.err (!%p8231_p9)
}
  0x35   :  { %23 = dma.hbm_to_vmem [thread:$0]  %s8468_s0, 5504, %s21_s21, [#allocation3]  }
  0x36   :  { %s8235_s10 = scalar_lea.hbm %s8470_s2, 32 }
  0x37   :  { %p8236_p10 = scmp.ne.s32.totalorder %s8470_s2, %s8235_s10  ;;  %p8239_p11 = scmp.lt.u32.totalorder %s8235_s10, %s8470_s2 }
  0x39   :  { %p8241_p12 = pnand %p8239_p11, %p8236_p10 }
  0x3b   :  { %8244 = shalt.err (!%p8241_p12)
}
  0x3c   :  { %s8245_s15 = scalar_lea.vmem %s43_s23, 32  ;;  %p8250_p0 = scmp.lt.s32.totalorder %s43_s23, %s43_s23 }
  0x3d   :  { %p8246_p13 = scmp.ne.s32.totalorder %s43_s23, %s8245_s15  ;;  %p8251_p1 = scmp.lt.s32.totalorder %s8245_s15, %s8245_s15 }
  0x3f   :  { %p8252_p2 = por %p8251_p1, %p8250_p0 }
  0x41   :  { %p8253_p3 = pnand %p8252_p2, %p8246_p13 }
  0x43   :  { %8256 = shalt.err (!%p8253_p3)
}
  0x44   :  { %45 = dma.hbm_to_vmem [thread:$0]  %s8470_s2, 32, %s43_s23, [#allocation6]  }
  0x45   :  { %s8317_s1 = smov [#allocation10]   ;;  %s8257_s20 = scalar_lea.hbm %s8472_s4, 128 }
  0x46   :  { %s64_s17 = sshll.u32 %s8317_s1, 4  ;;  %p8258_p4 = scmp.ne.s32.totalorder %s8472_s4, %s8257_s20  ;;  %s65_s17 = int_to_ptr.vmem [resolvable:$true] %s64_s17 }
  0x47   :  { %p8261_p5 = scmp.lt.u32.totalorder %s8257_s20, %s8472_s4 }
  0x49   :  { %p8263_p6 = pnand %p8261_p5, %p8258_p4 }
  0x4b   :  { %8266 = shalt.err (!%p8263_p6)
}
  0x4c   :  { %s8267_s26 = scalar_lea.vmem %s65_s17, 128  ;;  %p8272_p8 = scmp.lt.s32.totalorder %s65_s17, %s65_s17 }
  0x4d   :  { %p8268_p7 = scmp.ne.s32.totalorder %s65_s17, %s8267_s26  ;;  %p8273_p9 = scmp.lt.s32.totalorder %s8267_s26, %s8267_s26 }
  0x4f   :  { %p8274_p10 = por %p8273_p9, %p8272_p8 }
  0x51   :  { %p8275_p11 = pnand %p8274_p10, %p8268_p7 }
  0x53   :  { %8278 = shalt.err (!%p8275_p11)
}
  0x54   :  { %67 = dma.hbm_to_vmem [thread:$0]  %s8472_s4, 128, %s65_s17, [#allocation9]  }
  0x55   :  { %8301 = dma.done.wait [#allocation3], 5504  }
  0x56   :  { %8302 = vsyncadd [#allocation3], 4294961792 }
  0x57   :  { %8303 = dma.done.wait [#allocation6], 86560  }
  0x58   :  { %8304 = vsyncadd [#allocation6], 4294880736 }
  0x59   :  { %8305 = dma.done.wait [#allocation9], 16512  }
  0x5a   :  { %8306 = vsyncadd [#allocation9], 4294950784  ;;  %v7115_v0 = vld [vmem:[#allocation5 + $0x4] ss:$8 sps:$4 sm:$0xff]   ;;  %v7119_v2 = vld [vmem:[#allocation5] ss:$8 sps:$4 sm:$0xff]  }
  0x5b   :  { %v7117_v1 = vld [vmem:[#allocation5 + $0x904] ss:$8 sps:$4 sm:$0xff]   ;;  %4242 = vmatprep.subr.bf16.mxu1 %v7115_v0  ;;  %v7120_v3 = vld [vmem:[#allocation5 + $0x900] ss:$8 sps:$4 sm:$0xff]   ;;  %v7121_v4 = vld [vmem:[#allocation5 + $0x14] ss:$8 sps:$4 sm:$0xff]  }
  0x5c   :  { %4611 = vmatprep.subr.bf16.mxu0 %v7117_v1  ;;  %4243 = vmatpush1.bf16.msra.mxu1 %v7119_v2  ;;  %v7123_v5 = vld [vmem:[#allocation5 + $0x914] ss:$8 sps:$4 sm:$0xff]   ;;  %v7125_v6 = vld [vmem:[#allocation5 + $0x10] ss:$8 sps:$4 sm:$0xff]   ;;  %v7127_v8 = vld [vmem:[#allocation5 + $0x24] ss:$8 sps:$4 sm:$0xff]  }
  0x5d   :  { %4612 = vmatpush1.bf16.msra.mxu0 %v7120_v3  ;;  %4244 = vmatprep.subr.bf16.mxu1 %v7121_v4  ;;  %v7126_v7 = vld [vmem:[#allocation5 + $0x910] ss:$8 sps:$4 sm:$0xff]   ;;  %v7129_v9 = vld [vmem:[#allocation5 + $0x924] ss:$8 sps:$4 sm:$0xff]   ;;  %v7131_v10 = vld [vmem:[#allocation5 + $0x20] ss:$8 sps:$4 sm:$0xff]  }
  0x5e   :  { %4613 = vmatprep.subr.bf16.mxu0 %v7123_v5  ;;  %v7132_v11 = vld [vmem:[#allocation5 + $0x920] ss:$8 sps:$4 sm:$0xff]   ;;  %v7133_v12 = vld [vmem:[#allocation5 + $0x34] ss:$8 sps:$4 sm:$0xff]   ;;  %v7137_v14 = vld [vmem:[#allocation5 + $0x30] ss:$8 sps:$4 sm:$0xff]  }
  0x5f   :  { %v7135_v13 = vld [vmem:[#allocation5 + $0x934] ss:$8 sps:$4 sm:$0xff]   ;;  %v7138_v15 = vld [vmem:[#allocation5 + $0x930] ss:$8 sps:$4 sm:$0xff]   ;;  %v7139_v16 = vld [vmem:[#allocation5 + $0x44] ss:$8 sps:$4 sm:$0xff]  }
  0x60   :  { %4245 = vmatpush1.bf16.msra.mxu1 %v7125_v6  ;;  %v7141_v17 = vld [vmem:[#allocation5 + $0x944] ss:$8 sps:$4 sm:$0xff]   ;;  %v7143_v18 = vld [vmem:[#allocation5 + $0x40] ss:$8 sps:$4 sm:$0xff]   ;;  %v7145_v20 = vld [vmem:[#allocation5 + $0x54] ss:$8 sps:$4 sm:$0xff]  }
  0x61   :  { %4614 = vmatpush1.bf16.msra.mxu0 %v7126_v7  ;;  %4246 = vmatprep.subr.bf16.mxu1 %v7127_v8  ;;  %v7144_v19 = vld [vmem:[#allocation5 + $0x940] ss:$8 sps:$4 sm:$0xff]   ;;  %v7147_v21 = vld [vmem:[#allocation5 + $0x954] ss:$8 sps:$4 sm:$0xff]   ;;  %v7149_v22 = vld [vmem:[#allocation5 + $0x50] ss:$8 sps:$4 sm:$0xff]  }
  0x62   :  { %4615 = vmatprep.subr.bf16.mxu0 %v7129_v9  ;;  %v7150_v23 = vld [vmem:[#allocation5 + $0x950] ss:$8 sps:$4 sm:$0xff]   ;;  %v7151_v24 = vld [vmem:[#allocation5 + $0x64] ss:$8 sps:$4 sm:$0xff]   ;;  %v7155_v26 = vld [vmem:[#allocation5 + $0x60] ss:$8 sps:$4 sm:$0xff]  }
  0x63   :  { %v7153_v25 = vld [vmem:[#allocation5 + $0x964] ss:$8 sps:$4 sm:$0xff]   ;;  %v7156_v27 = vld [vmem:[#allocation5 + $0x960] ss:$8 sps:$4 sm:$0xff]   ;;  %v7157_v28 = vld [vmem:[#allocation5 + $0x74] ss:$8 sps:$4 sm:$0xff]  }
  0x64   :  { %4247 = vmatpush1.bf16.msra.mxu1 %v7131_v10  ;;  %v7159_v29 = vld [vmem:[#allocation5 + $0x974] ss:$8 sps:$4 sm:$0xff]   ;;  %v7161_v30 = vld [vmem:[#allocation5 + $0x70] ss:$8 sps:$4 sm:$0xff]   ;;  %v7163_v32 = vld [vmem:[#allocation5 + $0x84] ss:$8 sps:$4 sm:$0xff]  }
  0x65   :  { %4616 = vmatpush1.bf16.msra.mxu0 %v7132_v11  ;;  %4248 = vmatprep.subr.bf16.mxu1 %v7133_v12  ;;  %v7162_v31 = vld [vmem:[#allocation5 + $0x970] ss:$8 sps:$4 sm:$0xff]   ;;  %v7165_v33 = vld [vmem:[#allocation5 + $0x984] ss:$8 sps:$4 sm:$0xff]   ;;  %v7167_v34 = vld [vmem:[#allocation5 + $0x80] ss:$8 sps:$4 sm:$0xff]  }
  0x66   :  { %4617 = vmatprep.subr.bf16.mxu0 %v7135_v13  ;;  %v7168_v35 = vld [vmem:[#allocation5 + $0x980] ss:$8 sps:$4 sm:$0xff]   ;;  %v7169_v36 = vld [vmem:[#allocation5 + $0x94] ss:$8 sps:$4 sm:$0xff]   ;;  %v7173_v38 = vld [vmem:[#allocation5 + $0x90] ss:$8 sps:$4 sm:$0xff]  }
  0x67   :  { %v7171_v37 = vld [vmem:[#allocation5 + $0x994] ss:$8 sps:$4 sm:$0xff]   ;;  %v7174_v39 = vld [vmem:[#allocation5 + $0x990] ss:$8 sps:$4 sm:$0xff]   ;;  %v7175_v40 = vld [vmem:[#allocation5 + $0xa4] ss:$8 sps:$4 sm:$0xff]  }
  0x68   :  { %4249 = vmatpush1.bf16.msra.mxu1 %v7137_v14  ;;  %v7177_v41 = vld [vmem:[#allocation5 + $0x9a4] ss:$8 sps:$4 sm:$0xff]   ;;  %v7179_v42 = vld [vmem:[#allocation5 + $0xa0] ss:$8 sps:$4 sm:$0xff]   ;;  %v7181_v44 = vld [vmem:[#allocation5 + $0xb4] ss:$8 sps:$4 sm:$0xff]  }
  0x69   :  { %4618 = vmatpush1.bf16.msra.mxu0 %v7138_v15  ;;  %4250 = vmatprep.subr.bf16.mxu1 %v7139_v16  ;;  %v7180_v43 = vld [vmem:[#allocation5 + $0x9a0] ss:$8 sps:$4 sm:$0xff]   ;;  %v7183_v45 = vld [vmem:[#allocation5 + $0x9b4] ss:$8 sps:$4 sm:$0xff]   ;;  %v7185_v47 = vld [vmem:[#allocation5 + $0xb0] ss:$8 sps:$4 sm:$0xff]  }
  0x6a   :  { %4619 = vmatprep.subr.bf16.mxu0 %v7141_v17  ;;  %v85_v46 = vld [vmem:[#allocation2 + $0x8] sm:$0xff]  ;;  %v103_v50 = vld [vmem:[#allocation2 + $0x98] sm:$0xff]  ;;  %v84_v5 = vld [vmem:[#allocation2] sm:$0xff]  ;;  %vm4238_vm0 = vcmask 261120   ;;  %s8319_s4 = smov [#allocation11]  }
  0x6b   :  { %v128_v48 = vpack.c.bf16 %v85_v46, %v85_v46  ;;  %v7186_v49 = vld [vmem:[#allocation5 + $0x9b0] ss:$8 sps:$4 sm:$0xff]   ;;  %v7187_v51 = vld [vmem:[#allocation5 + $0xc4] ss:$8 sps:$4 sm:$0xff]   ;;  %v146_v53 = vpack.c.bf16 %v103_v50, %v103_v50  ;;  %v7191_v54 = vld [vmem:[#allocation5 + $0xc0] ss:$8 sps:$4 sm:$0xff]   ;;  %v127_v10 = vpack.c.bf16 %v84_v5, %v84_v5 }
  0x6c   :  { %4251 = vmatpush1.bf16.msra.mxu1 %v7143_v18  ;;  %v7189_v52 = vld [vmem:[#allocation5 + $0x9c4] ss:$8 sps:$4 sm:$0xff]   ;;  %v7192_v55 = vld [vmem:[#allocation5 + $0x9c0] ss:$8 sps:$4 sm:$0xff]   ;;  %v7193_v56 = vld [vmem:[#allocation5 + $0xd4] ss:$8 sps:$4 sm:$0xff]  }
  0x6d   :  { %4620 = vmatpush1.bf16.msra.mxu0 %v7144_v19  ;;  %4252 = vmatprep.subr.bf16.mxu1 %v7145_v20  ;;  %v7195_v57 = vld [vmem:[#allocation5 + $0x9d4] ss:$8 sps:$4 sm:$0xff]   ;;  %v7197_v58 = vld [vmem:[#allocation5 + $0xd0] ss:$8 sps:$4 sm:$0xff]   ;;  %v7199_v60 = vld [vmem:[#allocation5 + $0xe4] ss:$8 sps:$4 sm:$0xff]  }
  0x6e   :  { %4621 = vmatprep.subr.bf16.mxu0 %v7147_v21  ;;  %4274 = vmatprep.mubr.bf16.mxu1 %v128_v48  ;;  %v7198_v59 = vld [vmem:[#allocation5 + $0x9d0] ss:$8 sps:$4 sm:$0xff]   ;;  %v7201_v61 = vld [vmem:[#allocation5 + $0x9e4] ss:$8 sps:$4 sm:$0xff]   ;;  %v7203_v62 = vld [vmem:[#allocation5 + $0xe0] ss:$8 sps:$4 sm:$0xff]  }
  0x6f   :  { %4643 = vmatprep.mubr.bf16.mxu0 %v146_v53  ;;  %v7204_v63 = vld [vmem:[#allocation5 + $0x9e0] ss:$8 sps:$4 sm:$0xff]   ;;  %v7205_v0 = vld [vmem:[#allocation5 + $0xf4] ss:$8 sps:$4 sm:$0xff]   ;;  %v7209_v2 = vld [vmem:[#allocation5 + $0xf0] ss:$8 sps:$4 sm:$0xff]  }
  0x70   :  { %4253 = vmatpush1.bf16.msra.mxu1 %v7149_v22  ;;  %v7207_v1 = vld [vmem:[#allocation5 + $0x9f4] ss:$8 sps:$4 sm:$0xff]   ;;  %v7210_v3 = vld [vmem:[#allocation5 + $0x9f0] ss:$8 sps:$4 sm:$0xff]   ;;  %v7213_v4 = vld [vmem:[#allocation5 + $0x104] ss:$8 sps:$4 sm:$0xff]  }
  0x71   :  { %4622 = vmatpush1.bf16.msra.mxu0 %v7150_v23  ;;  %4254 = vmatprep.subr.bf16.mxu1 %v7151_v24  ;;  %v102_v6 = vld [vmem:[#allocation2 + $0x90] sm:$0xff]  ;;  %v7216_v7 = vld [vmem:[#allocation5 + $0xa04] ss:$8 sps:$4 sm:$0xff]   ;;  %v7211_v8 = vld [vmem:[#allocation5 + $0x100] ss:$8 sps:$4 sm:$0xff]   ;;  %s6194_s27 = sshll.u32 %s8319_s4, 4  ;;  %s6195_s27 = int_to_ptr.vmem [resolvable:$true] %s6194_s27 }
  0x72   :  { %4623 = vmatprep.subr.bf16.mxu0 %v7153_v25  ;;  %v7214_v9 = vld [vmem:[#allocation5 + $0xa00] ss:$8 sps:$4 sm:$0xff]   ;;  %v145_v11 = vpack.c.bf16 %v102_v6, %v102_v6  ;;  %v7219_v12 = vld [vmem:[#allocation5 + $0x114] ss:$8 sps:$4 sm:$0xff]   ;;  %v7217_v14 = vld [vmem:[#allocation5 + $0x110] ss:$8 sps:$4 sm:$0xff]   ;;  %p8284_p13 = scmp.lt.s32.totalorder %s6195_s27, %s6195_s27 }
  0x73   :  { %v7222_v13 = vld [vmem:[#allocation5 + $0xa14] ss:$8 sps:$4 sm:$0xff]   ;;  %v7220_v15 = vld [vmem:[#allocation5 + $0xa10] ss:$8 sps:$4 sm:$0xff]   ;;  %v7225_v16 = vld [vmem:[#allocation5 + $0x124] ss:$8 sps:$4 sm:$0xff]  }
  0x74   :  { %4255 = vmatpush1.bf16.msra.mxu1 %v7155_v26  ;;  %v7228_v17 = vld [vmem:[#allocation5 + $0xa24] ss:$8 sps:$4 sm:$0xff]   ;;  %v7223_v18 = vld [vmem:[#allocation5 + $0x120] ss:$8 sps:$4 sm:$0xff]   ;;  %v7231_v20 = vld [vmem:[#allocation5 + $0x134] ss:$8 sps:$4 sm:$0xff]  }
  0x75   :  { %4624 = vmatpush1.bf16.msra.mxu0 %v7156_v27  ;;  %4256 = vmatprep.subr.bf16.mxu1 %v7157_v28  ;;  %v7226_v19 = vld [vmem:[#allocation5 + $0xa20] ss:$8 sps:$4 sm:$0xff]   ;;  %v7234_v21 = vld [vmem:[#allocation5 + $0xa34] ss:$8 sps:$4 sm:$0xff]   ;;  %v7229_v22 = vld [vmem:[#allocation5 + $0x130] ss:$8 sps:$4 sm:$0xff]  }
  0x76   :  { %4625 = vmatprep.subr.bf16.mxu0 %v7159_v29  ;;  %v7232_v23 = vld [vmem:[#allocation5 + $0xa30] ss:$8 sps:$4 sm:$0xff]   ;;  %v7237_v24 = vld [vmem:[#allocation5 + $0x144] ss:$8 sps:$4 sm:$0xff]   ;;  %v7235_v26 = vld [vmem:[#allocation5 + $0x140] ss:$8 sps:$4 sm:$0xff]  }
  0x77   :  { %v7240_v25 = vld [vmem:[#allocation5 + $0xa44] ss:$8 sps:$4 sm:$0xff]   ;;  %v7238_v27 = vld [vmem:[#allocation5 + $0xa40] ss:$8 sps:$4 sm:$0xff]   ;;  %v7243_v28 = vld [vmem:[#allocation5 + $0x154] ss:$8 sps:$4 sm:$0xff]  }
  0x78   :  { %4257 = vmatpush1.bf16.msra.mxu1 %v7161_v30  ;;  %v7246_v29 = vld [vmem:[#allocation5 + $0xa54] ss:$8 sps:$4 sm:$0xff]   ;;  %v7241_v30 = vld [vmem:[#allocation5 + $0x150] ss:$8 sps:$4 sm:$0xff]   ;;  %v7259_v46 = vld [vmem:[#allocation5 + $0x180] ss:$8 sps:$4 sm:$0xff]  }
  0x79   :  { %4626 = vmatpush1.bf16.msra.mxu0 %v7162_v31  ;;  %4258 = vmatprep.subr.bf16.mxu1 %v7163_v32  ;;  %v7244_v31 = vld [vmem:[#allocation5 + $0xa50] ss:$8 sps:$4 sm:$0xff]   ;;  %v7249_v32 = vld [vmem:[#allocation5 + $0x164] ss:$8 sps:$4 sm:$0xff]   ;;  %v7267_v48 = vld [vmem:[#allocation5 + $0x194] ss:$8 sps:$4 sm:$0xff]  }
  0x7a   :  { %4627 = vmatprep.subr.bf16.mxu0 %v7165_v33  ;;  %v7252_v33 = vld [vmem:[#allocation5 + $0xa64] ss:$8 sps:$4 sm:$0xff]   ;;  %v7265_v50 = vld [vmem:[#allocation5 + $0x190] ss:$8 sps:$4 sm:$0xff]   ;;  %v7295_v6 = vld [vmem:[#allocation5 + $0x1e0] ss:$8 sps:$4 sm:$0xff]  }
  0x7b   :  { %v7276_v53 = vld [vmem:[#allocation5 + $0xaa4] ss:$8 sps:$4 sm:$0xff]   ;;  %s8279_s28 = scalar_lea.vmem %s6195_s27, 1024 }
  0x7c   :  { %4259 = vmatpush1.bf16.msra.mxu1 %v7167_v34  ;;  %v87_v34 = vld [vmem:[#allocation2 + $0x18] sm:$0xff]  ;;  %p8280_p12 = scmp.ne.s32.totalorder %s6195_s27, %s8279_s28  ;;  %p8285_p0 = scmp.lt.s32.totalorder %s8279_s28, %s8279_s28 }
  0x7d   :  { %4628 = vmatpush1.bf16.msra.mxu0 %v7168_v35  ;;  %4260 = vmatprep.subr.bf16.mxu1 %v7169_v36  ;;  %v7247_v35 = vld [vmem:[#allocation5 + $0x160] ss:$8 sps:$4 sm:$0xff]   ;;  %v130_v36 = vpack.c.bf16 %v87_v34, %v87_v34  ;;  %v7300_v5 = vld [vmem:[#allocation5 + $0xae4] ss:$8 sps:$4 sm:$0xff]   ;;  %v7325_v34 = vld [vmem:[#allocation5 + $0x230] ss:$8 sps:$4 sm:$0xff]  }
  0x7e   :  { %4629 = vmatprep.subr.bf16.mxu0 %v7171_v37  ;;  %v7250_v37 = vld [vmem:[#allocation5 + $0xa60] ss:$8 sps:$4 sm:$0xff]   ;;  %p8286_p1 = por %p8285_p0, %p8284_p13 }
  0x80   :  { %4261 = vmatpush1.bf16.msra.mxu1 %v7173_v38  ;;  %v105_v38 = vld [vmem:[#allocation2 + $0xa8] sm:$0xff]  ;;  %p8287_p2 = pnand %p8286_p1, %p8280_p12 }
  0x81   :  { %4630 = vmatpush1.bf16.msra.mxu0 %v7174_v39  ;;  %4262 = vmatprep.subr.bf16.mxu1 %v7175_v40  ;;  %v7255_v39 = vld [vmem:[#allocation5 + $0x174] ss:$8 sps:$4 sm:$0xff]  }
  0x82   :  { %4631 = vmatprep.subr.bf16.mxu0 %v7177_v41  ;;  %v7258_v40 = vld [vmem:[#allocation5 + $0xa74] ss:$8 sps:$4 sm:$0xff]   ;;  %v148_v41 = vpack.c.bf16 %v105_v38, %v105_v38  ;;  %v7331_v38 = vld [vmem:[#allocation5 + $0x240] ss:$8 sps:$4 sm:$0xff]  }
  0x84   :  { %4263 = vmatpush1.bf16.msra.mxu1 %v7179_v42  ;;  %v7253_v42 = vld [vmem:[#allocation5 + $0x170] ss:$8 sps:$4 sm:$0xff]  }
  0x85   :  { %4632 = vmatpush1.bf16.msra.mxu0 %v7180_v43  ;;  %4264 = vmatprep.subr.bf16.mxu1 %v7181_v44  ;;  %v7256_v43 = vld [vmem:[#allocation5 + $0xa70] ss:$8 sps:$4 sm:$0xff]   ;;  %v7261_v44 = vld [vmem:[#allocation5 + $0x184] ss:$8 sps:$4 sm:$0xff]  }
  0x86   :  { %4633 = vmatprep.subr.bf16.mxu0 %v7183_v45  ;;  %v7264_v45 = vld [vmem:[#allocation5 + $0xa84] ss:$8 sps:$4 sm:$0xff]  }
  0x88   :  { %4265 = vmatpush1.bf16.msra.mxu1 %v7185_v47  ;;  %v7262_v47 = vld [vmem:[#allocation5 + $0xa80] ss:$8 sps:$4 sm:$0xff]  }
  0x89   :  { %4634 = vmatpush1.bf16.msra.mxu0 %v7186_v49  ;;  %4266 = vmatprep.subr.bf16.mxu1 %v7187_v51  ;;  %v7270_v49 = vld [vmem:[#allocation5 + $0xa94] ss:$8 sps:$4 sm:$0xff]   ;;  %v7268_v51 = vld [vmem:[#allocation5 + $0xa90] ss:$8 sps:$4 sm:$0xff]  }
  0x8a   :  { %4635 = vmatprep.subr.bf16.mxu0 %v7189_v52  ;;  %v7273_v52 = vld [vmem:[#allocation5 + $0x1a4] ss:$8 sps:$4 sm:$0xff]  }
  0x8c   :  { %4267 = vmatpush1.bf16.msra.mxu1 %v7191_v54  ;;  %v7271_v54 = vld [vmem:[#allocation5 + $0x1a0] ss:$8 sps:$4 sm:$0xff]  }
  0x8d   :  { %4636 = vmatpush1.bf16.msra.mxu0 %v7192_v55  ;;  %4268 = vmatprep.subr.bf16.mxu1 %v7193_v56  ;;  %v7274_v55 = vld [vmem:[#allocation5 + $0xaa0] ss:$8 sps:$4 sm:$0xff]   ;;  %v7279_v56 = vld [vmem:[#allocation5 + $0x1b4] ss:$8 sps:$4 sm:$0xff]  }
  0x8e   :  { %4637 = vmatprep.subr.bf16.mxu0 %v7195_v57  ;;  %v7282_v57 = vld [vmem:[#allocation5 + $0xab4] ss:$8 sps:$4 sm:$0xff]  }
  0x90   :  { %4269 = vmatpush1.bf16.msra.mxu1 %v7197_v58  ;;  %v7277_v58 = vld [vmem:[#allocation5 + $0x1b0] ss:$8 sps:$4 sm:$0xff]  }
  0x91   :  { %4638 = vmatpush1.bf16.msra.mxu0 %v7198_v59  ;;  %4270 = vmatprep.subr.bf16.mxu1 %v7199_v60  ;;  %v7280_v59 = vld [vmem:[#allocation5 + $0xab0] ss:$8 sps:$4 sm:$0xff]   ;;  %v7285_v60 = vld [vmem:[#allocation5 + $0x1c4] ss:$8 sps:$4 sm:$0xff]  }
  0x92   :  { %4639 = vmatprep.subr.bf16.mxu0 %v7201_v61  ;;  %v7288_v61 = vld [vmem:[#allocation5 + $0xac4] ss:$8 sps:$4 sm:$0xff]  }
  0x94   :  { %4271 = vmatpush1.bf16.msra.mxu1 %v7203_v62  ;;  %v7283_v62 = vld [vmem:[#allocation5 + $0x1c0] ss:$8 sps:$4 sm:$0xff]  }
  0x95   :  { %4640 = vmatpush1.bf16.msra.mxu0 %v7204_v63  ;;  %4272 = vmatprep.subr.bf16.mxu1 %v7205_v0  ;;  %v7286_v63 = vld [vmem:[#allocation5 + $0xac0] ss:$8 sps:$4 sm:$0xff]   ;;  %v7291_v0 = vld [vmem:[#allocation5 + $0x1d4] ss:$8 sps:$4 sm:$0xff]  }
  0x96   :  { %4641 = vmatprep.subr.bf16.mxu0 %v7207_v1  ;;  %v7294_v1 = vld [vmem:[#allocation5 + $0xad4] ss:$8 sps:$4 sm:$0xff]  }
  0x98   :  { %4273 = vmatpush1.bf16.msra.mxu1 %v7209_v2  ;;  %v7289_v2 = vld [vmem:[#allocation5 + $0x1d0] ss:$8 sps:$4 sm:$0xff]  }
  0x99   :  { %4642 = vmatpush1.bf16.msra.mxu0 %v7210_v3  ;;  %4283 = vmatprep.subr.bf16.mxu1 %v7213_v4  ;;  %v7292_v3 = vld [vmem:[#allocation5 + $0xad0] ss:$8 sps:$4 sm:$0xff]   ;;  %v7297_v4 = vld [vmem:[#allocation5 + $0x1e4] ss:$8 sps:$4 sm:$0xff]  }
  0x9a   :  { %4652 = vmatprep.subr.bf16.mxu0 %v7216_v7  ;;  %v7298_v7 = vld [vmem:[#allocation5 + $0xae0] ss:$8 sps:$4 sm:$0xff]  }
  0x9b   :  { %4275 = vmatmul.mubr.bf16.vlgmr.msra.gmra.mrb[0].mxu1 %v127_v10  ;;  %v7301_v10 = vld [vmem:[#allocation5 + $0x1f0] ss:$8 sps:$4 sm:$0xff]  }
  0x9c   :  { %4644 = vmatmul.mubr.bf16.vlgmr.msra.gmra.mrb[0].mxu0 %v145_v11  ;;  %4284 = vmatpush1.bf16.msra.mxu1 %v7211_v8  ;;  %v7303_v8 = vld [vmem:[#allocation5 + $0x1f4] ss:$8 sps:$4 sm:$0xff]   ;;  %v7304_v11 = vld [vmem:[#allocation5 + $0xaf0] ss:$8 sps:$4 sm:$0xff]  }
  0x9d   :  { %4653 = vmatpush1.bf16.msra.mxu0 %v7214_v9  ;;  %4285 = vmatprep.subr.bf16.mxu1 %v7219_v12  ;;  %v7306_v9 = vld [vmem:[#allocation5 + $0xaf4] ss:$8 sps:$4 sm:$0xff]   ;;  %v7309_v12 = vld [vmem:[#allocation5 + $0x204] ss:$8 sps:$4 sm:$0xff]  }
  0x9e   :  { %4654 = vmatprep.subr.bf16.mxu0 %v7222_v13  ;;  %4315 = vmatprep.mubr.bf16.mxu1 %v130_v36  ;;  %v86_v13 = vld [vmem:[#allocation2 + $0x10] sm:$0xff]  ;;  %v7333_v36 = vld [vmem:[#allocation5 + $0x244] ss:$8 sps:$4 sm:$0xff]  }
  0x9f   :  { %4684 = vmatprep.mubr.bf16.mxu0 %v148_v41  ;;  %v7342_v41 = vld [vmem:[#allocation5 + $0xb54] ss:$8 sps:$4 sm:$0xff]  }
  0xa0   :  { %4286 = vmatpush1.bf16.msra.mxu1 %v7217_v14  ;;  %v104_v14 = vld [vmem:[#allocation2 + $0xa0] sm:$0xff] }
  0xa1   :  { %4655 = vmatpush1.bf16.msra.mxu0 %v7220_v15  ;;  %4287 = vmatprep.subr.bf16.mxu1 %v7225_v16  ;;  %v7312_v15 = vld [vmem:[#allocation5 + $0xb04] ss:$8 sps:$4 sm:$0xff]   ;;  %v7307_v16 = vld [vmem:[#allocation5 + $0x200] ss:$8 sps:$4 sm:$0xff]  }
  0xa2   :  { %4656 = vmatprep.subr.bf16.mxu0 %v7228_v17  ;;  %v7310_v17 = vld [vmem:[#allocation5 + $0xb00] ss:$8 sps:$4 sm:$0xff]  }
  0xa4   :  { %4288 = vmatpush1.bf16.msra.mxu1 %v7223_v18  ;;  %v129_v18 = vpack.c.bf16 %v86_v13, %v86_v13  ;;  %v7396_v13 = vld [vmem:[#allocation5 + $0xbe4] ss:$8 sps:$4 sm:$0xff]  }
  0xa5   :  { %4657 = vmatpush1.bf16.msra.mxu0 %v7226_v19  ;;  %4289 = vmatprep.subr.bf16.mxu1 %v7231_v20  ;;  %v147_v19 = vpack.c.bf16 %v104_v14, %v104_v14  ;;  %v7315_v20 = vld [vmem:[#allocation5 + $0x214] ss:$8 sps:$4 sm:$0xff]   ;;  %v7391_v14 = vld [vmem:[#allocation5 + $0x2e0] ss:$8 sps:$4 sm:$0xff]  }
  0xa6   :  { %4658 = vmatprep.subr.bf16.mxu0 %v7234_v21  ;;  %v7318_v21 = vld [vmem:[#allocation5 + $0xb14] ss:$8 sps:$4 sm:$0xff]  }
  0xa8   :  { %4290 = vmatpush1.bf16.msra.mxu1 %v7229_v22  ;;  %v89_v22 = vld [vmem:[#allocation2 + $0x28] sm:$0xff] }
  0xa9   :  { %4659 = vmatpush1.bf16.msra.mxu0 %v7232_v23  ;;  %4291 = vmatprep.subr.bf16.mxu1 %v7237_v24  ;;  %v7313_v23 = vld [vmem:[#allocation5 + $0x210] ss:$8 sps:$4 sm:$0xff]   ;;  %v132_v24 = vpack.c.bf16 %v89_v22, %v89_v22 }
  0xaa   :  { %4660 = vmatprep.subr.bf16.mxu0 %v7240_v25  ;;  %v7316_v25 = vld [vmem:[#allocation5 + $0xb10] ss:$8 sps:$4 sm:$0xff]  }
  0xab   :  { %v106_v22 = vld [vmem:[#allocation2 + $0xb0] sm:$0xff] }
  0xac   :  { %4292 = vmatpush1.bf16.msra.mxu1 %v7235_v26  ;;  %v107_v26 = vld [vmem:[#allocation2 + $0xb8] sm:$0xff] }
  0xad   :  { %4661 = vmatpush1.bf16.msra.mxu0 %v7238_v27  ;;  %4293 = vmatprep.subr.bf16.mxu1 %v7243_v28  ;;  %v7321_v27 = vld [vmem:[#allocation5 + $0x224] ss:$8 sps:$4 sm:$0xff]  }
  0xae   :  { %4662 = vmatprep.subr.bf16.mxu0 %v7246_v29  ;;  %v7324_v28 = vld [vmem:[#allocation5 + $0xb24] ss:$8 sps:$4 sm:$0xff]   ;;  %v150_v29 = vpack.c.bf16 %v107_v26, %v107_v26 }
  0xb0   :  { %4294 = vmatpush1.bf16.msra.mxu1 %v7241_v30  ;;  %v7319_v30 = vld [vmem:[#allocation5 + $0x220] ss:$8 sps:$4 sm:$0xff]  }
  0xb1   :  { %4663 = vmatpush1.bf16.msra.mxu0 %v7244_v31  ;;  %4295 = vmatprep.subr.bf16.mxu1 %v7249_v32  ;;  %v7322_v31 = vld [vmem:[#allocation5 + $0xb20] ss:$8 sps:$4 sm:$0xff]   ;;  %v7327_v32 = vld [vmem:[#allocation5 + $0x234] ss:$8 sps:$4 sm:$0xff]  }
  0xb2   :  { %4664 = vmatprep.subr.bf16.mxu0 %v7252_v33  ;;  %v7330_v33 = vld [vmem:[#allocation5 + $0xb34] ss:$8 sps:$4 sm:$0xff]  }
  0xb4   :  { %4296 = vmatpush1.bf16.msra.mxu1 %v7247_v35  ;;  %v7328_v35 = vld [vmem:[#allocation5 + $0xb30] ss:$8 sps:$4 sm:$0xff]  }
  0xb5   :  { %4665 = vmatpush1.bf16.msra.mxu0 %v7250_v37  ;;  %4297 = vmatprep.subr.bf16.mxu1 %v7255_v39  ;;  %v7336_v37 = vld [vmem:[#allocation5 + $0xb44] ss:$8 sps:$4 sm:$0xff]   ;;  %v7334_v39 = vld [vmem:[#allocation5 + $0xb40] ss:$8 sps:$4 sm:$0xff]  }
  0xb6   :  { %4666 = vmatprep.subr.bf16.mxu0 %v7258_v40  ;;  %v7339_v40 = vld [vmem:[#allocation5 + $0x254] ss:$8 sps:$4 sm:$0xff]  }
  0xb8   :  { %4298 = vmatpush1.bf16.msra.mxu1 %v7253_v42  ;;  %v7337_v42 = vld [vmem:[#allocation5 + $0x250] ss:$8 sps:$4 sm:$0xff]  }
  0xb9   :  { %4667 = vmatpush1.bf16.msra.mxu0 %v7256_v43  ;;  %4299 = vmatprep.subr.bf16.mxu1 %v7261_v44  ;;  %v7340_v43 = vld [vmem:[#allocation5 + $0xb50] ss:$8 sps:$4 sm:$0xff]   ;;  %v7345_v44 = vld [vmem:[#allocation5 + $0x264] ss:$8 sps:$4 sm:$0xff]  }
  0xba   :  { %4668 = vmatprep.subr.bf16.mxu0 %v7264_v45  ;;  %v7348_v45 = vld [vmem:[#allocation5 + $0xb64] ss:$8 sps:$4 sm:$0xff]  }
  0xbc   :  { %4300 = vmatpush1.bf16.msra.mxu1 %v7259_v46  ;;  %v7343_v46 = vld [vmem:[#allocation5 + $0x260] ss:$8 sps:$4 sm:$0xff]  }
  0xbd   :  { %4669 = vmatpush1.bf16.msra.mxu0 %v7262_v47  ;;  %4301 = vmatprep.subr.bf16.mxu1 %v7267_v48  ;;  %v7346_v47 = vld [vmem:[#allocation5 + $0xb60] ss:$8 sps:$4 sm:$0xff]   ;;  %v7351_v48 = vld [vmem:[#allocation5 + $0x274] ss:$8 sps:$4 sm:$0xff]  }
  0xbe   :  { %4670 = vmatprep.subr.bf16.mxu0 %v7270_v49  ;;  %v7354_v49 = vld [vmem:[#allocation5 + $0xb74] ss:$8 sps:$4 sm:$0xff]  }
  0xc0   :  { %4302 = vmatpush1.bf16.msra.mxu1 %v7265_v50  ;;  %v7349_v50 = vld [vmem:[#allocation5 + $0x270] ss:$8 sps:$4 sm:$0xff]  }
  0xc1   :  { %4671 = vmatpush1.bf16.msra.mxu0 %v7268_v51  ;;  %4303 = vmatprep.subr.bf16.mxu1 %v7273_v52  ;;  %v7352_v51 = vld [vmem:[#allocation5 + $0xb70] ss:$8 sps:$4 sm:$0xff]   ;;  %v7357_v52 = vld [vmem:[#allocation5 + $0x284] ss:$8 sps:$4 sm:$0xff]  }
  0xc2   :  { %4672 = vmatprep.subr.bf16.mxu0 %v7276_v53  ;;  %v7360_v53 = vld [vmem:[#allocation5 + $0xb84] ss:$8 sps:$4 sm:$0xff]  }
  0xc4   :  { %4304 = vmatpush1.bf16.msra.mxu1 %v7271_v54  ;;  %v7355_v54 = vld [vmem:[#allocation5 + $0x280] ss:$8 sps:$4 sm:$0xff]  }
  0xc5   :  { %4673 = vmatpush1.bf16.msra.mxu0 %v7274_v55  ;;  %4305 = vmatprep.subr.bf16.mxu1 %v7279_v56  ;;  %v7358_v55 = vld [vmem:[#allocation5 + $0xb80] ss:$8 sps:$4 sm:$0xff]   ;;  %v7363_v56 = vld [vmem:[#allocation5 + $0x294] ss:$8 sps:$4 sm:$0xff]  }
  0xc6   :  { %4674 = vmatprep.subr.bf16.mxu0 %v7282_v57  ;;  %v7366_v57 = vld [vmem:[#allocation5 + $0xb94] ss:$8 sps:$4 sm:$0xff]  }
  0xc8   :  { %4306 = vmatpush1.bf16.msra.mxu1 %v7277_v58  ;;  %v7361_v58 = vld [vmem:[#allocation5 + $0x290] ss:$8 sps:$4 sm:$0xff]  }
  0xc9   :  { %4675 = vmatpush1.bf16.msra.mxu0 %v7280_v59  ;;  %4307 = vmatprep.subr.bf16.mxu1 %v7285_v60  ;;  %v7364_v59 = vld [vmem:[#allocation5 + $0xb90] ss:$8 sps:$4 sm:$0xff]   ;;  %v7369_v60 = vld [vmem:[#allocation5 + $0x2a4] ss:$8 sps:$4 sm:$0xff]  }
  0xca   :  { %4676 = vmatprep.subr.bf16.mxu0 %v7288_v61  ;;  %v7372_v61 = vld [vmem:[#allocation5 + $0xba4] ss:$8 sps:$4 sm:$0xff]  }
  0xcc   :  { %4308 = vmatpush1.bf16.msra.mxu1 %v7283_v62  ;;  %v7367_v62 = vld [vmem:[#allocation5 + $0x2a0] ss:$8 sps:$4 sm:$0xff]  }
  0xcd   :  { %4677 = vmatpush1.bf16.msra.mxu0 %v7286_v63  ;;  %4309 = vmatprep.subr.bf16.mxu1 %v7291_v0  ;;  %v7370_v63 = vld [vmem:[#allocation5 + $0xba0] ss:$8 sps:$4 sm:$0xff]   ;;  %v7375_v0 = vld [vmem:[#allocation5 + $0x2b4] ss:$8 sps:$4 sm:$0xff]  }
  0xce   :  { %4678 = vmatprep.subr.bf16.mxu0 %v7294_v1  ;;  %v7378_v1 = vld [vmem:[#allocation5 + $0xbb4] ss:$8 sps:$4 sm:$0xff]  }
  0xd0   :  { %4310 = vmatpush1.bf16.msra.mxu1 %v7289_v2  ;;  %v7373_v2 = vld [vmem:[#allocation5 + $0x2b0] ss:$8 sps:$4 sm:$0xff]  }
  0xd1   :  { %4679 = vmatpush1.bf16.msra.mxu0 %v7292_v3  ;;  %4311 = vmatprep.subr.bf16.mxu1 %v7297_v4  ;;  %v7376_v3 = vld [vmem:[#allocation5 + $0xbb0] ss:$8 sps:$4 sm:$0xff]   ;;  %v7381_v4 = vld [vmem:[#allocation5 + $0x2c4] ss:$8 sps:$4 sm:$0xff]  }
  0xd2   :  { %4680 = vmatprep.subr.bf16.mxu0 %v7300_v5  ;;  %v7384_v5 = vld [vmem:[#allocation5 + $0xbc4] ss:$8 sps:$4 sm:$0xff]  }
  0xd4   :  { %4312 = vmatpush1.bf16.msra.mxu1 %v7295_v6  ;;  %v7379_v6 = vld [vmem:[#allocation5 + $0x2c0] ss:$8 sps:$4 sm:$0xff]  }
  0xd5   :  { %4681 = vmatpush1.bf16.msra.mxu0 %v7298_v7  ;;  %4313 = vmatprep.subr.bf16.mxu1 %v7303_v8  ;;  %v7382_v7 = vld [vmem:[#allocation5 + $0xbc0] ss:$8 sps:$4 sm:$0xff]   ;;  %v7387_v8 = vld [vmem:[#allocation5 + $0x2d4] ss:$8 sps:$4 sm:$0xff]  }
  0xd6   :  { %4682 = vmatprep.subr.bf16.mxu0 %v7306_v9  ;;  %v7390_v9 = vld [vmem:[#allocation5 + $0xbd4] ss:$8 sps:$4 sm:$0xff]  }
  0xd8   :  { %4314 = vmatpush1.bf16.msra.mxu1 %v7301_v10  ;;  %v7385_v10 = vld [vmem:[#allocation5 + $0x2d0] ss:$8 sps:$4 sm:$0xff]  }
  0xd9   :  { %4683 = vmatpush1.bf16.msra.mxu0 %v7304_v11  ;;  %4324 = vmatprep.subr.bf16.mxu1 %v7309_v12  ;;  %v7388_v11 = vld [vmem:[#allocation5 + $0xbd0] ss:$8 sps:$4 sm:$0xff]   ;;  %v7393_v12 = vld [vmem:[#allocation5 + $0x2e4] ss:$8 sps:$4 sm:$0xff]  }
  0xda   :  { %4693 = vmatprep.subr.bf16.mxu0 %v7312_v15  ;;  %v7394_v15 = vld [vmem:[#allocation5 + $0xbe0] ss:$8 sps:$4 sm:$0xff]  }
  0xdb   :  { %4316 = vmatmul.mubr.bf16.vlgmr.msra.gmra.mrb[0].mxu1 %v129_v18  ;;  %v7397_v18 = vld [vmem:[#allocation5 + $0x2f0] ss:$8 sps:$4 sm:$0xff]  }
  0xdc   :  { %4685 = vmatmul.mubr.bf16.vlgmr.msra.gmra.mrb[0].mxu0 %v147_v19  ;;  %4325 = vmatpush1.bf16.msra.mxu1 %v7307_v16  ;;  %v7399_v16 = vld [vmem:[#allocation5 + $0x2f4] ss:$8 sps:$4 sm:$0xff]   ;;  %v7400_v19 = vld [vmem:[#allocation5 + $0xbf0] ss:$8 sps:$4 sm:$0xff]  }
  0xdd   :  { %4694 = vmatpush1.bf16.msra.mxu0 %v7310_v17  ;;  %4326 = vmatprep.subr.bf16.mxu1 %v7315_v20  ;;  %v7402_v17 = vld [vmem:[#allocation5 + $0xbf4] ss:$8 sps:$4 sm:$0xff]   ;;  %v7405_v20 = vld [vmem:[#allocation5 + $0x304] ss:$8 sps:$4 sm:$0xff]  }
  0xde   :  { %4695 = vmatprep.subr.bf16.mxu0 %v7318_v21  ;;  %4356 = vmatprep.mubr.bf16.mxu1 %v132_v24  ;;  %v88_v21 = vld [vmem:[#allocation2 + $0x20] sm:$0xff] }
  0xdf   :  { %4725 = vmatprep.mubr.bf16.mxu0 %v150_v29  ;;  %v7403_v24 = vld [vmem:[#allocation5 + $0x300] ss:$8 sps:$4 sm:$0xff]   ;;  %v131_v26 = vpack.c.bf16 %v88_v21, %v88_v21  ;;  %v109_v29 = vld [vmem:[#allocation2 + $0xc8] sm:$0xff]  ;;  %v7492_v21 = vld [vmem:[#allocation5 + $0xce4] ss:$8 sps:$4 sm:$0xff]  }
  0xe0   :  { %4327 = vmatpush1.bf16.msra.mxu1 %v7313_v23  ;;  %v7408_v23 = vld [vmem:[#allocation5 + $0xc04] ss:$8 sps:$4 sm:$0xff]  }
  0xe1   :  { %4696 = vmatpush1.bf16.msra.mxu0 %v7316_v25  ;;  %4328 = vmatprep.subr.bf16.mxu1 %v7321_v27  ;;  %v7406_v25 = vld [vmem:[#allocation5 + $0xc00] ss:$8 sps:$4 sm:$0xff]   ;;  %v149_v27 = vpack.c.bf16 %v106_v22, %v106_v22 }
  0xe2   :  { %4697 = vmatprep.subr.bf16.mxu0 %v7324_v28  ;;  %v91_v28 = vld [vmem:[#allocation2 + $0x38] sm:$0xff] }
  0xe3   :  { %v7487_v22 = vld [vmem:[#allocation5 + $0x3e0] ss:$8 sps:$4 sm:$0xff]  }
  0xe4   :  { %4329 = vmatpush1.bf16.msra.mxu1 %v7319_v30  ;;  %v7411_v30 = vld [vmem:[#allocation5 + $0x314] ss:$8 sps:$4 sm:$0xff]  }
  0xe5   :  { %4698 = vmatpush1.bf16.msra.mxu0 %v7322_v31  ;;  %4330 = vmatprep.subr.bf16.mxu1 %v7327_v32  ;;  %v7414_v31 = vld [vmem:[#allocation5 + $0xc14] ss:$8 sps:$4 sm:$0xff]   ;;  %v134_v32 = vpack.c.bf16 %v91_v28, %v91_v28  ;;  %v7501_v28 = vld [vmem:[#allocation5 + $0x404] ss:$8 sps:$4 sm:$0xff]  }
  0xe6   :  { %4699 = vmatprep.subr.bf16.mxu0 %v7330_v33  ;;  %v152_v33 = vpack.c.bf16 %v109_v29, %v109_v29  ;;  %v90_v29 = vld [vmem:[#allocation2 + $0x30] sm:$0xff] }
  0xe8   :  { %4331 = vmatpush1.bf16.msra.mxu1 %v7325_v34  ;;  %v7409_v34 = vld [vmem:[#allocation5 + $0x310] ss:$8 sps:$4 sm:$0xff]  }
  0xe9   :  { %4700 = vmatpush1.bf16.msra.mxu0 %v7328_v35  ;;  %4332 = vmatprep.subr.bf16.mxu1 %v7333_v36  ;;  %v7412_v35 = vld [vmem:[#allocation5 + $0xc10] ss:$8 sps:$4 sm:$0xff]   ;;  %v7417_v36 = vld [vmem:[#allocation5 + $0x324] ss:$8 sps:$4 sm:$0xff]  }
  0xea   :  { %4701 = vmatprep.subr.bf16.mxu0 %v7336_v37  ;;  %v7420_v37 = vld [vmem:[#allocation5 + $0xc24] ss:$8 sps:$4 sm:$0xff]  }
  0xec   :  { %4333 = vmatpush1.bf16.msra.mxu1 %v7331_v38  ;;  %v7415_v38 = vld [vmem:[#allocation5 + $0x320] ss:$8 sps:$4 sm:$0xff]  }
  0xed   :  { %4702 = vmatpush1.bf16.msra.mxu0 %v7334_v39  ;;  %4334 = vmatprep.subr.bf16.mxu1 %v7339_v40  ;;  %v7418_v39 = vld [vmem:[#allocation5 + $0xc20] ss:$8 sps:$4 sm:$0xff]   ;;  %v7423_v40 = vld [vmem:[#allocation5 + $0x334] ss:$8 sps:$4 sm:$0xff]  }
  0xee   :  { %4703 = vmatprep.subr.bf16.mxu0 %v7342_v41  ;;  %v7426_v41 = vld [vmem:[#allocation5 + $0xc34] ss:$8 sps:$4 sm:$0xff]  }
  0xf0   :  { %4335 = vmatpush1.bf16.msra.mxu1 %v7337_v42  ;;  %v7421_v42 = vld [vmem:[#allocation5 + $0x330] ss:$8 sps:$4 sm:$0xff]  }
  0xf1   :  { %4704 = vmatpush1.bf16.msra.mxu0 %v7340_v43  ;;  %4336 = vmatprep.subr.bf16.mxu1 %v7345_v44  ;;  %v7424_v43 = vld [vmem:[#allocation5 + $0xc30] ss:$8 sps:$4 sm:$0xff]   ;;  %v7429_v44 = vld [vmem:[#allocation5 + $0x344] ss:$8 sps:$4 sm:$0xff]  }
  0xf2   :  { %4705 = vmatprep.subr.bf16.mxu0 %v7348_v45  ;;  %v7432_v45 = vld [vmem:[#allocation5 + $0xc44] ss:$8 sps:$4 sm:$0xff]  }
  0xf4   :  { %4337 = vmatpush1.bf16.msra.mxu1 %v7343_v46  ;;  %v7427_v46 = vld [vmem:[#allocation5 + $0x340] ss:$8 sps:$4 sm:$0xff]  }
  0xf5   :  { %4706 = vmatpush1.bf16.msra.mxu0 %v7346_v47  ;;  %4338 = vmatprep.subr.bf16.mxu1 %v7351_v48  ;;  %v7430_v47 = vld [vmem:[#allocation5 + $0xc40] ss:$8 sps:$4 sm:$0xff]   ;;  %v7435_v48 = vld [vmem:[#allocation5 + $0x354] ss:$8 sps:$4 sm:$0xff]  }
  0xf6   :  { %4707 = vmatprep.subr.bf16.mxu0 %v7354_v49  ;;  %v7438_v49 = vld [vmem:[#allocation5 + $0xc54] ss:$8 sps:$4 sm:$0xff]  }
  0xf8   :  { %4339 = vmatpush1.bf16.msra.mxu1 %v7349_v50  ;;  %v7433_v50 = vld [vmem:[#allocation5 + $0x350] ss:$8 sps:$4 sm:$0xff]  }
  0xf9   :  { %4708 = vmatpush1.bf16.msra.mxu0 %v7352_v51  ;;  %4340 = vmatprep.subr.bf16.mxu1 %v7357_v52  ;;  %v7436_v51 = vld [vmem:[#allocation5 + $0xc50] ss:$8 sps:$4 sm:$0xff]   ;;  %v7441_v52 = vld [vmem:[#allocation5 + $0x364] ss:$8 sps:$4 sm:$0xff]  }
  0xfa   :  { %4709 = vmatprep.subr.bf16.mxu0 %v7360_v53  ;;  %v7444_v53 = vld [vmem:[#allocation5 + $0xc64] ss:$8 sps:$4 sm:$0xff]  }
  0xfc   :  { %4341 = vmatpush1.bf16.msra.mxu1 %v7355_v54  ;;  %v7439_v54 = vld [vmem:[#allocation5 + $0x360] ss:$8 sps:$4 sm:$0xff]  }
  0xfd   :  { %4710 = vmatpush1.bf16.msra.mxu0 %v7358_v55  ;;  %4342 = vmatprep.subr.bf16.mxu1 %v7363_v56  ;;  %v7442_v55 = vld [vmem:[#allocation5 + $0xc60] ss:$8 sps:$4 sm:$0xff]   ;;  %v7447_v56 = vld [vmem:[#allocation5 + $0x374] ss:$8 sps:$4 sm:$0xff]  }
  0xfe   :  { %4711 = vmatprep.subr.bf16.mxu0 %v7366_v57  ;;  %v7450_v57 = vld [vmem:[#allocation5 + $0xc74] ss:$8 sps:$4 sm:$0xff]  }
 0x100   :  { %4343 = vmatpush1.bf16.msra.mxu1 %v7361_v58  ;;  %v7445_v58 = vld [vmem:[#allocation5 + $0x370] ss:$8 sps:$4 sm:$0xff]  }
 0x101   :  { %4712 = vmatpush1.bf16.msra.mxu0 %v7364_v59  ;;  %4344 = vmatprep.subr.bf16.mxu1 %v7369_v60  ;;  %v7448_v59 = vld [vmem:[#allocation5 + $0xc70] ss:$8 sps:$4 sm:$0xff]   ;;  %v7453_v60 = vld [vmem:[#allocation5 + $0x384] ss:$8 sps:$4 sm:$0xff]  }
 0x102   :  { %4713 = vmatprep.subr.bf16.mxu0 %v7372_v61  ;;  %v7456_v61 = vld [vmem:[#allocation5 + $0xc84] ss:$8 sps:$4 sm:$0xff]  }
 0x104   :  { %4345 = vmatpush1.bf16.msra.mxu1 %v7367_v62  ;;  %v7451_v62 = vld [vmem:[#allocation5 + $0x380] ss:$8 sps:$4 sm:$0xff]  }
 0x105   :  { %4714 = vmatpush1.bf16.msra.mxu0 %v7370_v63  ;;  %4346 = vmatprep.subr.bf16.mxu1 %v7375_v0  ;;  %v7454_v63 = vld [vmem:[#allocation5 + $0xc80] ss:$8 sps:$4 sm:$0xff]   ;;  %v7459_v0 = vld [vmem:[#allocation5 + $0x394] ss:$8 sps:$4 sm:$0xff]  }
 0x106   :  { %4715 = vmatprep.subr.bf16.mxu0 %v7378_v1  ;;  %v7462_v1 = vld [vmem:[#allocation5 + $0xc94] ss:$8 sps:$4 sm:$0xff]  }
 0x108   :  { %4347 = vmatpush1.bf16.msra.mxu1 %v7373_v2  ;;  %v7457_v2 = vld [vmem:[#allocation5 + $0x390] ss:$8 sps:$4 sm:$0xff]  }
 0x109   :  { %4716 = vmatpush1.bf16.msra.mxu0 %v7376_v3  ;;  %4348 = vmatprep.subr.bf16.mxu1 %v7381_v4  ;;  %v7460_v3 = vld [vmem:[#allocation5 + $0xc90] ss:$8 sps:$4 sm:$0xff]   ;;  %v7465_v4 = vld [vmem:[#allocation5 + $0x3a4] ss:$8 sps:$4 sm:$0xff]  }
 0x10a   :  { %4717 = vmatprep.subr.bf16.mxu0 %v7384_v5  ;;  %v7468_v5 = vld [vmem:[#allocation5 + $0xca4] ss:$8 sps:$4 sm:$0xff]  }
 0x10c   :  { %4349 = vmatpush1.bf16.msra.mxu1 %v7379_v6  ;;  %v7463_v6 = vld [vmem:[#allocation5 + $0x3a0] ss:$8 sps:$4 sm:$0xff]  }
 0x10d   :  { %4718 = vmatpush1.bf16.msra.mxu0 %v7382_v7  ;;  %4350 = vmatprep.subr.bf16.mxu1 %v7387_v8  ;;  %v7466_v7 = vld [vmem:[#allocation5 + $0xca0] ss:$8 sps:$4 sm:$0xff]   ;;  %v7471_v8 = vld [vmem:[#allocation5 + $0x3b4] ss:$8 sps:$4 sm:$0xff]  }
 0x10e   :  { %4719 = vmatprep.subr.bf16.mxu0 %v7390_v9  ;;  %v7474_v9 = vld [vmem:[#allocation5 + $0xcb4] ss:$8 sps:$4 sm:$0xff]  }
 0x110   :  { %4351 = vmatpush1.bf16.msra.mxu1 %v7385_v10  ;;  %v7469_v10 = vld [vmem:[#allocation5 + $0x3b0] ss:$8 sps:$4 sm:$0xff]  }
 0x111   :  { %4720 = vmatpush1.bf16.msra.mxu0 %v7388_v11  ;;  %4352 = vmatprep.subr.bf16.mxu1 %v7393_v12  ;;  %v7472_v11 = vld [vmem:[#allocation5 + $0xcb0] ss:$8 sps:$4 sm:$0xff]   ;;  %v7477_v12 = vld [vmem:[#allocation5 + $0x3c4] ss:$8 sps:$4 sm:$0xff]  }
 0x112   :  { %4721 = vmatprep.subr.bf16.mxu0 %v7396_v13  ;;  %v7480_v13 = vld [vmem:[#allocation5 + $0xcc4] ss:$8 sps:$4 sm:$0xff]  }
 0x114   :  { %4353 = vmatpush1.bf16.msra.mxu1 %v7391_v14  ;;  %v7475_v14 = vld [vmem:[#allocation5 + $0x3c0] ss:$8 sps:$4 sm:$0xff]  }
 0x115   :  { %4722 = vmatpush1.bf16.msra.mxu0 %v7394_v15  ;;  %4354 = vmatprep.subr.bf16.mxu1 %v7399_v16  ;;  %v7478_v15 = vld [vmem:[#allocation5 + $0xcc0] ss:$8 sps:$4 sm:$0xff]   ;;  %v7483_v16 = vld [vmem:[#allocation5 + $0x3d4] ss:$8 sps:$4 sm:$0xff]  }
 0x116   :  { %4723 = vmatprep.subr.bf16.mxu0 %v7402_v17  ;;  %v7486_v17 = vld [vmem:[#allocation5 + $0xcd4] ss:$8 sps:$4 sm:$0xff]  }
 0x118   :  { %4355 = vmatpush1.bf16.msra.mxu1 %v7397_v18  ;;  %v7481_v18 = vld [vmem:[#allocation5 + $0x3d0] ss:$8 sps:$4 sm:$0xff]  }
 0x119   :  { %4724 = vmatpush1.bf16.msra.mxu0 %v7400_v19  ;;  %4365 = vmatprep.subr.bf16.mxu1 %v7405_v20  ;;  %v7484_v19 = vld [vmem:[#allocation5 + $0xcd0] ss:$8 sps:$4 sm:$0xff]   ;;  %v7489_v20 = vld [vmem:[#allocation5 + $0x3e4] ss:$8 sps:$4 sm:$0xff]  }
 0x11a   :  { %4734 = vmatprep.subr.bf16.mxu0 %v7408_v23  ;;  %v7490_v23 = vld [vmem:[#allocation5 + $0xce0] ss:$8 sps:$4 sm:$0xff]  }
 0x11b   :  { %4357 = vmatmul.mubr.bf16.vlgmr.msra.gmra.mrb[0].mxu1 %v131_v26  ;;  %v7493_v26 = vld [vmem:[#allocation5 + $0x3f0] ss:$8 sps:$4 sm:$0xff]  }
 0x11c   :  { %4726 = vmatmul.mubr.bf16.vlgmr.msra.gmra.mrb[0].mxu0 %v149_v27  ;;  %4366 = vmatpush1.bf16.msra.mxu1 %v7403_v24  ;;  %v7495_v24 = vld [vmem:[#allocation5 + $0x3f4] ss:$8 sps:$4 sm:$0xff]   ;;  %v7496_v27 = vld [vmem:[#allocation5 + $0xcf0] ss:$8 sps:$4 sm:$0xff]  }
 0x11d   :  { %4735 = vmatpush1.bf16.msra.mxu0 %v7406_v25  ;;  %4367 = vmatprep.subr.bf16.mxu1 %v7411_v30  ;;  %v7498_v25 = vld [vmem:[#allocation5 + $0xcf4] ss:$8 sps:$4 sm:$0xff]   ;;  %v108_v30 = vld [vmem:[#allocation2 + $0xc0] sm:$0xff] }
 0x11e   :  { %4736 = vmatprep.subr.bf16.mxu0 %v7414_v31  ;;  %4397 = vmatprep.mubr.bf16.mxu1 %v134_v32  ;;  %v7504_v31 = vld [vmem:[#allocation5 + $0xd04] ss:$8 sps:$4 sm:$0xff]   ;;  %v7499_v32 = vld [vmem:[#allocation5 + $0x400] ss:$8 sps:$4 sm:$0xff]  }
 0x11f   :  { %4766 = vmatprep.mubr.bf16.mxu0 %v152_v33  ;;  %v7502_v33 = vld [vmem:[#allocation5 + $0xd00] ss:$8 sps:$4 sm:$0xff]  }
 0x120   :  { %4368 = vmatpush1.bf16.msra.mxu1 %v7409_v34  ;;  %v133_v34 = vpack.c.bf16 %v90_v29, %v90_v29  ;;  %v7588_v29 = vld [vmem:[#allocation5 + $0xde4] ss:$8 sps:$4 sm:$0xff]  }
 0x121   :  { %4737 = vmatpush1.bf16.msra.mxu0 %v7412_v35  ;;  %4369 = vmatprep.subr.bf16.mxu1 %v7417_v36  ;;  %v151_v35 = vpack.c.bf16 %v108_v30, %v108_v30  ;;  %v93_v36 = vld [vmem:[#allocation2 + $0x48] sm:$0xff]  ;;  %v7583_v30 = vld [vmem:[#allocation5 + $0x4e0] ss:$8 sps:$4 sm:$0xff]  }
 0x122   :  { %4738 = vmatprep.subr.bf16.mxu0 %v7420_v37  ;;  %v111_v37 = vld [vmem:[#allocation2 + $0xd8] sm:$0xff] }
 0x124   :  { %4370 = vmatpush1.bf16.msra.mxu1 %v7415_v38  ;;  %v7507_v38 = vld [vmem:[#allocation5 + $0x414] ss:$8 sps:$4 sm:$0xff]  }
 0x125   :  { %4739 = vmatpush1.bf16.msra.mxu0 %v7418_v39  ;;  %4371 = vmatprep.subr.bf16.mxu1 %v7423_v40  ;;  %v7510_v39 = vld [vmem:[#allocation5 + $0xd14] ss:$8 sps:$4 sm:$0xff]   ;;  %v136_v40 = vpack.c.bf16 %v93_v36, %v93_v36  ;;  %v7597_v36 = vld [vmem:[#allocation5 + $0x504] ss:$8 sps:$4 sm:$0xff]  }
 0x126   :  { %4740 = vmatprep.subr.bf16.mxu0 %v7426_v41  ;;  %v154_v41 = vpack.c.bf16 %v111_v37, %v111_v37  ;;  %v7600_v37 = vld [vmem:[#allocation5 + $0xe04] ss:$8 sps:$4 sm:$0xff]  }
 0x128   :  { %4372 = vmatpush1.bf16.msra.mxu1 %v7421_v42  ;;  %v7505_v42 = vld [vmem:[#allocation5 + $0x410] ss:$8 sps:$4 sm:$0xff]  }
 0x129   :  { %4741 = vmatpush1.bf16.msra.mxu0 %v7424_v43  ;;  %4373 = vmatprep.subr.bf16.mxu1 %v7429_v44  ;;  %v7508_v43 = vld [vmem:[#allocation5 + $0xd10] ss:$8 sps:$4 sm:$0xff]   ;;  %v7513_v44 = vld [vmem:[#allocation5 + $0x424] ss:$8 sps:$4 sm:$0xff]  }
 0x12a   :  { %4742 = vmatprep.subr.bf16.mxu0 %v7432_v45  ;;  %v7516_v45 = vld [vmem:[#allocation5 + $0xd24] ss:$8 sps:$4 sm:$0xff]  }
 0x12c   :  { %4374 = vmatpush1.bf16.msra.mxu1 %v7427_v46  ;;  %v7511_v46 = vld [vmem:[#allocation5 + $0x420] ss:$8 sps:$4 sm:$0xff]  }
 0x12d   :  { %4743 = vmatpush1.bf16.msra.mxu0 %v7430_v47  ;;  %4375 = vmatprep.subr.bf16.mxu1 %v7435_v48  ;;  %v7514_v47 = vld [vmem:[#allocation5 + $0xd20] ss:$8 sps:$4 sm:$0xff]   ;;  %v7519_v48 = vld [vmem:[#allocation5 + $0x434] ss:$8 sps:$4 sm:$0xff]  }
 0x12e   :  { %4744 = vmatprep.subr.bf16.mxu0 %v7438_v49  ;;  %v7522_v49 = vld [vmem:[#allocation5 + $0xd34] ss:$8 sps:$4 sm:$0xff]  }
 0x130   :  { %4376 = vmatpush1.bf16.msra.mxu1 %v7433_v50  ;;  %v7517_v50 = vld [vmem:[#allocation5 + $0x430] ss:$8 sps:$4 sm:$0xff]  }
 0x131   :  { %4745 = vmatpush1.bf16.msra.mxu0 %v7436_v51  ;;  %4377 = vmatprep.subr.bf16.mxu1 %v7441_v52  ;;  %v7520_v51 = vld [vmem:[#allocation5 + $0xd30] ss:$8 sps:$4 sm:$0xff]   ;;  %v7525_v52 = vld [vmem:[#allocation5 + $0x444] ss:$8 sps:$4 sm:$0xff]  }
 0x132   :  { %4746 = vmatprep.subr.bf16.mxu0 %v7444_v53  ;;  %v7528_v53 = vld [vmem:[#allocation5 + $0xd44] ss:$8 sps:$4 sm:$0xff]  }
 0x134   :  { %4378 = vmatpush1.bf16.msra.mxu1 %v7439_v54  ;;  %v7523_v54 = vld [vmem:[#allocation5 + $0x440] ss:$8 sps:$4 sm:$0xff]  }
 0x135   :  { %4747 = vmatpush1.bf16.msra.mxu0 %v7442_v55  ;;  %4379 = vmatprep.subr.bf16.mxu1 %v7447_v56  ;;  %v7526_v55 = vld [vmem:[#allocation5 + $0xd40] ss:$8 sps:$4 sm:$0xff]   ;;  %v7531_v56 = vld [vmem:[#allocation5 + $0x454] ss:$8 sps:$4 sm:$0xff]  }
 0x136   :  { %4748 = vmatprep.subr.bf16.mxu0 %v7450_v57  ;;  %v7534_v57 = vld [vmem:[#allocation5 + $0xd54] ss:$8 sps:$4 sm:$0xff]  }
 0x138   :  { %4380 = vmatpush1.bf16.msra.mxu1 %v7445_v58  ;;  %v7529_v58 = vld [vmem:[#allocation5 + $0x450] ss:$8 sps:$4 sm:$0xff]  }
 0x139   :  { %4749 = vmatpush1.bf16.msra.mxu0 %v7448_v59  ;;  %4381 = vmatprep.subr.bf16.mxu1 %v7453_v60  ;;  %v7532_v59 = vld [vmem:[#allocation5 + $0xd50] ss:$8 sps:$4 sm:$0xff]   ;;  %v7537_v60 = vld [vmem:[#allocation5 + $0x464] ss:$8 sps:$4 sm:$0xff]  }
 0x13a   :  { %4750 = vmatprep.subr.bf16.mxu0 %v7456_v61  ;;  %v7540_v61 = vld [vmem:[#allocation5 + $0xd64] ss:$8 sps:$4 sm:$0xff]  }
 0x13c   :  { %4382 = vmatpush1.bf16.msra.mxu1 %v7451_v62  ;;  %v7535_v62 = vld [vmem:[#allocation5 + $0x460] ss:$8 sps:$4 sm:$0xff]  }
 0x13d   :  { %4751 = vmatpush1.bf16.msra.mxu0 %v7454_v63  ;;  %4383 = vmatprep.subr.bf16.mxu1 %v7459_v0  ;;  %v7538_v63 = vld [vmem:[#allocation5 + $0xd60] ss:$8 sps:$4 sm:$0xff]   ;;  %v7543_v0 = vld [vmem:[#allocation5 + $0x474] ss:$8 sps:$4 sm:$0xff]  }
 0x13e   :  { %4752 = vmatprep.subr.bf16.mxu0 %v7462_v1  ;;  %v7546_v1 = vld [vmem:[#allocation5 + $0xd74] ss:$8 sps:$4 sm:$0xff]  }
 0x140   :  { %4384 = vmatpush1.bf16.msra.mxu1 %v7457_v2  ;;  %v7541_v2 = vld [vmem:[#allocation5 + $0x470] ss:$8 sps:$4 sm:$0xff]  }
 0x141   :  { %4753 = vmatpush1.bf16.msra.mxu0 %v7460_v3  ;;  %4385 = vmatprep.subr.bf16.mxu1 %v7465_v4  ;;  %v7544_v3 = vld [vmem:[#allocation5 + $0xd70] ss:$8 sps:$4 sm:$0xff]   ;;  %v7549_v4 = vld [vmem:[#allocation5 + $0x484] ss:$8 sps:$4 sm:$0xff]  }
 0x142   :  { %4754 = vmatprep.subr.bf16.mxu0 %v7468_v5  ;;  %v7552_v5 = vld [vmem:[#allocation5 + $0xd84] ss:$8 sps:$4 sm:$0xff]  }
 0x144   :  { %4386 = vmatpush1.bf16.msra.mxu1 %v7463_v6  ;;  %v7547_v6 = vld [vmem:[#allocation5 + $0x480] ss:$8 sps:$4 sm:$0xff]  }
 0x145   :  { %4755 = vmatpush1.bf16.msra.mxu0 %v7466_v7  ;;  %4387 = vmatprep.subr.bf16.mxu1 %v7471_v8  ;;  %v7550_v7 = vld [vmem:[#allocation5 + $0xd80] ss:$8 sps:$4 sm:$0xff]   ;;  %v7555_v8 = vld [vmem:[#allocation5 + $0x494] ss:$8 sps:$4 sm:$0xff]  }
 0x146   :  { %4756 = vmatprep.subr.bf16.mxu0 %v7474_v9  ;;  %v7558_v9 = vld [vmem:[#allocation5 + $0xd94] ss:$8 sps:$4 sm:$0xff]  }
 0x148   :  { %4388 = vmatpush1.bf16.msra.mxu1 %v7469_v10  ;;  %v7553_v10 = vld [vmem:[#allocation5 + $0x490] ss:$8 sps:$4 sm:$0xff]  }
 0x149   :  { %4757 = vmatpush1.bf16.msra.mxu0 %v7472_v11  ;;  %4389 = vmatprep.subr.bf16.mxu1 %v7477_v12  ;;  %v7556_v11 = vld [vmem:[#allocation5 + $0xd90] ss:$8 sps:$4 sm:$0xff]   ;;  %v7561_v12 = vld [vmem:[#allocation5 + $0x4a4] ss:$8 sps:$4 sm:$0xff]  }
 0x14a   :  { %4758 = vmatprep.subr.bf16.mxu0 %v7480_v13  ;;  %v7564_v13 = vld [vmem:[#allocation5 + $0xda4] ss:$8 sps:$4 sm:$0xff]  }
 0x14c   :  { %4390 = vmatpush1.bf16.msra.mxu1 %v7475_v14  ;;  %v7559_v14 = vld [vmem:[#allocation5 + $0x4a0] ss:$8 sps:$4 sm:$0xff]  }
 0x14d   :  { %4759 = vmatpush1.bf16.msra.mxu0 %v7478_v15  ;;  %4391 = vmatprep.subr.bf16.mxu1 %v7483_v16  ;;  %v7562_v15 = vld [vmem:[#allocation5 + $0xda0] ss:$8 sps:$4 sm:$0xff]   ;;  %v7567_v16 = vld [vmem:[#allocation5 + $0x4b4] ss:$8 sps:$4 sm:$0xff]  }
 0x14e   :  { %4760 = vmatprep.subr.bf16.mxu0 %v7486_v17  ;;  %v7570_v17 = vld [vmem:[#allocation5 + $0xdb4] ss:$8 sps:$4 sm:$0xff]  }
 0x150   :  { %4392 = vmatpush1.bf16.msra.mxu1 %v7481_v18  ;;  %v7565_v18 = vld [vmem:[#allocation5 + $0x4b0] ss:$8 sps:$4 sm:$0xff]  }
 0x151   :  { %4761 = vmatpush1.bf16.msra.mxu0 %v7484_v19  ;;  %4393 = vmatprep.subr.bf16.mxu1 %v7489_v20  ;;  %v7568_v19 = vld [vmem:[#allocation5 + $0xdb0] ss:$8 sps:$4 sm:$0xff]   ;;  %v7573_v20 = vld [vmem:[#allocation5 + $0x4c4] ss:$8 sps:$4 sm:$0xff]  }
 0x152   :  { %4762 = vmatprep.subr.bf16.mxu0 %v7492_v21  ;;  %v7576_v21 = vld [vmem:[#allocation5 + $0xdc4] ss:$8 sps:$4 sm:$0xff]  }
 0x154   :  { %4394 = vmatpush1.bf16.msra.mxu1 %v7487_v22  ;;  %v7571_v22 = vld [vmem:[#allocation5 + $0x4c0] ss:$8 sps:$4 sm:$0xff]  }
 0x155   :  { %4763 = vmatpush1.bf16.msra.mxu0 %v7490_v23  ;;  %4395 = vmatprep.subr.bf16.mxu1 %v7495_v24  ;;  %v7574_v23 = vld [vmem:[#allocation5 + $0xdc0] ss:$8 sps:$4 sm:$0xff]   ;;  %v7579_v24 = vld [vmem:[#allocation5 + $0x4d4] ss:$8 sps:$4 sm:$0xff]  }
 0x156   :  { %4764 = vmatprep.subr.bf16.mxu0 %v7498_v25  ;;  %v7582_v25 = vld [vmem:[#allocation5 + $0xdd4] ss:$8 sps:$4 sm:$0xff]  }
 0x158   :  { %4396 = vmatpush1.bf16.msra.mxu1 %v7493_v26  ;;  %v7577_v26 = vld [vmem:[#allocation5 + $0x4d0] ss:$8 sps:$4 sm:$0xff]  }
 0x159   :  { %4765 = vmatpush1.bf16.msra.mxu0 %v7496_v27  ;;  %4406 = vmatprep.subr.bf16.mxu1 %v7501_v28  ;;  %v7580_v27 = vld [vmem:[#allocation5 + $0xdd0] ss:$8 sps:$4 sm:$0xff]   ;;  %v7585_v28 = vld [vmem:[#allocation5 + $0x4e4] ss:$8 sps:$4 sm:$0xff]  }
 0x15a   :  { %4775 = vmatprep.subr.bf16.mxu0 %v7504_v31  ;;  %v7586_v31 = vld [vmem:[#allocation5 + $0xde0] ss:$8 sps:$4 sm:$0xff]  }
 0x15b   :  { %4398 = vmatmul.mubr.bf16.vlgmr.msra.gmra.mrb[0].mxu1 %v133_v34  ;;  %v7589_v34 = vld [vmem:[#allocation5 + $0x4f0] ss:$8 sps:$4 sm:$0xff]  }
 0x15c   :  { %4767 = vmatmul.mubr.bf16.vlgmr.msra.gmra.mrb[0].mxu0 %v151_v35  ;;  %4407 = vmatpush1.bf16.msra.mxu1 %v7499_v32  ;;  %v7591_v32 = vld [vmem:[#allocation5 + $0x4f4] ss:$8 sps:$4 sm:$0xff]   ;;  %v7592_v35 = vld [vmem:[#allocation5 + $0xdf0] ss:$8 sps:$4 sm:$0xff]  }
 0x15d   :  { %4776 = vmatpush1.bf16.msra.mxu0 %v7502_v33  ;;  %4408 = vmatprep.subr.bf16.mxu1 %v7507_v38  ;;  %v7594_v33 = vld [vmem:[#allocation5 + $0xdf4] ss:$8 sps:$4 sm:$0xff]   ;;  %v92_v38 = vld [vmem:[#allocation2 + $0x40] sm:$0xff] }
 0x15e   :  { %4777 = vmatprep.subr.bf16.mxu0 %v7510_v39  ;;  %4438 = vmatprep.mubr.bf16.mxu1 %v136_v40  ;;  %v110_v39 = vld [vmem:[#allocation2 + $0xd0] sm:$0xff]  ;;  %v95_v40 = vld [vmem:[#allocation2 + $0x58] sm:$0xff] }
 0x15f   :  { %4807 = vmatprep.mubr.bf16.mxu0 %v154_v41  ;;  %v113_v41 = vld [vmem:[#allocation2 + $0xe8] sm:$0xff] }
 0x160   :  { %4409 = vmatpush1.bf16.msra.mxu1 %v7505_v42  ;;  %v135_v42 = vpack.c.bf16 %v92_v38, %v92_v38  ;;  %v7679_v38 = vld [vmem:[#allocation5 + $0x5e0] ss:$8 sps:$4 sm:$0xff]  }
 0x161   :  { %4778 = vmatpush1.bf16.msra.mxu0 %v7508_v43  ;;  %4410 = vmatprep.subr.bf16.mxu1 %v7513_v44  ;;  %v153_v43 = vpack.c.bf16 %v110_v39, %v110_v39  ;;  %v7595_v44 = vld [vmem:[#allocation5 + $0x500] ss:$8 sps:$4 sm:$0xff]  }
 0x162   :  { %4779 = vmatprep.subr.bf16.mxu0 %v7516_v45  ;;  %v7598_v45 = vld [vmem:[#allocation5 + $0xe00] ss:$8 sps:$4 sm:$0xff]  }
 0x163   :  { %v7682_v39 = vld [vmem:[#allocation5 + $0xee0] ss:$8 sps:$4 sm:$0xff]  }
 0x164   :  { %4411 = vmatpush1.bf16.msra.mxu1 %v7511_v46  ;;  %v7603_v46 = vld [vmem:[#allocation5 + $0x514] ss:$8 sps:$4 sm:$0xff]  }
 0x165   :  { %4780 = vmatpush1.bf16.msra.mxu0 %v7514_v47  ;;  %4412 = vmatprep.subr.bf16.mxu1 %v7519_v48  ;;  %v7606_v47 = vld [vmem:[#allocation5 + $0xe14] ss:$8 sps:$4 sm:$0xff]   ;;  %v138_v48 = vpack.c.bf16 %v95_v40, %v95_v40 }
 0x166   :  { %4781 = vmatprep.subr.bf16.mxu0 %v7522_v49  ;;  %v156_v49 = vpack.c.bf16 %v113_v41, %v113_v41  ;;  %v7687_v40 = vld [vmem:[#allocation5 + $0x5f4] ss:$8 sps:$4 sm:$0xff]  }
 0x167   :  { %v7690_v41 = vld [vmem:[#allocation5 + $0xef4] ss:$8 sps:$4 sm:$0xff]  }
 0x168   :  { %4413 = vmatpush1.bf16.msra.mxu1 %v7517_v50  ;;  %v7601_v50 = vld [vmem:[#allocation5 + $0x510] ss:$8 sps:$4 sm:$0xff]  }
 0x169   :  { %4782 = vmatpush1.bf16.msra.mxu0 %v7520_v51  ;;  %4414 = vmatprep.subr.bf16.mxu1 %v7525_v52  ;;  %v7604_v51 = vld [vmem:[#allocation5 + $0xe10] ss:$8 sps:$4 sm:$0xff]   ;;  %v7609_v52 = vld [vmem:[#allocation5 + $0x524] ss:$8 sps:$4 sm:$0xff]  }
 0x16a   :  { %4783 = vmatprep.subr.bf16.mxu0 %v7528_v53  ;;  %v7612_v53 = vld [vmem:[#allocation5 + $0xe24] ss:$8 sps:$4 sm:$0xff]  }
 0x16c   :  { %4415 = vmatpush1.bf16.msra.mxu1 %v7523_v54  ;;  %v7607_v54 = vld [vmem:[#allocation5 + $0x520] ss:$8 sps:$4 sm:$0xff]  }
 0x16d   :  { %4784 = vmatpush1.bf16.msra.mxu0 %v7526_v55  ;;  %4416 = vmatprep.subr.bf16.mxu1 %v7531_v56  ;;  %v7610_v55 = vld [vmem:[#allocation5 + $0xe20] ss:$8 sps:$4 sm:$0xff]   ;;  %v7615_v56 = vld [vmem:[#allocation5 + $0x534] ss:$8 sps:$4 sm:$0xff]  }
 0x16e   :  { %4785 = vmatprep.subr.bf16.mxu0 %v7534_v57  ;;  %v7618_v57 = vld [vmem:[#allocation5 + $0xe34] ss:$8 sps:$4 sm:$0xff]  }
 0x170   :  { %4417 = vmatpush1.bf16.msra.mxu1 %v7529_v58  ;;  %v7613_v58 = vld [vmem:[#allocation5 + $0x530] ss:$8 sps:$4 sm:$0xff]  }
 0x171   :  { %4786 = vmatpush1.bf16.msra.mxu0 %v7532_v59  ;;  %4418 = vmatprep.subr.bf16.mxu1 %v7537_v60  ;;  %v7616_v59 = vld [vmem:[#allocation5 + $0xe30] ss:$8 sps:$4 sm:$0xff]   ;;  %v7621_v60 = vld [vmem:[#allocation5 + $0x544] ss:$8 sps:$4 sm:$0xff]  }
 0x172   :  { %4787 = vmatprep.subr.bf16.mxu0 %v7540_v61  ;;  %v7624_v61 = vld [vmem:[#allocation5 + $0xe44] ss:$8 sps:$4 sm:$0xff]  }
 0x174   :  { %4419 = vmatpush1.bf16.msra.mxu1 %v7535_v62  ;;  %v7619_v62 = vld [vmem:[#allocation5 + $0x540] ss:$8 sps:$4 sm:$0xff]  }
 0x175   :  { %4788 = vmatpush1.bf16.msra.mxu0 %v7538_v63  ;;  %4420 = vmatprep.subr.bf16.mxu1 %v7543_v0  ;;  %v7622_v63 = vld [vmem:[#allocation5 + $0xe40] ss:$8 sps:$4 sm:$0xff]   ;;  %v7627_v0 = vld [vmem:[#allocation5 + $0x554] ss:$8 sps:$4 sm:$0xff]  }
 0x176   :  { %4789 = vmatprep.subr.bf16.mxu0 %v7546_v1  ;;  %v7630_v1 = vld [vmem:[#allocation5 + $0xe54] ss:$8 sps:$4 sm:$0xff]  }
 0x178   :  { %4421 = vmatpush1.bf16.msra.mxu1 %v7541_v2  ;;  %v7625_v2 = vld [vmem:[#allocation5 + $0x550] ss:$8 sps:$4 sm:$0xff]  }
 0x179   :  { %4790 = vmatpush1.bf16.msra.mxu0 %v7544_v3  ;;  %4422 = vmatprep.subr.bf16.mxu1 %v7549_v4  ;;  %v7628_v3 = vld [vmem:[#allocation5 + $0xe50] ss:$8 sps:$4 sm:$0xff]   ;;  %v7633_v4 = vld [vmem:[#allocation5 + $0x564] ss:$8 sps:$4 sm:$0xff]  }
 0x17a   :  { %4791 = vmatprep.subr.bf16.mxu0 %v7552_v5  ;;  %v7636_v5 = vld [vmem:[#allocation5 + $0xe64] ss:$8 sps:$4 sm:$0xff]  }
 0x17c   :  { %4423 = vmatpush1.bf16.msra.mxu1 %v7547_v6  ;;  %v7631_v6 = vld [vmem:[#allocation5 + $0x560] ss:$8 sps:$4 sm:$0xff]  }
 0x17d   :  { %4792 = vmatpush1.bf16.msra.mxu0 %v7550_v7  ;;  %4424 = vmatprep.subr.bf16.mxu1 %v7555_v8  ;;  %v7634_v7 = vld [vmem:[#allocation5 + $0xe60] ss:$8 sps:$4 sm:$0xff]   ;;  %v7639_v8 = vld [vmem:[#allocation5 + $0x574] ss:$8 sps:$4 sm:$0xff]  }
 0x17e   :  { %4793 = vmatprep.subr.bf16.mxu0 %v7558_v9  ;;  %v7642_v9 = vld [vmem:[#allocation5 + $0xe74] ss:$8 sps:$4 sm:$0xff]  }
 0x180   :  { %4425 = vmatpush1.bf16.msra.mxu1 %v7553_v10  ;;  %v7637_v10 = vld [vmem:[#allocation5 + $0x570] ss:$8 sps:$4 sm:$0xff]  }
 0x181   :  { %4794 = vmatpush1.bf16.msra.mxu0 %v7556_v11  ;;  %4426 = vmatprep.subr.bf16.mxu1 %v7561_v12  ;;  %v7640_v11 = vld [vmem:[#allocation5 + $0xe70] ss:$8 sps:$4 sm:$0xff]   ;;  %v7645_v12 = vld [vmem:[#allocation5 + $0x584] ss:$8 sps:$4 sm:$0xff]  }
 0x182   :  { %4795 = vmatprep.subr.bf16.mxu0 %v7564_v13  ;;  %v7648_v13 = vld [vmem:[#allocation5 + $0xe84] ss:$8 sps:$4 sm:$0xff]  }
 0x184   :  { %4427 = vmatpush1.bf16.msra.mxu1 %v7559_v14  ;;  %v7643_v14 = vld [vmem:[#allocation5 + $0x580] ss:$8 sps:$4 sm:$0xff]  }
 0x185   :  { %4796 = vmatpush1.bf16.msra.mxu0 %v7562_v15  ;;  %4428 = vmatprep.subr.bf16.mxu1 %v7567_v16  ;;  %v7646_v15 = vld [vmem:[#allocation5 + $0xe80] ss:$8 sps:$4 sm:$0xff]   ;;  %v7651_v16 = vld [vmem:[#allocation5 + $0x594] ss:$8 sps:$4 sm:$0xff]  }
 0x186   :  { %4797 = vmatprep.subr.bf16.mxu0 %v7570_v17  ;;  %v7654_v17 = vld [vmem:[#allocation5 + $0xe94] ss:$8 sps:$4 sm:$0xff]  }
 0x188   :  { %4429 = vmatpush1.bf16.msra.mxu1 %v7565_v18  ;;  %v7649_v18 = vld [vmem:[#allocation5 + $0x590] ss:$8 sps:$4 sm:$0xff]  }
 0x189   :  { %4798 = vmatpush1.bf16.msra.mxu0 %v7568_v19  ;;  %4430 = vmatprep.subr.bf16.mxu1 %v7573_v20  ;;  %v7652_v19 = vld [vmem:[#allocation5 + $0xe90] ss:$8 sps:$4 sm:$0xff]   ;;  %v7657_v20 = vld [vmem:[#allocation5 + $0x5a4] ss:$8 sps:$4 sm:$0xff]  }
 0x18a   :  { %4799 = vmatprep.subr.bf16.mxu0 %v7576_v21  ;;  %v7660_v21 = vld [vmem:[#allocation5 + $0xea4] ss:$8 sps:$4 sm:$0xff]  }
 0x18c   :  { %4431 = vmatpush1.bf16.msra.mxu1 %v7571_v22  ;;  %v7655_v22 = vld [vmem:[#allocation5 + $0x5a0] ss:$8 sps:$4 sm:$0xff]  }
 0x18d   :  { %4800 = vmatpush1.bf16.msra.mxu0 %v7574_v23  ;;  %4432 = vmatprep.subr.bf16.mxu1 %v7579_v24  ;;  %v7658_v23 = vld [vmem:[#allocation5 + $0xea0] ss:$8 sps:$4 sm:$0xff]   ;;  %v7663_v24 = vld [vmem:[#allocation5 + $0x5b4] ss:$8 sps:$4 sm:$0xff]  }
 0x18e   :  { %4801 = vmatprep.subr.bf16.mxu0 %v7582_v25  ;;  %v7666_v25 = vld [vmem:[#allocation5 + $0xeb4] ss:$8 sps:$4 sm:$0xff]  }
 0x190   :  { %4433 = vmatpush1.bf16.msra.mxu1 %v7577_v26  ;;  %v7661_v26 = vld [vmem:[#allocation5 + $0x5b0] ss:$8 sps:$4 sm:$0xff]  }
 0x191   :  { %4802 = vmatpush1.bf16.msra.mxu0 %v7580_v27  ;;  %4434 = vmatprep.subr.bf16.mxu1 %v7585_v28  ;;  %v7664_v27 = vld [vmem:[#allocation5 + $0xeb0] ss:$8 sps:$4 sm:$0xff]   ;;  %v7669_v28 = vld [vmem:[#allocation5 + $0x5c4] ss:$8 sps:$4 sm:$0xff]  }
 0x192   :  { %4803 = vmatprep.subr.bf16.mxu0 %v7588_v29  ;;  %v7672_v29 = vld [vmem:[#allocation5 + $0xec4] ss:$8 sps:$4 sm:$0xff]  }
 0x194   :  { %4435 = vmatpush1.bf16.msra.mxu1 %v7583_v30  ;;  %v7667_v30 = vld [vmem:[#allocation5 + $0x5c0] ss:$8 sps:$4 sm:$0xff]  }
 0x195   :  { %4804 = vmatpush1.bf16.msra.mxu0 %v7586_v31  ;;  %4436 = vmatprep.subr.bf16.mxu1 %v7591_v32  ;;  %v7670_v31 = vld [vmem:[#allocation5 + $0xec0] ss:$8 sps:$4 sm:$0xff]   ;;  %v7675_v32 = vld [vmem:[#allocation5 + $0x5d4] ss:$8 sps:$4 sm:$0xff]  }
 0x196   :  { %4805 = vmatprep.subr.bf16.mxu0 %v7594_v33  ;;  %v7678_v33 = vld [vmem:[#allocation5 + $0xed4] ss:$8 sps:$4 sm:$0xff]  }
 0x198   :  { %4437 = vmatpush1.bf16.msra.mxu1 %v7589_v34  ;;  %v7673_v34 = vld [vmem:[#allocation5 + $0x5d0] ss:$8 sps:$4 sm:$0xff]  }
 0x199   :  { %4806 = vmatpush1.bf16.msra.mxu0 %v7592_v35  ;;  %4447 = vmatprep.subr.bf16.mxu1 %v7597_v36  ;;  %v7676_v35 = vld [vmem:[#allocation5 + $0xed0] ss:$8 sps:$4 sm:$0xff]   ;;  %v7681_v36 = vld [vmem:[#allocation5 + $0x5e4] ss:$8 sps:$4 sm:$0xff]  }
 0x19a   :  { %4816 = vmatprep.subr.bf16.mxu0 %v7600_v37  ;;  %v7684_v37 = vld [vmem:[#allocation5 + $0xee4] ss:$8 sps:$4 sm:$0xff]  }
 0x19b   :  { %4439 = vmatmul.mubr.bf16.vlgmr.msra.gmra.mrb[0].mxu1 %v135_v42  ;;  %v7685_v42 = vld [vmem:[#allocation5 + $0x5f0] ss:$8 sps:$4 sm:$0xff]  }
 0x19c   :  { %4808 = vmatmul.mubr.bf16.vlgmr.msra.gmra.mrb[0].mxu0 %v153_v43  ;;  %4448 = vmatpush1.bf16.msra.mxu1 %v7595_v44  ;;  %v7688_v43 = vld [vmem:[#allocation5 + $0xef0] ss:$8 sps:$4 sm:$0xff]   ;;  %v7693_v44 = vld [vmem:[#allocation5 + $0x604] ss:$8 sps:$4 sm:$0xff]  }
 0x19d   :  { %4817 = vmatpush1.bf16.msra.mxu0 %v7598_v45  ;;  %4449 = vmatprep.subr.bf16.mxu1 %v7603_v46  ;;  %v7696_v45 = vld [vmem:[#allocation5 + $0xf04] ss:$8 sps:$4 sm:$0xff]   ;;  %v94_v46 = vld [vmem:[#allocation2 + $0x50] sm:$0xff] }
 0x19e   :  { %4818 = vmatprep.subr.bf16.mxu0 %v7606_v47  ;;  %4479 = vmatprep.mubr.bf16.mxu1 %v138_v48  ;;  %v112_v47 = vld [vmem:[#allocation2 + $0xe0] sm:$0xff]  ;;  %v97_v48 = vld [vmem:[#allocation2 + $0x68] sm:$0xff] }
 0x19f   :  { %4848 = vmatprep.mubr.bf16.mxu0 %v156_v49  ;;  %v115_v49 = vld [vmem:[#allocation2 + $0xf8] sm:$0xff] }
 0x1a0   :  { %4450 = vmatpush1.bf16.msra.mxu1 %v7601_v50  ;;  %v137_v50 = vpack.c.bf16 %v94_v46, %v94_v46  ;;  %v7775_v46 = vld [vmem:[#allocation5 + $0x6e0] ss:$8 sps:$4 sm:$0xff]  }
 0x1a1   :  { %4819 = vmatpush1.bf16.msra.mxu0 %v7604_v51  ;;  %4451 = vmatprep.subr.bf16.mxu1 %v7609_v52  ;;  %v155_v51 = vpack.c.bf16 %v112_v47, %v112_v47  ;;  %v7691_v52 = vld [vmem:[#allocation5 + $0x600] ss:$8 sps:$4 sm:$0xff]  }
 0x1a2   :  { %4820 = vmatprep.subr.bf16.mxu0 %v7612_v53  ;;  %v7694_v53 = vld [vmem:[#allocation5 + $0xf00] ss:$8 sps:$4 sm:$0xff]  }
 0x1a3   :  { %v7778_v47 = vld [vmem:[#allocation5 + $0xfe0] ss:$8 sps:$4 sm:$0xff]  }
 0x1a4   :  { %4452 = vmatpush1.bf16.msra.mxu1 %v7607_v54  ;;  %v7699_v54 = vld [vmem:[#allocation5 + $0x614] ss:$8 sps:$4 sm:$0xff]  }
 0x1a5   :  { %4821 = vmatpush1.bf16.msra.mxu0 %v7610_v55  ;;  %4453 = vmatprep.subr.bf16.mxu1 %v7615_v56  ;;  %v7702_v55 = vld [vmem:[#allocation5 + $0xf14] ss:$8 sps:$4 sm:$0xff]   ;;  %v140_v56 = vpack.c.bf16 %v97_v48, %v97_v48 }
 0x1a6   :  { %4822 = vmatprep.subr.bf16.mxu0 %v7618_v57  ;;  %v158_v57 = vpack.c.bf16 %v115_v49, %v115_v49  ;;  %v7783_v48 = vld [vmem:[#allocation5 + $0x6f4] ss:$8 sps:$4 sm:$0xff]  }
 0x1a7   :  { %v7786_v49 = vld [vmem:[#allocation5 + $0xff4] ss:$8 sps:$4 sm:$0xff]  }
 0x1a8   :  { %4454 = vmatpush1.bf16.msra.mxu1 %v7613_v58  ;;  %v7697_v58 = vld [vmem:[#allocation5 + $0x610] ss:$8 sps:$4 sm:$0xff]  }
 0x1a9   :  { %4823 = vmatpush1.bf16.msra.mxu0 %v7616_v59  ;;  %4455 = vmatprep.subr.bf16.mxu1 %v7621_v60  ;;  %v7700_v59 = vld [vmem:[#allocation5 + $0xf10] ss:$8 sps:$4 sm:$0xff]   ;;  %v7705_v60 = vld [vmem:[#allocation5 + $0x624] ss:$8 sps:$4 sm:$0xff]  }
 0x1aa   :  { %4824 = vmatprep.subr.bf16.mxu0 %v7624_v61  ;;  %v7708_v61 = vld [vmem:[#allocation5 + $0xf24] ss:$8 sps:$4 sm:$0xff]  }
 0x1ac   :  { %4456 = vmatpush1.bf16.msra.mxu1 %v7619_v62  ;;  %v7703_v62 = vld [vmem:[#allocation5 + $0x620] ss:$8 sps:$4 sm:$0xff]  }
 0x1ad   :  { %4825 = vmatpush1.bf16.msra.mxu0 %v7622_v63  ;;  %4457 = vmatprep.subr.bf16.mxu1 %v7627_v0  ;;  %v7706_v63 = vld [vmem:[#allocation5 + $0xf20] ss:$8 sps:$4 sm:$0xff]   ;;  %v7711_v0 = vld [vmem:[#allocation5 + $0x634] ss:$8 sps:$4 sm:$0xff]  }
 0x1ae   :  { %4826 = vmatprep.subr.bf16.mxu0 %v7630_v1  ;;  %v7714_v1 = vld [vmem:[#allocation5 + $0xf34] ss:$8 sps:$4 sm:$0xff]  }
 0x1b0   :  { %4458 = vmatpush1.bf16.msra.mxu1 %v7625_v2  ;;  %v7709_v2 = vld [vmem:[#allocation5 + $0x630] ss:$8 sps:$4 sm:$0xff]  }
 0x1b1   :  { %4827 = vmatpush1.bf16.msra.mxu0 %v7628_v3  ;;  %4459 = vmatprep.subr.bf16.mxu1 %v7633_v4  ;;  %v7712_v3 = vld [vmem:[#allocation5 + $0xf30] ss:$8 sps:$4 sm:$0xff]   ;;  %v7717_v4 = vld [vmem:[#allocation5 + $0x644] ss:$8 sps:$4 sm:$0xff]  }
 0x1b2   :  { %4828 = vmatprep.subr.bf16.mxu0 %v7636_v5  ;;  %v7720_v5 = vld [vmem:[#allocation5 + $0xf44] ss:$8 sps:$4 sm:$0xff]  }
 0x1b4   :  { %4460 = vmatpush1.bf16.msra.mxu1 %v7631_v6  ;;  %v7715_v6 = vld [vmem:[#allocation5 + $0x640] ss:$8 sps:$4 sm:$0xff]  }
 0x1b5   :  { %4829 = vmatpush1.bf16.msra.mxu0 %v7634_v7  ;;  %4461 = vmatprep.subr.bf16.mxu1 %v7639_v8  ;;  %v7718_v7 = vld [vmem:[#allocation5 + $0xf40] ss:$8 sps:$4 sm:$0xff]   ;;  %v7723_v8 = vld [vmem:[#allocation5 + $0x654] ss:$8 sps:$4 sm:$0xff]  }
 0x1b6   :  { %4830 = vmatprep.subr.bf16.mxu0 %v7642_v9  ;;  %v7726_v9 = vld [vmem:[#allocation5 + $0xf54] ss:$8 sps:$4 sm:$0xff]  }
 0x1b8   :  { %4462 = vmatpush1.bf16.msra.mxu1 %v7637_v10  ;;  %v7721_v10 = vld [vmem:[#allocation5 + $0x650] ss:$8 sps:$4 sm:$0xff]  }
 0x1b9   :  { %4831 = vmatpush1.bf16.msra.mxu0 %v7640_v11  ;;  %4463 = vmatprep.subr.bf16.mxu1 %v7645_v12  ;;  %v7724_v11 = vld [vmem:[#allocation5 + $0xf50] ss:$8 sps:$4 sm:$0xff]   ;;  %v7729_v12 = vld [vmem:[#allocation5 + $0x664] ss:$8 sps:$4 sm:$0xff]  }
 0x1ba   :  { %4832 = vmatprep.subr.bf16.mxu0 %v7648_v13  ;;  %v7732_v13 = vld [vmem:[#allocation5 + $0xf64] ss:$8 sps:$4 sm:$0xff]  }
 0x1bc   :  { %4464 = vmatpush1.bf16.msra.mxu1 %v7643_v14  ;;  %v7727_v14 = vld [vmem:[#allocation5 + $0x660] ss:$8 sps:$4 sm:$0xff]  }
 0x1bd   :  { %4833 = vmatpush1.bf16.msra.mxu0 %v7646_v15  ;;  %4465 = vmatprep.subr.bf16.mxu1 %v7651_v16  ;;  %v7730_v15 = vld [vmem:[#allocation5 + $0xf60] ss:$8 sps:$4 sm:$0xff]   ;;  %v7735_v16 = vld [vmem:[#allocation5 + $0x674] ss:$8 sps:$4 sm:$0xff]  }
 0x1be   :  { %4834 = vmatprep.subr.bf16.mxu0 %v7654_v17  ;;  %v7738_v17 = vld [vmem:[#allocation5 + $0xf74] ss:$8 sps:$4 sm:$0xff]  }
 0x1c0   :  { %4466 = vmatpush1.bf16.msra.mxu1 %v7649_v18  ;;  %v7733_v18 = vld [vmem:[#allocation5 + $0x670] ss:$8 sps:$4 sm:$0xff]  }
 0x1c1   :  { %4835 = vmatpush1.bf16.msra.mxu0 %v7652_v19  ;;  %4467 = vmatprep.subr.bf16.mxu1 %v7657_v20  ;;  %v7736_v19 = vld [vmem:[#allocation5 + $0xf70] ss:$8 sps:$4 sm:$0xff]   ;;  %v7741_v20 = vld [vmem:[#allocation5 + $0x684] ss:$8 sps:$4 sm:$0xff]  }
 0x1c2   :  { %4836 = vmatprep.subr.bf16.mxu0 %v7660_v21  ;;  %v7744_v21 = vld [vmem:[#allocation5 + $0xf84] ss:$8 sps:$4 sm:$0xff]  }
 0x1c4   :  { %4468 = vmatpush1.bf16.msra.mxu1 %v7655_v22  ;;  %v7739_v22 = vld [vmem:[#allocation5 + $0x680] ss:$8 sps:$4 sm:$0xff]  }
 0x1c5   :  { %4837 = vmatpush1.bf16.msra.mxu0 %v7658_v23  ;;  %4469 = vmatprep.subr.bf16.mxu1 %v7663_v24  ;;  %v7742_v23 = vld [vmem:[#allocation5 + $0xf80] ss:$8 sps:$4 sm:$0xff]   ;;  %v7747_v24 = vld [vmem:[#allocation5 + $0x694] ss:$8 sps:$4 sm:$0xff]  }
 0x1c6   :  { %4838 = vmatprep.subr.bf16.mxu0 %v7666_v25  ;;  %v7750_v25 = vld [vmem:[#allocation5 + $0xf94] ss:$8 sps:$4 sm:$0xff]  }
 0x1c8   :  { %4470 = vmatpush1.bf16.msra.mxu1 %v7661_v26  ;;  %v7745_v26 = vld [vmem:[#allocation5 + $0x690] ss:$8 sps:$4 sm:$0xff]  }
 0x1c9   :  { %4839 = vmatpush1.bf16.msra.mxu0 %v7664_v27  ;;  %4471 = vmatprep.subr.bf16.mxu1 %v7669_v28  ;;  %v7748_v27 = vld [vmem:[#allocation5 + $0xf90] ss:$8 sps:$4 sm:$0xff]   ;;  %v7753_v28 = vld [vmem:[#allocation5 + $0x6a4] ss:$8 sps:$4 sm:$0xff]  }
 0x1ca   :  { %4840 = vmatprep.subr.bf16.mxu0 %v7672_v29  ;;  %v7756_v29 = vld [vmem:[#allocation5 + $0xfa4] ss:$8 sps:$4 sm:$0xff]  }
 0x1cc   :  { %4472 = vmatpush1.bf16.msra.mxu1 %v7667_v30  ;;  %v7751_v30 = vld [vmem:[#allocation5 + $0x6a0] ss:$8 sps:$4 sm:$0xff]  }
 0x1cd   :  { %4841 = vmatpush1.bf16.msra.mxu0 %v7670_v31  ;;  %4473 = vmatprep.subr.bf16.mxu1 %v7675_v32  ;;  %v7754_v31 = vld [vmem:[#allocation5 + $0xfa0] ss:$8 sps:$4 sm:$0xff]   ;;  %v7759_v32 = vld [vmem:[#allocation5 + $0x6b4] ss:$8 sps:$4 sm:$0xff]  }
 0x1ce   :  { %4842 = vmatprep.subr.bf16.mxu0 %v7678_v33  ;;  %v7762_v33 = vld [vmem:[#allocation5 + $0xfb4] ss:$8 sps:$4 sm:$0xff]  }
 0x1d0   :  { %4474 = vmatpush1.bf16.msra.mxu1 %v7673_v34  ;;  %v7757_v34 = vld [vmem:[#allocation5 + $0x6b0] ss:$8 sps:$4 sm:$0xff]  }
 0x1d1   :  { %4843 = vmatpush1.bf16.msra.mxu0 %v7676_v35  ;;  %4475 = vmatprep.subr.bf16.mxu1 %v7681_v36  ;;  %v7760_v35 = vld [vmem:[#allocation5 + $0xfb0] ss:$8 sps:$4 sm:$0xff]   ;;  %v7765_v36 = vld [vmem:[#allocation5 + $0x6c4] ss:$8 sps:$4 sm:$0xff]  }
 0x1d2   :  { %4844 = vmatprep.subr.bf16.mxu0 %v7684_v37  ;;  %v7768_v37 = vld [vmem:[#allocation5 + $0xfc4] ss:$8 sps:$4 sm:$0xff]  }
 0x1d4   :  { %4476 = vmatpush1.bf16.msra.mxu1 %v7679_v38  ;;  %v7763_v38 = vld [vmem:[#allocation5 + $0x6c0] ss:$8 sps:$4 sm:$0xff]  }
 0x1d5   :  { %4845 = vmatpush1.bf16.msra.mxu0 %v7682_v39  ;;  %4477 = vmatprep.subr.bf16.mxu1 %v7687_v40  ;;  %v7766_v39 = vld [vmem:[#allocation5 + $0xfc0] ss:$8 sps:$4 sm:$0xff]   ;;  %v7771_v40 = vld [vmem:[#allocation5 + $0x6d4] ss:$8 sps:$4 sm:$0xff]  }
 0x1d6   :  { %4846 = vmatprep.subr.bf16.mxu0 %v7690_v41  ;;  %v7774_v41 = vld [vmem:[#allocation5 + $0xfd4] ss:$8 sps:$4 sm:$0xff]  }
 0x1d8   :  { %4478 = vmatpush1.bf16.msra.mxu1 %v7685_v42  ;;  %v7769_v42 = vld [vmem:[#allocation5 + $0x6d0] ss:$8 sps:$4 sm:$0xff]  }
 0x1d9   :  { %4847 = vmatpush1.bf16.msra.mxu0 %v7688_v43  ;;  %4488 = vmatprep.subr.bf16.mxu1 %v7693_v44  ;;  %v7772_v43 = vld [vmem:[#allocation5 + $0xfd0] ss:$8 sps:$4 sm:$0xff]   ;;  %v7777_v44 = vld [vmem:[#allocation5 + $0x6e4] ss:$8 sps:$4 sm:$0xff]  }
 0x1da   :  { %4857 = vmatprep.subr.bf16.mxu0 %v7696_v45  ;;  %v7780_v45 = vld [vmem:[#allocation5 + $0xfe4] ss:$8 sps:$4 sm:$0xff]  }
 0x1db   :  { %4480 = vmatmul.mubr.bf16.vlgmr.msra.gmra.mrb[0].mxu1 %v137_v50  ;;  %v7781_v50 = vld [vmem:[#allocation5 + $0x6f0] ss:$8 sps:$4 sm:$0xff]  }
 0x1dc   :  { %4849 = vmatmul.mubr.bf16.vlgmr.msra.gmra.mrb[0].mxu0 %v155_v51  ;;  %4489 = vmatpush1.bf16.msra.mxu1 %v7691_v52  ;;  %v7784_v51 = vld [vmem:[#allocation5 + $0xff0] ss:$8 sps:$4 sm:$0xff]   ;;  %v96_v52 = vld [vmem:[#allocation2 + $0x60] sm:$0xff] }
 0x1dd   :  { %4858 = vmatpush1.bf16.msra.mxu0 %v7694_v53  ;;  %4490 = vmatprep.subr.bf16.mxu1 %v7699_v54  ;;  %v114_v53 = vld [vmem:[#allocation2 + $0xf0] sm:$0xff]  ;;  %v7789_v54 = vld [vmem:[#allocation5 + $0x704] ss:$8 sps:$4 sm:$0xff]  }
 0x1de   :  { %4859 = vmatprep.subr.bf16.mxu0 %v7702_v55  ;;  %4520 = vmatprep.mubr.bf16.mxu1 %v140_v56  ;;  %v7792_v55 = vld [vmem:[#allocation5 + $0x1004] ss:$8 sps:$4 sm:$0xff]   ;;  %v139_v56 = vpack.c.bf16 %v96_v52, %v96_v52 }
 0x1df   :  { %4889 = vmatprep.mubr.bf16.mxu0 %v158_v57  ;;  %v157_v57 = vpack.c.bf16 %v114_v53, %v114_v53  ;;  %v7873_v52 = vld [vmem:[#allocation5 + $0x7e4] ss:$8 sps:$4 sm:$0xff]  }
 0x1e0   :  { %4491 = vmatpush1.bf16.msra.mxu1 %v7697_v58  ;;  %v99_v58 = vld [vmem:[#allocation2 + $0x78] sm:$0xff] }
 0x1e1   :  { %4860 = vmatpush1.bf16.msra.mxu0 %v7700_v59  ;;  %4492 = vmatprep.subr.bf16.mxu1 %v7705_v60  ;;  %v117_v59 = vld [vmem:[#allocation2 + $0x108] sm:$0xff]  ;;  %v7787_v60 = vld [vmem:[#allocation5 + $0x700] ss:$8 sps:$4 sm:$0xff]   ;;  %v7876_v53 = vld [vmem:[#allocation5 + $0x10e4] ss:$8 sps:$4 sm:$0xff]  }
 0x1e2   :  { %4861 = vmatprep.subr.bf16.mxu0 %v7708_v61  ;;  %v7790_v61 = vld [vmem:[#allocation5 + $0x1000] ss:$8 sps:$4 sm:$0xff]  }
 0x1e4   :  { %4493 = vmatpush1.bf16.msra.mxu1 %v7703_v62  ;;  %v7795_v62 = vld [vmem:[#allocation5 + $0x714] ss:$8 sps:$4 sm:$0xff]  }
 0x1e5   :  { %4862 = vmatpush1.bf16.msra.mxu0 %v7706_v63  ;;  %4494 = vmatprep.subr.bf16.mxu1 %v7711_v0  ;;  %v7798_v63 = vld [vmem:[#allocation5 + $0x1014] ss:$8 sps:$4 sm:$0xff]   ;;  %v142_v0 = vpack.c.bf16 %v99_v58, %v99_v58  ;;  %v7877_v58 = vld [vmem:[#allocation5 + $0x7f0] ss:$8 sps:$4 sm:$0xff]  }
 0x1e6   :  { %4863 = vmatprep.subr.bf16.mxu0 %v7714_v1  ;;  %v160_v1 = vpack.c.bf16 %v117_v59, %v117_v59  ;;  %v7880_v59 = vld [vmem:[#allocation5 + $0x10f0] ss:$8 sps:$4 sm:$0xff]  }
 0x1e8   :  { %4495 = vmatpush1.bf16.msra.mxu1 %v7709_v2  ;;  %v7793_v2 = vld [vmem:[#allocation5 + $0x710] ss:$8 sps:$4 sm:$0xff]  }
 0x1e9   :  { %4864 = vmatpush1.bf16.msra.mxu0 %v7712_v3  ;;  %4496 = vmatprep.subr.bf16.mxu1 %v7717_v4  ;;  %v7796_v3 = vld [vmem:[#allocation5 + $0x1010] ss:$8 sps:$4 sm:$0xff]   ;;  %v7801_v4 = vld [vmem:[#allocation5 + $0x724] ss:$8 sps:$4 sm:$0xff]  }
 0x1ea   :  { %4865 = vmatprep.subr.bf16.mxu0 %v7720_v5  ;;  %v7804_v5 = vld [vmem:[#allocation5 + $0x1024] ss:$8 sps:$4 sm:$0xff]  }
 0x1ec   :  { %4497 = vmatpush1.bf16.msra.mxu1 %v7715_v6  ;;  %v7799_v6 = vld [vmem:[#allocation5 + $0x720] ss:$8 sps:$4 sm:$0xff]  }
 0x1ed   :  { %4866 = vmatpush1.bf16.msra.mxu0 %v7718_v7  ;;  %4498 = vmatprep.subr.bf16.mxu1 %v7723_v8  ;;  %v7802_v7 = vld [vmem:[#allocation5 + $0x1020] ss:$8 sps:$4 sm:$0xff]   ;;  %v7807_v8 = vld [vmem:[#allocation5 + $0x734] ss:$8 sps:$4 sm:$0xff]  }
 0x1ee   :  { %4867 = vmatprep.subr.bf16.mxu0 %v7726_v9  ;;  %v7810_v9 = vld [vmem:[#allocation5 + $0x1034] ss:$8 sps:$4 sm:$0xff]  }
 0x1f0   :  { %4499 = vmatpush1.bf16.msra.mxu1 %v7721_v10  ;;  %v7805_v10 = vld [vmem:[#allocation5 + $0x730] ss:$8 sps:$4 sm:$0xff]  }
 0x1f1   :  { %4868 = vmatpush1.bf16.msra.mxu0 %v7724_v11  ;;  %4500 = vmatprep.subr.bf16.mxu1 %v7729_v12  ;;  %v7808_v11 = vld [vmem:[#allocation5 + $0x1030] ss:$8 sps:$4 sm:$0xff]   ;;  %v7813_v12 = vld [vmem:[#allocation5 + $0x744] ss:$8 sps:$4 sm:$0xff]  }
 0x1f2   :  { %4869 = vmatprep.subr.bf16.mxu0 %v7732_v13  ;;  %v7816_v13 = vld [vmem:[#allocation5 + $0x1044] ss:$8 sps:$4 sm:$0xff]  }
 0x1f4   :  { %4501 = vmatpush1.bf16.msra.mxu1 %v7727_v14  ;;  %v7811_v14 = vld [vmem:[#allocation5 + $0x740] ss:$8 sps:$4 sm:$0xff]  }
 0x1f5   :  { %4870 = vmatpush1.bf16.msra.mxu0 %v7730_v15  ;;  %4502 = vmatprep.subr.bf16.mxu1 %v7735_v16  ;;  %v7814_v15 = vld [vmem:[#allocation5 + $0x1040] ss:$8 sps:$4 sm:$0xff]   ;;  %v7819_v16 = vld [vmem:[#allocation5 + $0x754] ss:$8 sps:$4 sm:$0xff]  }
 0x1f6   :  { %4871 = vmatprep.subr.bf16.mxu0 %v7738_v17  ;;  %v7822_v17 = vld [vmem:[#allocation5 + $0x1054] ss:$8 sps:$4 sm:$0xff]  }
 0x1f8   :  { %4503 = vmatpush1.bf16.msra.mxu1 %v7733_v18  ;;  %v7817_v18 = vld [vmem:[#allocation5 + $0x750] ss:$8 sps:$4 sm:$0xff]  }
 0x1f9   :  { %4872 = vmatpush1.bf16.msra.mxu0 %v7736_v19  ;;  %4504 = vmatprep.subr.bf16.mxu1 %v7741_v20  ;;  %v7820_v19 = vld [vmem:[#allocation5 + $0x1050] ss:$8 sps:$4 sm:$0xff]   ;;  %v7825_v20 = vld [vmem:[#allocation5 + $0x764] ss:$8 sps:$4 sm:$0xff]  }
 0x1fa   :  { %4873 = vmatprep.subr.bf16.mxu0 %v7744_v21  ;;  %v7828_v21 = vld [vmem:[#allocation5 + $0x1064] ss:$8 sps:$4 sm:$0xff]  }
 0x1fc   :  { %4505 = vmatpush1.bf16.msra.mxu1 %v7739_v22  ;;  %v7823_v22 = vld [vmem:[#allocation5 + $0x760] ss:$8 sps:$4 sm:$0xff]  }
 0x1fd   :  { %4874 = vmatpush1.bf16.msra.mxu0 %v7742_v23  ;;  %4506 = vmatprep.subr.bf16.mxu1 %v7747_v24  ;;  %v7826_v23 = vld [vmem:[#allocation5 + $0x1060] ss:$8 sps:$4 sm:$0xff]   ;;  %v7831_v24 = vld [vmem:[#allocation5 + $0x774] ss:$8 sps:$4 sm:$0xff]  }
 0x1fe   :  { %4875 = vmatprep.subr.bf16.mxu0 %v7750_v25  ;;  %v7834_v25 = vld [vmem:[#allocation5 + $0x1074] ss:$8 sps:$4 sm:$0xff]  }
 0x200   :  { %4507 = vmatpush1.bf16.msra.mxu1 %v7745_v26  ;;  %v7829_v26 = vld [vmem:[#allocation5 + $0x770] ss:$8 sps:$4 sm:$0xff]  }
 0x201   :  { %4876 = vmatpush1.bf16.msra.mxu0 %v7748_v27  ;;  %4508 = vmatprep.subr.bf16.mxu1 %v7753_v28  ;;  %v7832_v27 = vld [vmem:[#allocation5 + $0x1070] ss:$8 sps:$4 sm:$0xff]   ;;  %v7837_v28 = vld [vmem:[#allocation5 + $0x784] ss:$8 sps:$4 sm:$0xff]  }
 0x202   :  { %4877 = vmatprep.subr.bf16.mxu0 %v7756_v29  ;;  %v7840_v29 = vld [vmem:[#allocation5 + $0x1084] ss:$8 sps:$4 sm:$0xff]  }
 0x204   :  { %4509 = vmatpush1.bf16.msra.mxu1 %v7751_v30  ;;  %v7835_v30 = vld [vmem:[#allocation5 + $0x780] ss:$8 sps:$4 sm:$0xff]  }
 0x205   :  { %4878 = vmatpush1.bf16.msra.mxu0 %v7754_v31  ;;  %4510 = vmatprep.subr.bf16.mxu1 %v7759_v32  ;;  %v7838_v31 = vld [vmem:[#allocation5 + $0x1080] ss:$8 sps:$4 sm:$0xff]   ;;  %v7843_v32 = vld [vmem:[#allocation5 + $0x794] ss:$8 sps:$4 sm:$0xff]  }
 0x206   :  { %4879 = vmatprep.subr.bf16.mxu0 %v7762_v33  ;;  %v7846_v33 = vld [vmem:[#allocation5 + $0x1094] ss:$8 sps:$4 sm:$0xff]  }
 0x208   :  { %4511 = vmatpush1.bf16.msra.mxu1 %v7757_v34  ;;  %v7841_v34 = vld [vmem:[#allocation5 + $0x790] ss:$8 sps:$4 sm:$0xff]  }
 0x209   :  { %4880 = vmatpush1.bf16.msra.mxu0 %v7760_v35  ;;  %4512 = vmatprep.subr.bf16.mxu1 %v7765_v36  ;;  %v7844_v35 = vld [vmem:[#allocation5 + $0x1090] ss:$8 sps:$4 sm:$0xff]   ;;  %v7849_v36 = vld [vmem:[#allocation5 + $0x7a4] ss:$8 sps:$4 sm:$0xff]  }
 0x20a   :  { %4881 = vmatprep.subr.bf16.mxu0 %v7768_v37  ;;  %v7852_v37 = vld [vmem:[#allocation5 + $0x10a4] ss:$8 sps:$4 sm:$0xff]  }
 0x20c   :  { %4513 = vmatpush1.bf16.msra.mxu1 %v7763_v38  ;;  %v7847_v38 = vld [vmem:[#allocation5 + $0x7a0] ss:$8 sps:$4 sm:$0xff]  }
 0x20d   :  { %4882 = vmatpush1.bf16.msra.mxu0 %v7766_v39  ;;  %4514 = vmatprep.subr.bf16.mxu1 %v7771_v40  ;;  %v7850_v39 = vld [vmem:[#allocation5 + $0x10a0] ss:$8 sps:$4 sm:$0xff]   ;;  %v7855_v40 = vld [vmem:[#allocation5 + $0x7b4] ss:$8 sps:$4 sm:$0xff]  }
 0x20e   :  { %4883 = vmatprep.subr.bf16.mxu0 %v7774_v41  ;;  %v7858_v41 = vld [vmem:[#allocation5 + $0x10b4] ss:$8 sps:$4 sm:$0xff]  }
 0x210   :  { %4515 = vmatpush1.bf16.msra.mxu1 %v7769_v42  ;;  %v7853_v42 = vld [vmem:[#allocation5 + $0x7b0] ss:$8 sps:$4 sm:$0xff]  }
 0x211   :  { %4884 = vmatpush1.bf16.msra.mxu0 %v7772_v43  ;;  %4516 = vmatprep.subr.bf16.mxu1 %v7777_v44  ;;  %v7856_v43 = vld [vmem:[#allocation5 + $0x10b0] ss:$8 sps:$4 sm:$0xff]   ;;  %v7861_v44 = vld [vmem:[#allocation5 + $0x7c4] ss:$8 sps:$4 sm:$0xff]  }
 0x212   :  { %4885 = vmatprep.subr.bf16.mxu0 %v7780_v45  ;;  %v7864_v45 = vld [vmem:[#allocation5 + $0x10c4] ss:$8 sps:$4 sm:$0xff]  }
 0x214   :  { %4517 = vmatpush1.bf16.msra.mxu1 %v7775_v46  ;;  %v7859_v46 = vld [vmem:[#allocation5 + $0x7c0] ss:$8 sps:$4 sm:$0xff]  }
 0x215   :  { %4886 = vmatpush1.bf16.msra.mxu0 %v7778_v47  ;;  %4518 = vmatprep.subr.bf16.mxu1 %v7783_v48  ;;  %v7862_v47 = vld [vmem:[#allocation5 + $0x10c0] ss:$8 sps:$4 sm:$0xff]   ;;  %v7867_v48 = vld [vmem:[#allocation5 + $0x7d4] ss:$8 sps:$4 sm:$0xff]  }
 0x216   :  { %4887 = vmatprep.subr.bf16.mxu0 %v7786_v49  ;;  %v7870_v49 = vld [vmem:[#allocation5 + $0x10d4] ss:$8 sps:$4 sm:$0xff]  }
 0x218   :  { %4519 = vmatpush1.bf16.msra.mxu1 %v7781_v50  ;;  %v7865_v50 = vld [vmem:[#allocation5 + $0x7d0] ss:$8 sps:$4 sm:$0xff]  }
 0x219   :  { %4888 = vmatpush1.bf16.msra.mxu0 %v7784_v51  ;;  %4529 = vmatprep.subr.bf16.mxu1 %v7789_v54  ;;  %v7868_v51 = vld [vmem:[#allocation5 + $0x10d0] ss:$8 sps:$4 sm:$0xff]   ;;  %v7871_v54 = vld [vmem:[#allocation5 + $0x7e0] ss:$8 sps:$4 sm:$0xff]  }
 0x21a   :  { %4898 = vmatprep.subr.bf16.mxu0 %v7792_v55  ;;  %v7874_v55 = vld [vmem:[#allocation5 + $0x10e0] ss:$8 sps:$4 sm:$0xff]  }
 0x21b   :  { %4521 = vmatmul.mubr.bf16.vlgmr.msra.gmra.mrb[0].mxu1 %v139_v56  ;;  %v7879_v56 = vld [vmem:[#allocation5 + $0x7f4] ss:$8 sps:$4 sm:$0xff]  }
 0x21c   :  { %4890 = vmatmul.mubr.bf16.vlgmr.msra.gmra.mrb[0].mxu0 %v157_v57  ;;  %4530 = vmatpush1.bf16.msra.mxu1 %v7787_v60  ;;  %v7882_v57 = vld [vmem:[#allocation5 + $0x10f4] ss:$8 sps:$4 sm:$0xff]  }
 0x21d   :  { %4899 = vmatpush1.bf16.msra.mxu0 %v7790_v61  ;;  %4531 = vmatprep.subr.bf16.mxu1 %v7795_v62  ;;  %v98_v60 = vld [vmem:[#allocation2 + $0x70] sm:$0xff]  ;;  %v116_v61 = vld [vmem:[#allocation2 + $0x100] sm:$0xff] }
 0x21e   :  { %4900 = vmatprep.subr.bf16.mxu0 %v7798_v63  ;;  %4561 = vmatprep.mubr.bf16.mxu1 %v142_v0  ;;  %v7885_v62 = vld [vmem:[#allocation5 + $0x804] ss:$8 sps:$4 sm:$0xff]   ;;  %v141_v0 = vpack.c.bf16 %v98_v60, %v98_v60 }
 0x21f   :  { %4930 = vmatprep.mubr.bf16.mxu0 %v160_v1  ;;  %v7888_v63 = vld [vmem:[#allocation5 + $0x1104] ss:$8 sps:$4 sm:$0xff]   ;;  %v159_v1 = vpack.c.bf16 %v116_v61, %v116_v61 }
 0x220   :  { %4532 = vmatpush1.bf16.msra.mxu1 %v7793_v2  ;;  %v101_v2 = vld [vmem:[#allocation2 + $0x88] sm:$0xff]  ;;  %v7969_v60 = vld [vmem:[#allocation5 + $0x8e4] ss:$8 sps:$4 sm:$0xff]  }
 0x221   :  { %4901 = vmatpush1.bf16.msra.mxu0 %v7796_v3  ;;  %4533 = vmatprep.subr.bf16.mxu1 %v7801_v4  ;;  %v119_v3 = vld [vmem:[#allocation2 + $0x118] sm:$0xff] }
 0x222   :  { %4902 = vmatprep.subr.bf16.mxu0 %v7804_v5  ;;  %v7883_v4 = vld [vmem:[#allocation5 + $0x800] ss:$8 sps:$4 sm:$0xff]   ;;  %v7972_v61 = vld [vmem:[#allocation5 + $0x11e4] ss:$8 sps:$4 sm:$0xff]  }
 0x223   :  { %v7886_v5 = vld [vmem:[#allocation5 + $0x1100] ss:$8 sps:$4 sm:$0xff]  }
 0x224   :  { %4534 = vmatpush1.bf16.msra.mxu1 %v7799_v6  ;;  %v7891_v6 = vld [vmem:[#allocation5 + $0x814] ss:$8 sps:$4 sm:$0xff]  }
 0x225   :  { %4903 = vmatpush1.bf16.msra.mxu0 %v7802_v7  ;;  %4535 = vmatprep.subr.bf16.mxu1 %v7807_v8  ;;  %v7894_v7 = vld [vmem:[#allocation5 + $0x1114] ss:$8 sps:$4 sm:$0xff]   ;;  %v144_v8 = vpack.c.bf16 %v101_v2, %v101_v2  ;;  %v7973_v2 = vld [vmem:[#allocation5 + $0x8f0] ss:$8 sps:$4 sm:$0xff]  }
 0x226   :  { %4904 = vmatprep.subr.bf16.mxu0 %v7810_v9  ;;  %v162_v9 = vpack.c.bf16 %v119_v3, %v119_v3  ;;  %v7976_v3 = vld [vmem:[#allocation5 + $0x11f0] ss:$8 sps:$4 sm:$0xff]  }
 0x228   :  { %4536 = vmatpush1.bf16.msra.mxu1 %v7805_v10  ;;  %v7889_v10 = vld [vmem:[#allocation5 + $0x810] ss:$8 sps:$4 sm:$0xff]  }
 0x229   :  { %4905 = vmatpush1.bf16.msra.mxu0 %v7808_v11  ;;  %4537 = vmatprep.subr.bf16.mxu1 %v7813_v12  ;;  %v7892_v11 = vld [vmem:[#allocation5 + $0x1110] ss:$8 sps:$4 sm:$0xff]   ;;  %v7897_v12 = vld [vmem:[#allocation5 + $0x824] ss:$8 sps:$4 sm:$0xff]  }
 0x22a   :  { %4906 = vmatprep.subr.bf16.mxu0 %v7816_v13  ;;  %v7900_v13 = vld [vmem:[#allocation5 + $0x1124] ss:$8 sps:$4 sm:$0xff]  }
 0x22c   :  { %4538 = vmatpush1.bf16.msra.mxu1 %v7811_v14  ;;  %v7895_v14 = vld [vmem:[#allocation5 + $0x820] ss:$8 sps:$4 sm:$0xff]  }
 0x22d   :  { %4907 = vmatpush1.bf16.msra.mxu0 %v7814_v15  ;;  %4539 = vmatprep.subr.bf16.mxu1 %v7819_v16  ;;  %v7898_v15 = vld [vmem:[#allocation5 + $0x1120] ss:$8 sps:$4 sm:$0xff]   ;;  %v7903_v16 = vld [vmem:[#allocation5 + $0x834] ss:$8 sps:$4 sm:$0xff]  }
 0x22e   :  { %4908 = vmatprep.subr.bf16.mxu0 %v7822_v17  ;;  %v7906_v17 = vld [vmem:[#allocation5 + $0x1134] ss:$8 sps:$4 sm:$0xff]  }
 0x230   :  { %4540 = vmatpush1.bf16.msra.mxu1 %v7817_v18  ;;  %v7901_v18 = vld [vmem:[#allocation5 + $0x830] ss:$8 sps:$4 sm:$0xff]  }
 0x231   :  { %4909 = vmatpush1.bf16.msra.mxu0 %v7820_v19  ;;  %4541 = vmatprep.subr.bf16.mxu1 %v7825_v20  ;;  %v7904_v19 = vld [vmem:[#allocation5 + $0x1130] ss:$8 sps:$4 sm:$0xff]   ;;  %v7909_v20 = vld [vmem:[#allocation5 + $0x844] ss:$8 sps:$4 sm:$0xff]  }
 0x232   :  { %4910 = vmatprep.subr.bf16.mxu0 %v7828_v21  ;;  %v7912_v21 = vld [vmem:[#allocation5 + $0x1144] ss:$8 sps:$4 sm:$0xff]  }
 0x234   :  { %4542 = vmatpush1.bf16.msra.mxu1 %v7823_v22  ;;  %v7907_v22 = vld [vmem:[#allocation5 + $0x840] ss:$8 sps:$4 sm:$0xff]  }
 0x235   :  { %4911 = vmatpush1.bf16.msra.mxu0 %v7826_v23  ;;  %4543 = vmatprep.subr.bf16.mxu1 %v7831_v24  ;;  %v7910_v23 = vld [vmem:[#allocation5 + $0x1140] ss:$8 sps:$4 sm:$0xff]   ;;  %v7915_v24 = vld [vmem:[#allocation5 + $0x854] ss:$8 sps:$4 sm:$0xff]  }
 0x236   :  { %4912 = vmatprep.subr.bf16.mxu0 %v7834_v25  ;;  %v7918_v25 = vld [vmem:[#allocation5 + $0x1154] ss:$8 sps:$4 sm:$0xff]  }
 0x238   :  { %4544 = vmatpush1.bf16.msra.mxu1 %v7829_v26  ;;  %v7913_v26 = vld [vmem:[#allocation5 + $0x850] ss:$8 sps:$4 sm:$0xff]  }
 0x239   :  { %4913 = vmatpush1.bf16.msra.mxu0 %v7832_v27  ;;  %4545 = vmatprep.subr.bf16.mxu1 %v7837_v28  ;;  %v7916_v27 = vld [vmem:[#allocation5 + $0x1150] ss:$8 sps:$4 sm:$0xff]   ;;  %v7921_v28 = vld [vmem:[#allocation5 + $0x864] ss:$8 sps:$4 sm:$0xff]  }
 0x23a   :  { %4914 = vmatprep.subr.bf16.mxu0 %v7840_v29  ;;  %v7924_v29 = vld [vmem:[#allocation5 + $0x1164] ss:$8 sps:$4 sm:$0xff]  }
 0x23c   :  { %4546 = vmatpush1.bf16.msra.mxu1 %v7835_v30  ;;  %v7919_v30 = vld [vmem:[#allocation5 + $0x860] ss:$8 sps:$4 sm:$0xff]  }
 0x23d   :  { %4915 = vmatpush1.bf16.msra.mxu0 %v7838_v31  ;;  %4547 = vmatprep.subr.bf16.mxu1 %v7843_v32  ;;  %v7922_v31 = vld [vmem:[#allocation5 + $0x1160] ss:$8 sps:$4 sm:$0xff]   ;;  %v7927_v32 = vld [vmem:[#allocation5 + $0x874] ss:$8 sps:$4 sm:$0xff]  }
 0x23e   :  { %4916 = vmatprep.subr.bf16.mxu0 %v7846_v33  ;;  %v7930_v33 = vld [vmem:[#allocation5 + $0x1174] ss:$8 sps:$4 sm:$0xff]  }
 0x240   :  { %4548 = vmatpush1.bf16.msra.mxu1 %v7841_v34  ;;  %v7925_v34 = vld [vmem:[#allocation5 + $0x870] ss:$8 sps:$4 sm:$0xff]  }
 0x241   :  { %4917 = vmatpush1.bf16.msra.mxu0 %v7844_v35  ;;  %4549 = vmatprep.subr.bf16.mxu1 %v7849_v36  ;;  %v7928_v35 = vld [vmem:[#allocation5 + $0x1170] ss:$8 sps:$4 sm:$0xff]   ;;  %v7933_v36 = vld [vmem:[#allocation5 + $0x884] ss:$8 sps:$4 sm:$0xff]  }
 0x242   :  { %4918 = vmatprep.subr.bf16.mxu0 %v7852_v37  ;;  %v7936_v37 = vld [vmem:[#allocation5 + $0x1184] ss:$8 sps:$4 sm:$0xff]  }
 0x244   :  { %4550 = vmatpush1.bf16.msra.mxu1 %v7847_v38  ;;  %v7931_v38 = vld [vmem:[#allocation5 + $0x880] ss:$8 sps:$4 sm:$0xff]  }
 0x245   :  { %4919 = vmatpush1.bf16.msra.mxu0 %v7850_v39  ;;  %4551 = vmatprep.subr.bf16.mxu1 %v7855_v40  ;;  %v7934_v39 = vld [vmem:[#allocation5 + $0x1180] ss:$8 sps:$4 sm:$0xff]   ;;  %v7939_v40 = vld [vmem:[#allocation5 + $0x894] ss:$8 sps:$4 sm:$0xff]  }
 0x246   :  { %4920 = vmatprep.subr.bf16.mxu0 %v7858_v41  ;;  %v7942_v41 = vld [vmem:[#allocation5 + $0x1194] ss:$8 sps:$4 sm:$0xff]  }
 0x248   :  { %4552 = vmatpush1.bf16.msra.mxu1 %v7853_v42  ;;  %v7937_v42 = vld [vmem:[#allocation5 + $0x890] ss:$8 sps:$4 sm:$0xff]  }
 0x249   :  { %4921 = vmatpush1.bf16.msra.mxu0 %v7856_v43  ;;  %4553 = vmatprep.subr.bf16.mxu1 %v7861_v44  ;;  %v7940_v43 = vld [vmem:[#allocation5 + $0x1190] ss:$8 sps:$4 sm:$0xff]   ;;  %v7945_v44 = vld [vmem:[#allocation5 + $0x8a4] ss:$8 sps:$4 sm:$0xff]  }
 0x24a   :  { %4922 = vmatprep.subr.bf16.mxu0 %v7864_v45  ;;  %v7948_v45 = vld [vmem:[#allocation5 + $0x11a4] ss:$8 sps:$4 sm:$0xff]  }
 0x24c   :  { %4554 = vmatpush1.bf16.msra.mxu1 %v7859_v46  ;;  %v7943_v46 = vld [vmem:[#allocation5 + $0x8a0] ss:$8 sps:$4 sm:$0xff]  }
 0x24d   :  { %4923 = vmatpush1.bf16.msra.mxu0 %v7862_v47  ;;  %4555 = vmatprep.subr.bf16.mxu1 %v7867_v48  ;;  %v7946_v47 = vld [vmem:[#allocation5 + $0x11a0] ss:$8 sps:$4 sm:$0xff]   ;;  %v7951_v48 = vld [vmem:[#allocation5 + $0x8b4] ss:$8 sps:$4 sm:$0xff]  }
 0x24e   :  { %4924 = vmatprep.subr.bf16.mxu0 %v7870_v49  ;;  %v7954_v49 = vld [vmem:[#allocation5 + $0x11b4] ss:$8 sps:$4 sm:$0xff]  }
 0x250   :  { %4556 = vmatpush1.bf16.msra.mxu1 %v7865_v50  ;;  %v7949_v50 = vld [vmem:[#allocation5 + $0x8b0] ss:$8 sps:$4 sm:$0xff]  }
 0x251   :  { %4925 = vmatpush1.bf16.msra.mxu0 %v7868_v51  ;;  %4557 = vmatprep.subr.bf16.mxu1 %v7873_v52  ;;  %v7952_v51 = vld [vmem:[#allocation5 + $0x11b0] ss:$8 sps:$4 sm:$0xff]   ;;  %v7957_v52 = vld [vmem:[#allocation5 + $0x8c4] ss:$8 sps:$4 sm:$0xff]  }
 0x252   :  { %4926 = vmatprep.subr.bf16.mxu0 %v7876_v53  ;;  %v7960_v53 = vld [vmem:[#allocation5 + $0x11c4] ss:$8 sps:$4 sm:$0xff]  }
 0x254   :  { %4558 = vmatpush1.bf16.msra.mxu1 %v7871_v54  ;;  %v7955_v54 = vld [vmem:[#allocation5 + $0x8c0] ss:$8 sps:$4 sm:$0xff]  }
 0x255   :  { %4927 = vmatpush1.bf16.msra.mxu0 %v7874_v55  ;;  %4559 = vmatprep.subr.bf16.mxu1 %v7879_v56  ;;  %v7958_v55 = vld [vmem:[#allocation5 + $0x11c0] ss:$8 sps:$4 sm:$0xff]   ;;  %v7963_v56 = vld [vmem:[#allocation5 + $0x8d4] ss:$8 sps:$4 sm:$0xff]  }
 0x256   :  { %4928 = vmatprep.subr.bf16.mxu0 %v7882_v57  ;;  %v7966_v57 = vld [vmem:[#allocation5 + $0x11d4] ss:$8 sps:$4 sm:$0xff]  }
 0x258   :  { %4560 = vmatpush1.bf16.msra.mxu1 %v7877_v58  ;;  %v7961_v58 = vld [vmem:[#allocation5 + $0x8d0] ss:$8 sps:$4 sm:$0xff]  }
 0x259   :  { %4929 = vmatpush1.bf16.msra.mxu0 %v7880_v59  ;;  %4570 = vmatprep.subr.bf16.mxu1 %v7885_v62  ;;  %v7964_v59 = vld [vmem:[#allocation5 + $0x11d0] ss:$8 sps:$4 sm:$0xff]   ;;  %v7967_v62 = vld [vmem:[#allocation5 + $0x8e0] ss:$8 sps:$4 sm:$0xff]  }
 0x25a   :  { %4939 = vmatprep.subr.bf16.mxu0 %v7888_v63  ;;  %v7970_v63 = vld [vmem:[#allocation5 + $0x11e0] ss:$8 sps:$4 sm:$0xff]  }
 0x25b   :  { %4562 = vmatmul.mubr.bf16.vlgmr.msra.gmra.mrb[0].mxu1 %v141_v0  ;;  %v7975_v0 = vld [vmem:[#allocation5 + $0x8f4] ss:$8 sps:$4 sm:$0xff]  }
 0x25c   :  { %4931 = vmatmul.mubr.bf16.vlgmr.msra.gmra.mrb[0].mxu0 %v159_v1  ;;  %4571 = vmatpush1.bf16.msra.mxu1 %v7883_v4  ;;  %v7978_v1 = vld [vmem:[#allocation5 + $0x11f4] ss:$8 sps:$4 sm:$0xff]   ;;  %v100_v4 = vld [vmem:[#allocation2 + $0x80] sm:$0xff] }
 0x25d   :  { %4940 = vmatpush1.bf16.msra.mxu0 %v7886_v5  ;;  %4572 = vmatprep.subr.bf16.mxu1 %v7891_v6  ;;  %v118_v5 = vld [vmem:[#allocation2 + $0x110] sm:$0xff]  ;;  %v7981_v6 = vld [vmem:[#allocation5 + $0x1204] ss:$8 sps:$4 sm:$0xff]  }
 0x25e   :  { %4941 = vmatprep.subr.bf16.mxu0 %v7894_v7  ;;  %4602 = vmatprep.mubr.bf16.mxu1 %v144_v8  ;;  %v121_v7 = vld [vmem:[#allocation2 + $0x128] sm:$0xff]  ;;  %v143_v8 = vpack.c.bf16 %v100_v4, %v100_v4  ;;  %v5174_v4 = vld [vmem:[#allocation8 + $0x80] sm:$0xff] }
 0x25f   :  { %4971 = vmatprep.mubr.bf16.mxu0 %v162_v9  ;;  %v161_v9 = vpack.c.bf16 %v118_v5, %v118_v5  ;;  %v5178_v5 = vld [vmem:[#allocation8 + $0xa0] sm:$0xff] }
 0x260   :  { %4573 = vmatpush1.bf16.msra.mxu1 %v7889_v10  ;;  %v7979_v10 = vld [vmem:[#allocation5 + $0x1200] ss:$8 sps:$4 sm:$0xff]  }
 0x261   :  { %4942 = vmatpush1.bf16.msra.mxu0 %v7892_v11  ;;  %4574 = vmatprep.subr.bf16.mxu1 %v7897_v12  ;;  %v164_v11 = vpack.c.bf16 %v121_v7, %v121_v7  ;;  %v7984_v12 = vld [vmem:[#allocation5 + $0x1214] ss:$8 sps:$4 sm:$0xff]   ;;  %v8053_v7 = vld [vmem:[#allocation5 + $0x1384] ss:$8 sps:$4 sm:$0xff]  }
 0x262   :  { %4943 = vmatprep.subr.bf16.mxu0 %v7900_v13  ;;  %v7982_v13 = vld [vmem:[#allocation5 + $0x1210] ss:$8 sps:$4 sm:$0xff]  }
 0x264   :  { %4575 = vmatpush1.bf16.msra.mxu1 %v7895_v14  ;;  %v7987_v14 = vld [vmem:[#allocation5 + $0x1224] ss:$8 sps:$4 sm:$0xff]  }
 0x265   :  { %4944 = vmatpush1.bf16.msra.mxu0 %v7898_v15  ;;  %4576 = vmatprep.subr.bf16.mxu1 %v7903_v16  ;;  %v7985_v15 = vld [vmem:[#allocation5 + $0x1220] ss:$8 sps:$4 sm:$0xff]   ;;  %v7990_v16 = vld [vmem:[#allocation5 + $0x1234] ss:$8 sps:$4 sm:$0xff]  }
 0x266   :  { %4945 = vmatprep.subr.bf16.mxu0 %v7906_v17  ;;  %v7988_v17 = vld [vmem:[#allocation5 + $0x1230] ss:$8 sps:$4 sm:$0xff]  }
 0x268   :  { %4577 = vmatpush1.bf16.msra.mxu1 %v7901_v18  ;;  %v7993_v18 = vld [vmem:[#allocation5 + $0x1244] ss:$8 sps:$4 sm:$0xff]  }
 0x269   :  { %4946 = vmatpush1.bf16.msra.mxu0 %v7904_v19  ;;  %4578 = vmatprep.subr.bf16.mxu1 %v7909_v20  ;;  %v7991_v19 = vld [vmem:[#allocation5 + $0x1240] ss:$8 sps:$4 sm:$0xff]   ;;  %v7996_v20 = vld [vmem:[#allocation5 + $0x1254] ss:$8 sps:$4 sm:$0xff]  }
 0x26a   :  { %4947 = vmatprep.subr.bf16.mxu0 %v7912_v21  ;;  %v7994_v21 = vld [vmem:[#allocation5 + $0x1250] ss:$8 sps:$4 sm:$0xff]  }
 0x26c   :  { %4579 = vmatpush1.bf16.msra.mxu1 %v7907_v22  ;;  %v7999_v22 = vld [vmem:[#allocation5 + $0x1264] ss:$8 sps:$4 sm:$0xff]  }
 0x26d   :  { %4948 = vmatpush1.bf16.msra.mxu0 %v7910_v23  ;;  %4580 = vmatprep.subr.bf16.mxu1 %v7915_v24  ;;  %v7997_v23 = vld [vmem:[#allocation5 + $0x1260] ss:$8 sps:$4 sm:$0xff]   ;;  %v8002_v24 = vld [vmem:[#allocation5 + $0x1274] ss:$8 sps:$4 sm:$0xff]  }
 0x26e   :  { %4949 = vmatprep.subr.bf16.mxu0 %v7918_v25  ;;  %v8000_v25 = vld [vmem:[#allocation5 + $0x1270] ss:$8 sps:$4 sm:$0xff]  }
 0x270   :  { %4581 = vmatpush1.bf16.msra.mxu1 %v7913_v26  ;;  %v8005_v26 = vld [vmem:[#allocation5 + $0x1284] ss:$8 sps:$4 sm:$0xff]  }
 0x271   :  { %4950 = vmatpush1.bf16.msra.mxu0 %v7916_v27  ;;  %4582 = vmatprep.subr.bf16.mxu1 %v7921_v28  ;;  %v8003_v27 = vld [vmem:[#allocation5 + $0x1280] ss:$8 sps:$4 sm:$0xff]   ;;  %v8008_v28 = vld [vmem:[#allocation5 + $0x1294] ss:$8 sps:$4 sm:$0xff]  }
 0x272   :  { %4951 = vmatprep.subr.bf16.mxu0 %v7924_v29  ;;  %v8006_v29 = vld [vmem:[#allocation5 + $0x1290] ss:$8 sps:$4 sm:$0xff]  }
 0x274   :  { %4583 = vmatpush1.bf16.msra.mxu1 %v7919_v30  ;;  %v8011_v30 = vld [vmem:[#allocation5 + $0x12a4] ss:$8 sps:$4 sm:$0xff]  }
 0x275   :  { %4952 = vmatpush1.bf16.msra.mxu0 %v7922_v31  ;;  %4584 = vmatprep.subr.bf16.mxu1 %v7927_v32  ;;  %v8009_v31 = vld [vmem:[#allocation5 + $0x12a0] ss:$8 sps:$4 sm:$0xff]   ;;  %v8014_v32 = vld [vmem:[#allocation5 + $0x12b4] ss:$8 sps:$4 sm:$0xff]  }
 0x276   :  { %4953 = vmatprep.subr.bf16.mxu0 %v7930_v33  ;;  %v8012_v33 = vld [vmem:[#allocation5 + $0x12b0] ss:$8 sps:$4 sm:$0xff]  }
 0x278   :  { %4585 = vmatpush1.bf16.msra.mxu1 %v7925_v34  ;;  %v8017_v34 = vld [vmem:[#allocation5 + $0x12c4] ss:$8 sps:$4 sm:$0xff]  }
 0x279   :  { %4954 = vmatpush1.bf16.msra.mxu0 %v7928_v35  ;;  %4586 = vmatprep.subr.bf16.mxu1 %v7933_v36  ;;  %v8015_v35 = vld [vmem:[#allocation5 + $0x12c0] ss:$8 sps:$4 sm:$0xff]   ;;  %v8020_v36 = vld [vmem:[#allocation5 + $0x12d4] ss:$8 sps:$4 sm:$0xff]  }
 0x27a   :  { %4955 = vmatprep.subr.bf16.mxu0 %v7936_v37  ;;  %v8018_v37 = vld [vmem:[#allocation5 + $0x12d0] ss:$8 sps:$4 sm:$0xff]  }
 0x27c   :  { %4587 = vmatpush1.bf16.msra.mxu1 %v7931_v38  ;;  %v8023_v38 = vld [vmem:[#allocation5 + $0x12e4] ss:$8 sps:$4 sm:$0xff]  }
 0x27d   :  { %4956 = vmatpush1.bf16.msra.mxu0 %v7934_v39  ;;  %4588 = vmatprep.subr.bf16.mxu1 %v7939_v40  ;;  %v8021_v39 = vld [vmem:[#allocation5 + $0x12e0] ss:$8 sps:$4 sm:$0xff]   ;;  %v8026_v40 = vld [vmem:[#allocation5 + $0x12f4] ss:$8 sps:$4 sm:$0xff]  }
 0x27e   :  { %4957 = vmatprep.subr.bf16.mxu0 %v7942_v41  ;;  %v8024_v41 = vld [vmem:[#allocation5 + $0x12f0] ss:$8 sps:$4 sm:$0xff]  }
 0x280   :  { %4589 = vmatpush1.bf16.msra.mxu1 %v7937_v42  ;;  %v120_v42 = vld [vmem:[#allocation2 + $0x120] sm:$0xff] }
 0x281   :  { %4958 = vmatpush1.bf16.msra.mxu0 %v7940_v43  ;;  %4590 = vmatprep.subr.bf16.mxu1 %v7945_v44  ;;  %v8029_v43 = vld [vmem:[#allocation5 + $0x1304] ss:$8 sps:$4 sm:$0xff]  }
 0x282   :  { %4959 = vmatprep.subr.bf16.mxu0 %v7948_v45  ;;  %v123_v44 = vld [vmem:[#allocation2 + $0x138] sm:$0xff]  ;;  %v163_v45 = vpack.c.bf16 %v120_v42, %v120_v42 }
 0x284   :  { %4591 = vmatpush1.bf16.msra.mxu1 %v7943_v46  ;;  %v8027_v46 = vld [vmem:[#allocation5 + $0x1300] ss:$8 sps:$4 sm:$0xff]  }
 0x285   :  { %4960 = vmatpush1.bf16.msra.mxu0 %v7946_v47  ;;  %4592 = vmatprep.subr.bf16.mxu1 %v7951_v48  ;;  %v166_v47 = vpack.c.bf16 %v123_v44, %v123_v44  ;;  %v8032_v48 = vld [vmem:[#allocation5 + $0x1314] ss:$8 sps:$4 sm:$0xff]  }
 0x286   :  { %4961 = vmatprep.subr.bf16.mxu0 %v7954_v49  ;;  %v8030_v49 = vld [vmem:[#allocation5 + $0x1310] ss:$8 sps:$4 sm:$0xff]   ;;  %v8074_v44 = vld [vmem:[#allocation5 + $0x13f4] ss:$8 sps:$4 sm:$0xff]  }
 0x288   :  { %4593 = vmatpush1.bf16.msra.mxu1 %v7949_v50  ;;  %v8035_v50 = vld [vmem:[#allocation5 + $0x1324] ss:$8 sps:$4 sm:$0xff]  }
 0x289   :  { %4962 = vmatpush1.bf16.msra.mxu0 %v7952_v51  ;;  %4594 = vmatprep.subr.bf16.mxu1 %v7957_v52  ;;  %v8033_v51 = vld [vmem:[#allocation5 + $0x1320] ss:$8 sps:$4 sm:$0xff]   ;;  %v8038_v52 = vld [vmem:[#allocation5 + $0x1334] ss:$8 sps:$4 sm:$0xff]  }
 0x28a   :  { %4963 = vmatprep.subr.bf16.mxu0 %v7960_v53  ;;  %v8036_v53 = vld [vmem:[#allocation5 + $0x1330] ss:$8 sps:$4 sm:$0xff]  }
 0x28c   :  { %4595 = vmatpush1.bf16.msra.mxu1 %v7955_v54  ;;  %v8041_v54 = vld [vmem:[#allocation5 + $0x1344] ss:$8 sps:$4 sm:$0xff]  }
 0x28d   :  { %4964 = vmatpush1.bf16.msra.mxu0 %v7958_v55  ;;  %4596 = vmatprep.subr.bf16.mxu1 %v7963_v56  ;;  %v8039_v55 = vld [vmem:[#allocation5 + $0x1340] ss:$8 sps:$4 sm:$0xff]   ;;  %v8044_v56 = vld [vmem:[#allocation5 + $0x1354] ss:$8 sps:$4 sm:$0xff]  }
 0x28e   :  { %4965 = vmatprep.subr.bf16.mxu0 %v7966_v57  ;;  %v8042_v57 = vld [vmem:[#allocation5 + $0x1350] ss:$8 sps:$4 sm:$0xff]  }
 0x290   :  { %4597 = vmatpush1.bf16.msra.mxu1 %v7961_v58  ;;  %v8047_v58 = vld [vmem:[#allocation5 + $0x1364] ss:$8 sps:$4 sm:$0xff]  }
 0x291   :  { %4966 = vmatpush1.bf16.msra.mxu0 %v7964_v59  ;;  %4598 = vmatprep.subr.bf16.mxu1 %v7969_v60  ;;  %v8045_v59 = vld [vmem:[#allocation5 + $0x1360] ss:$8 sps:$4 sm:$0xff]   ;;  %v8050_v60 = vld [vmem:[#allocation5 + $0x1374] ss:$8 sps:$4 sm:$0xff]  }
 0x292   :  { %4967 = vmatprep.subr.bf16.mxu0 %v7972_v61  ;;  %v5158_v61 = vld [vmem:[#allocation8] sm:$0xff] }
 0x294   :  { %4599 = vmatpush1.bf16.msra.mxu1 %v7967_v62  ;;  %v5162_v62 = vld [vmem:[#allocation8 + $0x20] sm:$0xff] }
 0x295   :  { %4968 = vmatpush1.bf16.msra.mxu0 %v7970_v63  ;;  %4600 = vmatprep.subr.bf16.mxu1 %v7975_v0  ;;  %v5166_v63 = vld [vmem:[#allocation8 + $0x40] sm:$0xff]  ;;  %v6884_v0 = vcombine.low %v5158_v61, %v5162_v62 }
 0x296   :  { %4969 = vmatprep.subr.bf16.mxu0 %v7978_v1  ;;  %v6885_v1 = vcombine.high %v5158_v61, %v5162_v62  ;;  %v8090_v61 = vld [vmem:[#allocation5 + $0x1450] ss:$8 sps:$4 sm:$0xff]   ;;  %v8095_v62 = vld [vmem:[#allocation5 + $0x1464] ss:$8 sps:$4 sm:$0xff]  }
 0x298   :  { %4601 = vmatpush1.bf16.msra.mxu1 %v7973_v2  ;;  %v5170_v2 = vld [vmem:[#allocation8 + $0x60] sm:$0xff] }
 0x299   :  { %4970 = vmatpush1.bf16.msra.mxu0 %v7976_v3  ;;  %v6893_v3 = vcombine.high %v5166_v63, %v5170_v2  ;;  %5968 = vmatprep.subr.bf16.mxu1 %v6885_v1  ;;  %v8096_v1 = vld [vmem:[#allocation5 + $0x1470] ss:$8 sps:$4 sm:$0xff]  }
 0x29a   :  { %4980 = vmatprep.subr.bf16.mxu0 %v7981_v6  ;;  %v8048_v6 = vld [vmem:[#allocation5 + $0x1370] ss:$8 sps:$4 sm:$0xff]  }
 0x29b   :  { %4603 = vmatmul.mubr.bf16.vlgmr.msra.gmra.mrb[0].mxu1 %v143_v8  ;;  %v6892_v8 = vcombine.low %v5166_v63, %v5170_v2  ;;  %v8093_v63 = vld [vmem:[#allocation5 + $0x1460] ss:$8 sps:$4 sm:$0xff]   ;;  %v8101_v2 = vld [vmem:[#allocation5 + $0x1484] ss:$8 sps:$4 sm:$0xff]  }
 0x29c   :  { %4972 = vmatmul.mubr.bf16.vlgmr.msra.gmra.mrb[0].mxu0 %v161_v9  ;;  %5969 = vmatpush1.bf16.msra.mxu1 %v6884_v0  ;;  %v6901_v9 = vcombine.high %v5174_v4, %v5178_v5  ;;  %v8098_v0 = vld [vmem:[#allocation5 + $0x1474] ss:$8 sps:$4 sm:$0xff]  }
 0x29d   :  { %4981 = vmatpush1.bf16.msra.mxu0 %v7979_v10  ;;  %5012 = vmatprep.mubr.bf16.mxu0 %v164_v11  ;;  %v5182_v10 = vld [vmem:[#allocation8 + $0xc0] sm:$0xff] }
 0x29e   :  { %4982 = vmatprep.subr.bf16.mxu0 %v7984_v12  ;;  %5970 = vmatprep.subr.bf16.mxu1 %v6893_v3  ;;  %v5186_v11 = vld [vmem:[#allocation8 + $0xe0] sm:$0xff] }
 0x29f   :  { %v8051_v12 = vld [vmem:[#allocation5 + $0x1380] ss:$8 sps:$4 sm:$0xff]  }
 0x2a0   :  { %5971 = vmatpush1.bf16.msra.mxu1 %v6892_v8  ;;  %v8099_v3 = vld [vmem:[#allocation5 + $0x1480] ss:$8 sps:$4 sm:$0xff]   ;;  %v8110_v8 = vld [vmem:[#allocation5 + $0x14b4] ss:$8 sps:$4 sm:$0xff]  }
 0x2a1   :  { %4983 = vmatpush1.bf16.msra.mxu0 %v7982_v13  ;;  %v8056_v13 = vld [vmem:[#allocation5 + $0x1394] ss:$8 sps:$4 sm:$0xff]   ;;  %5972 = vmatprep.subr.bf16.mxu1 %v6901_v9  ;;  %v8108_v9 = vld [vmem:[#allocation5 + $0x14b0] ss:$8 sps:$4 sm:$0xff]  }
 0x2a2   :  { %4984 = vmatprep.subr.bf16.mxu0 %v7987_v14  ;;  %v6900_v14 = vcombine.low %v5174_v4, %v5178_v5  ;;  %v8104_v4 = vld [vmem:[#allocation5 + $0x1494] ss:$8 sps:$4 sm:$0xff]   ;;  %v8102_v5 = vld [vmem:[#allocation5 + $0x1490] ss:$8 sps:$4 sm:$0xff]  }
 0x2a4   :  { %5973 = vmatpush1.bf16.msra.mxu1 %v6900_v14  ;;  %v8119_v14 = vld [vmem:[#allocation5 + $0x14e4] ss:$8 sps:$4 sm:$0xff]  }
 0x2a5   :  { %4985 = vmatpush1.bf16.msra.mxu0 %v7985_v15  ;;  %v6909_v15 = vcombine.high %v5182_v10, %v5186_v11 }
 0x2a6   :  { %4986 = vmatprep.subr.bf16.mxu0 %v7990_v16  ;;  %v5190_v16 = vld [vmem:[#allocation8 + $0x100] sm:$0xff] }
 0x2a7   :  { %5974 = vmatprep.subr.bf16.mxu1 %v6909_v15  ;;  %v8117_v15 = vld [vmem:[#allocation5 + $0x14e0] ss:$8 sps:$4 sm:$0xff]  }
 0x2a9   :  { %4987 = vmatpush1.bf16.msra.mxu0 %v7988_v17  ;;  %v5194_v17 = vld [vmem:[#allocation8 + $0x120] sm:$0xff] }
 0x2aa   :  { %4988 = vmatprep.subr.bf16.mxu0 %v7993_v18  ;;  %v8054_v18 = vld [vmem:[#allocation5 + $0x1390] ss:$8 sps:$4 sm:$0xff]  }
 0x2ad   :  { %4989 = vmatpush1.bf16.msra.mxu0 %v7991_v19  ;;  %v8059_v19 = vld [vmem:[#allocation5 + $0x13a4] ss:$8 sps:$4 sm:$0xff]  }
 0x2ae   :  { %4990 = vmatprep.subr.bf16.mxu0 %v7996_v20  ;;  %v6908_v20 = vcombine.low %v5182_v10, %v5186_v11  ;;  %v8113_v10 = vld [vmem:[#allocation5 + $0x14c4] ss:$8 sps:$4 sm:$0xff]   ;;  %v8111_v11 = vld [vmem:[#allocation5 + $0x14c0] ss:$8 sps:$4 sm:$0xff]  }
 0x2b0   :  { %5975 = vmatpush1.bf16.msra.mxu1 %v6908_v20 }
 0x2b1   :  { %4991 = vmatpush1.bf16.msra.mxu0 %v7994_v21  ;;  %v6917_v21 = vcombine.high %v5190_v16, %v5194_v17 }
 0x2b2   :  { %4992 = vmatprep.subr.bf16.mxu0 %v7999_v22  ;;  %v5198_v22 = vld [vmem:[#allocation8 + $0x140] sm:$0xff] }
 0x2b3   :  { %5976 = vmatprep.subr.bf16.mxu1 %v6917_v21  ;;  %v8123_v21 = vld [vmem:[#allocation5 + $0x1500] ss:$8 sps:$4 sm:$0xff]  }
 0x2b5   :  { %4993 = vmatpush1.bf16.msra.mxu0 %v7997_v23  ;;  %v5202_v23 = vld [vmem:[#allocation8 + $0x160] sm:$0xff] }
 0x2b6   :  { %4994 = vmatprep.subr.bf16.mxu0 %v8002_v24  ;;  %v8057_v24 = vld [vmem:[#allocation5 + $0x13a0] ss:$8 sps:$4 sm:$0xff]  }
 0x2b9   :  { %4995 = vmatpush1.bf16.msra.mxu0 %v8000_v25  ;;  %v8062_v25 = vld [vmem:[#allocation5 + $0x13b4] ss:$8 sps:$4 sm:$0xff]  }
 0x2ba   :  { %4996 = vmatprep.subr.bf16.mxu0 %v8005_v26  ;;  %v6916_v26 = vcombine.low %v5190_v16, %v5194_v17  ;;  %v8122_v16 = vld [vmem:[#allocation5 + $0x14f4] ss:$8 sps:$4 sm:$0xff]   ;;  %v8120_v17 = vld [vmem:[#allocation5 + $0x14f0] ss:$8 sps:$4 sm:$0xff]  }
 0x2bc   :  { %5977 = vmatpush1.bf16.msra.mxu1 %v6916_v26 }
 0x2bd   :  { %4997 = vmatpush1.bf16.msra.mxu0 %v8003_v27  ;;  %v6925_v27 = vcombine.high %v5198_v22, %v5202_v23 }
 0x2be   :  { %4998 = vmatprep.subr.bf16.mxu0 %v8008_v28  ;;  %v5206_v28 = vld [vmem:[#allocation8 + $0x180] sm:$0xff] }
 0x2bf   :  { %5978 = vmatprep.subr.bf16.mxu1 %v6925_v27 }
 0x2c1   :  { %4999 = vmatpush1.bf16.msra.mxu0 %v8006_v29  ;;  %v5210_v29 = vld [vmem:[#allocation8 + $0x1a0] sm:$0xff] }
 0x2c2   :  { %5000 = vmatprep.subr.bf16.mxu0 %v8011_v30  ;;  %v8060_v30 = vld [vmem:[#allocation5 + $0x13b0] ss:$8 sps:$4 sm:$0xff]  }
 0x2c5   :  { %5001 = vmatpush1.bf16.msra.mxu0 %v8009_v31  ;;  %v8065_v31 = vld [vmem:[#allocation5 + $0x13c4] ss:$8 sps:$4 sm:$0xff]  }
 0x2c6   :  { %5002 = vmatprep.subr.bf16.mxu0 %v8014_v32  ;;  %v6924_v32 = vcombine.low %v5198_v22, %v5202_v23  ;;  %v8128_v22 = vld [vmem:[#allocation5 + $0x1514] ss:$8 sps:$4 sm:$0xff]   ;;  %v8126_v23 = vld [vmem:[#allocation5 + $0x1510] ss:$8 sps:$4 sm:$0xff]  }
 0x2c8   :  { %5979 = vmatpush1.bf16.msra.mxu1 %v6924_v32  ;;  %v5226_v32 = vld [vmem:[#allocation8 + $0x220] sm:$0xff] }
 0x2c9   :  { %5003 = vmatpush1.bf16.msra.mxu0 %v8012_v33  ;;  %v6933_v33 = vcombine.high %v5206_v28, %v5210_v29 }
 0x2ca   :  { %5004 = vmatprep.subr.bf16.mxu0 %v8017_v34  ;;  %v5214_v34 = vld [vmem:[#allocation8 + $0x1c0] sm:$0xff] }
 0x2cb   :  { %5980 = vmatprep.subr.bf16.mxu1 %v6933_v33 }
 0x2cd   :  { %5005 = vmatpush1.bf16.msra.mxu0 %v8015_v35  ;;  %v5218_v35 = vld [vmem:[#allocation8 + $0x1e0] sm:$0xff] }
 0x2ce   :  { %5006 = vmatprep.subr.bf16.mxu0 %v8020_v36  ;;  %v8063_v36 = vld [vmem:[#allocation5 + $0x13c0] ss:$8 sps:$4 sm:$0xff]   ;;  %v6940_v42 = vcombine.low %v5214_v34, %v5218_v35 }
 0x2d1   :  { %5007 = vmatpush1.bf16.msra.mxu0 %v8018_v37  ;;  %v8068_v37 = vld [vmem:[#allocation5 + $0x13d4] ss:$8 sps:$4 sm:$0xff]  }
 0x2d2   :  { %5008 = vmatprep.subr.bf16.mxu0 %v8023_v38  ;;  %v6932_v38 = vcombine.low %v5206_v28, %v5210_v29 }
 0x2d4   :  { %5981 = vmatpush1.bf16.msra.mxu1 %v6932_v38 }
 0x2d5   :  { %5009 = vmatpush1.bf16.msra.mxu0 %v8021_v39  ;;  %v6941_v39 = vcombine.high %v5214_v34, %v5218_v35  ;;  %v5230_v35 = vld [vmem:[#allocation8 + $0x240] sm:$0xff] }
 0x2d6   :  { %5010 = vmatprep.subr.bf16.mxu0 %v8026_v40  ;;  %v8066_v40 = vld [vmem:[#allocation5 + $0x13d0] ss:$8 sps:$4 sm:$0xff]  }
 0x2d7   :  { %5982 = vmatprep.subr.bf16.mxu1 %v6941_v39  ;;  %v5238_v39 = vld [vmem:[#allocation8 + $0x280] sm:$0xff] }
 0x2d8   :  { %5983 = vmatpush1.bf16.msra.mxu1 %v6940_v42 }
 0x2d9   :  { %5011 = vmatpush1.bf16.msra.mxu0 %v8024_v41  ;;  %v8071_v41 = vld [vmem:[#allocation5 + $0x13e4] ss:$8 sps:$4 sm:$0xff]  }
 0x2da   :  { %5021 = vmatprep.subr.bf16.mxu0 %v8029_v43  ;;  %v8069_v43 = vld [vmem:[#allocation5 + $0x13e0] ss:$8 sps:$4 sm:$0xff]  }
 0x2dc   :  { %5013 = vmatmul.mubr.bf16.vlgmr.msra.gmra.mrb[0].mxu0 %v163_v45  ;;  %v8072_v45 = vld [vmem:[#allocation5 + $0x13f0] ss:$8 sps:$4 sm:$0xff]  }
 0x2dd   :  { %5022 = vmatpush1.bf16.msra.mxu0 %v8027_v46  ;;  %5053 = vmatprep.mubr.bf16.mxu0 %v166_v47  ;;  %v122_v46 = vld [vmem:[#allocation2 + $0x130] sm:$0xff]  ;;  %v8077_v47 = vld [vmem:[#allocation5 + $0x1404] ss:$8 sps:$4 sm:$0xff]  }
 0x2de   :  { %5023 = vmatprep.subr.bf16.mxu0 %v8032_v48  ;;  %v125_v48 = vld [vmem:[#allocation2 + $0x148] sm:$0xff] }
 0x2e1   :  { %5024 = vmatpush1.bf16.msra.mxu0 %v8030_v49  ;;  %v165_v49 = vpack.c.bf16 %v122_v46, %v122_v46 }
 0x2e2   :  { %5025 = vmatprep.subr.bf16.mxu0 %v8035_v50  ;;  %v8075_v50 = vld [vmem:[#allocation5 + $0x1400] ss:$8 sps:$4 sm:$0xff]  }
 0x2e5   :  { %5026 = vmatpush1.bf16.msra.mxu0 %v8033_v51  ;;  %v168_v51 = vpack.c.bf16 %v125_v48, %v125_v48  ;;  %v5258_v48 = vld [vmem:[#allocation8 + $0x320] sm:$0xff] }
 0x2e6   :  { %5027 = vmatprep.subr.bf16.mxu0 %v8038_v52  ;;  %v8080_v52 = vld [vmem:[#allocation5 + $0x1414] ss:$8 sps:$4 sm:$0xff]  }
 0x2e9   :  { %5028 = vmatpush1.bf16.msra.mxu0 %v8036_v53  ;;  %v8078_v53 = vld [vmem:[#allocation5 + $0x1410] ss:$8 sps:$4 sm:$0xff]  }
 0x2ea   :  { %5029 = vmatprep.subr.bf16.mxu0 %v8041_v54  ;;  %v8083_v54 = vld [vmem:[#allocation5 + $0x1424] ss:$8 sps:$4 sm:$0xff]  }
 0x2ed   :  { %5030 = vmatpush1.bf16.msra.mxu0 %v8039_v55  ;;  %v8081_v55 = vld [vmem:[#allocation5 + $0x1420] ss:$8 sps:$4 sm:$0xff]  }
 0x2ee   :  { %5031 = vmatprep.subr.bf16.mxu0 %v8044_v56  ;;  %v8086_v56 = vld [vmem:[#allocation5 + $0x1434] ss:$8 sps:$4 sm:$0xff]  }
 0x2f1   :  { %5032 = vmatpush1.bf16.msra.mxu0 %v8042_v57  ;;  %v8084_v57 = vld [vmem:[#allocation5 + $0x1430] ss:$8 sps:$4 sm:$0xff]  }
 0x2f2   :  { %5033 = vmatprep.subr.bf16.mxu0 %v8047_v58  ;;  %v8089_v58 = vld [vmem:[#allocation5 + $0x1444] ss:$8 sps:$4 sm:$0xff]  }
 0x2f5   :  { %5034 = vmatpush1.bf16.msra.mxu0 %v8045_v59  ;;  %v8087_v59 = vld [vmem:[#allocation5 + $0x1440] ss:$8 sps:$4 sm:$0xff]  }
 0x2f6   :  { %5035 = vmatprep.subr.bf16.mxu0 %v8050_v60  ;;  %v8092_v60 = vld [vmem:[#allocation5 + $0x1454] ss:$8 sps:$4 sm:$0xff]  }
 0x2f9   :  { %5036 = vmatpush1.bf16.msra.mxu0 %v8048_v6  ;;  %v8107_v6 = vld [vmem:[#allocation5 + $0x14a4] ss:$8 sps:$4 sm:$0xff]  }
 0x2fa   :  { %5037 = vmatprep.subr.bf16.mxu0 %v8053_v7  ;;  %v8105_v7 = vld [vmem:[#allocation5 + $0x14a0] ss:$8 sps:$4 sm:$0xff]  }
 0x2fd   :  { %5038 = vmatpush1.bf16.msra.mxu0 %v8051_v12  ;;  %v8116_v12 = vld [vmem:[#allocation5 + $0x14d4] ss:$8 sps:$4 sm:$0xff]  }
 0x2fe   :  { %5039 = vmatprep.subr.bf16.mxu0 %v8056_v13  ;;  %v8114_v13 = vld [vmem:[#allocation5 + $0x14d0] ss:$8 sps:$4 sm:$0xff]  }
 0x301   :  { %5040 = vmatpush1.bf16.msra.mxu0 %v8054_v18  ;;  %v124_v18 = vld [vmem:[#allocation2 + $0x140] sm:$0xff] }
 0x302   :  { %5041 = vmatprep.subr.bf16.mxu0 %v8059_v19  ;;  %v8125_v19 = vld [vmem:[#allocation5 + $0x1504] ss:$8 sps:$4 sm:$0xff]   ;;  %v167_v20 = vpack.c.bf16 %v124_v18, %v124_v18 }
 0x305   :  { %5042 = vmatpush1.bf16.msra.mxu0 %v8057_v24  ;;  %v8318_v24 = vmov 0  }
 0x306   :  { %5043 = vmatprep.subr.bf16.mxu0 %v8062_v25  ;;  %v126_v25 = vld [vmem:[#allocation2 + $0x150] sm:$0xff] }
 0x307   :  { %v169_v26 = vpack.c.bf16 %v126_v25, %v126_v25  ;;  %v5167_v25 = vld [vmem:[#allocation8 + $0x48] sm:$0xff] }
 0x309   :  { %5044 = vmatpush1.bf16.msra.mxu0 %v8060_v30 }
 0x30a   :  { %5045 = vmatprep.subr.bf16.mxu0 %v8065_v31  ;;  %v5222_v31 = vld [vmem:[#allocation8 + $0x200] sm:$0xff] }
 0x30b   :  { %v6949_v33 = vcombine.high %v5222_v31, %v5226_v32  ;;  %v6948_v34 = vcombine.low %v5222_v31, %v5226_v32  ;;  %v5175_v31 = vld [vmem:[#allocation8 + $0x88] sm:$0xff] }
 0x30c   :  { %v5179_v32 = vld [vmem:[#allocation8 + $0xa8] sm:$0xff] }
 0x30d   :  { %5046 = vmatpush1.bf16.msra.mxu0 %v8063_v36  ;;  %5984 = vmatprep.subr.bf16.mxu1 %v6949_v33  ;;  %v5234_v36 = vld [vmem:[#allocation8 + $0x260] sm:$0xff] }
 0x30e   :  { %5047 = vmatprep.subr.bf16.mxu0 %v8068_v37  ;;  %5985 = vmatpush1.bf16.msra.mxu1 %v6948_v34  ;;  %v6957_v37 = vcombine.high %v5230_v35, %v5234_v36  ;;  %v6956_v38 = vcombine.low %v5230_v35, %v5234_v36  ;;  %v6903_v34 = vcombine.high %v5175_v31, %v5179_v32  ;;  %v5183_v35 = vld [vmem:[#allocation8 + $0xc8] sm:$0xff] }
 0x30f   :  { %v5187_v36 = vld [vmem:[#allocation8 + $0xe8] sm:$0xff] }
 0x310   :  { %5986 = vmatprep.subr.bf16.mxu1 %v6957_v37  ;;  %v6902_v37 = vcombine.low %v5175_v31, %v5179_v32  ;;  %v5168_v32 = vld [vmem:[#allocation8 + $0x50] sm:$0xff] }
 0x311   :  { %5048 = vmatpush1.bf16.msra.mxu0 %v8066_v40  ;;  %v5242_v40 = vld [vmem:[#allocation8 + $0x2a0] sm:$0xff] }
 0x312   :  { %5049 = vmatprep.subr.bf16.mxu0 %v8071_v41  ;;  %5987 = vmatpush1.bf16.msra.mxu1 %v6956_v38  ;;  %v6965_v41 = vcombine.high %v5238_v39, %v5242_v40  ;;  %v6964_v42 = vcombine.low %v5238_v39, %v5242_v40  ;;  %v6911_v38 = vcombine.high %v5183_v35, %v5187_v36  ;;  %v5191_v39 = vld [vmem:[#allocation8 + $0x108] sm:$0xff] }
 0x313   :  { %v5195_v40 = vld [vmem:[#allocation8 + $0x128] sm:$0xff] }
 0x314   :  { %5988 = vmatprep.subr.bf16.mxu1 %v6965_v41  ;;  %v6910_v41 = vcombine.low %v5183_v35, %v5187_v36  ;;  %v5176_v36 = vld [vmem:[#allocation8 + $0x90] sm:$0xff] }
 0x315   :  { %5050 = vmatpush1.bf16.msra.mxu0 %v8069_v43  ;;  %v5246_v43 = vld [vmem:[#allocation8 + $0x2c0] sm:$0xff] }
 0x316   :  { %5051 = vmatprep.subr.bf16.mxu0 %v8074_v44  ;;  %5989 = vmatpush1.bf16.msra.mxu1 %v6964_v42  ;;  %v5250_v44 = vld [vmem:[#allocation8 + $0x2e0] sm:$0xff]  ;;  %v6919_v42 = vcombine.high %v5191_v39, %v5195_v40 }
 0x317   :  { %v6972_v46 = vcombine.low %v5246_v43, %v5250_v44 }
 0x319   :  { %5052 = vmatpush1.bf16.msra.mxu0 %v8072_v45  ;;  %v6973_v45 = vcombine.high %v5246_v43, %v5250_v44  ;;  %v5199_v43 = vld [vmem:[#allocation8 + $0x148] sm:$0xff] }
 0x31a   :  { %5062 = vmatprep.subr.bf16.mxu0 %v8077_v47  ;;  %v5254_v47 = vld [vmem:[#allocation8 + $0x300] sm:$0xff]  ;;  %v5203_v44 = vld [vmem:[#allocation8 + $0x168] sm:$0xff] }
 0x31b   :  { %5990 = vmatprep.subr.bf16.mxu1 %v6973_v45  ;;  %v6918_v45 = vcombine.low %v5191_v39, %v5195_v40  ;;  %v5184_v40 = vld [vmem:[#allocation8 + $0xd0] sm:$0xff] }
 0x31c   :  { %5054 = vmatmul.mubr.bf16.vlgmr.msra.gmra.mrb[0].mxu0 %v165_v49  ;;  %5991 = vmatpush1.bf16.msra.mxu1 %v6972_v46  ;;  %v6981_v49 = vcombine.high %v5254_v47, %v5258_v48  ;;  %v6927_v46 = vcombine.high %v5199_v43, %v5203_v44 }
 0x31d   :  { %5063 = vmatpush1.bf16.msra.mxu0 %v8075_v50  ;;  %5094 = vmatprep.mubr.bf16.mxu0 %v168_v51  ;;  %v6980_v50 = vcombine.low %v5254_v47, %v5258_v48  ;;  %v5262_v51 = vld [vmem:[#allocation8 + $0x340] sm:$0xff]  ;;  %v5207_v47 = vld [vmem:[#allocation8 + $0x188] sm:$0xff] }
 0x31e   :  { %5064 = vmatprep.subr.bf16.mxu0 %v8080_v52  ;;  %5992 = vmatprep.subr.bf16.mxu1 %v6981_v49  ;;  %v5266_v52 = vld [vmem:[#allocation8 + $0x360] sm:$0xff]  ;;  %v5211_v48 = vld [vmem:[#allocation8 + $0x1a8] sm:$0xff]  ;;  %v6926_v49 = vcombine.low %v5199_v43, %v5203_v44  ;;  %v5192_v44 = vld [vmem:[#allocation8 + $0x110] sm:$0xff] }
 0x320   :  { %5993 = vmatpush1.bf16.msra.mxu1 %v6980_v50  ;;  %v6935_v50 = vcombine.high %v5207_v47, %v5211_v48 }
 0x321   :  { %5065 = vmatpush1.bf16.msra.mxu0 %v8078_v53  ;;  %v6989_v53 = vcombine.high %v5262_v51, %v5266_v52 }
 0x322   :  { %5066 = vmatprep.subr.bf16.mxu0 %v8083_v54  ;;  %v6988_v54 = vcombine.low %v5262_v51, %v5266_v52  ;;  %v5215_v51 = vld [vmem:[#allocation8 + $0x1c8] sm:$0xff] }
 0x323   :  { %5994 = vmatprep.subr.bf16.mxu1 %v6989_v53  ;;  %v5219_v52 = vld [vmem:[#allocation8 + $0x1e8] sm:$0xff]  ;;  %v6934_v53 = vcombine.low %v5207_v47, %v5211_v48  ;;  %v5200_v48 = vld [vmem:[#allocation8 + $0x150] sm:$0xff] }
 0x324   :  { %5995 = vmatpush1.bf16.msra.mxu1 %v6988_v54  ;;  %v6943_v54 = vcombine.high %v5215_v51, %v5219_v52 }
 0x325   :  { %5067 = vmatpush1.bf16.msra.mxu0 %v8081_v55  ;;  %v5270_v55 = vld [vmem:[#allocation8 + $0x380] sm:$0xff] }
 0x326   :  { %5068 = vmatprep.subr.bf16.mxu0 %v8086_v56  ;;  %v5274_v56 = vld [vmem:[#allocation8 + $0x3a0] sm:$0xff] }
 0x329   :  { %5069 = vmatpush1.bf16.msra.mxu0 %v8084_v57  ;;  %v5278_v57 = vld [vmem:[#allocation8 + $0x3c0] sm:$0xff] }
 0x32a   :  { %5070 = vmatprep.subr.bf16.mxu0 %v8089_v58  ;;  %v6997_v58 = vcombine.high %v5270_v55, %v5274_v56 }
 0x32c   :  { %5996 = vmatprep.subr.bf16.mxu1 %v6997_v58 }
 0x32d   :  { %5071 = vmatpush1.bf16.msra.mxu0 %v8087_v59  ;;  %v5282_v59 = vld [vmem:[#allocation8 + $0x3e0] sm:$0xff] }
 0x32e   :  { %5072 = vmatprep.subr.bf16.mxu0 %v8092_v60  ;;  %v6996_v60 = vcombine.low %v5270_v55, %v5274_v56  ;;  %v5223_v55 = vld [vmem:[#allocation8 + $0x208] sm:$0xff] }
 0x32f   :  { %v5227_v56 = vld [vmem:[#allocation8 + $0x228] sm:$0xff] }
 0x330   :  { %5997 = vmatpush1.bf16.msra.mxu1 %v6996_v60  ;;  %v6951_v58 = vcombine.high %v5223_v55, %v5227_v56  ;;  %v5235_v60 = vld [vmem:[#allocation8 + $0x268] sm:$0xff] }
 0x331   :  { %5073 = vmatpush1.bf16.msra.mxu0 %v8090_v61  ;;  %v7005_v61 = vcombine.high %v5278_v57, %v5282_v59 }
 0x332   :  { %5074 = vmatprep.subr.bf16.mxu0 %v8095_v62  ;;  %v7004_v62 = vcombine.low %v5278_v57, %v5282_v59  ;;  %v6942_v57 = vcombine.low %v5215_v51, %v5219_v52  ;;  %v5231_v59 = vld [vmem:[#allocation8 + $0x248] sm:$0xff]  ;;  %v5208_v52 = vld [vmem:[#allocation8 + $0x190] sm:$0xff] }
 0x333   :  { %5998 = vmatprep.subr.bf16.mxu1 %v7005_v61  ;;  %v6950_v61 = vcombine.low %v5223_v55, %v5227_v56  ;;  %v5216_v56 = vld [vmem:[#allocation8 + $0x1d0] sm:$0xff] }
 0x334   :  { %5999 = vmatpush1.bf16.msra.mxu1 %v7004_v62  ;;  %v6959_v62 = vcombine.high %v5231_v59, %v5235_v60 }
 0x335   :  { %5075 = vmatpush1.bf16.msra.mxu0 %v8093_v63  ;;  %v5159_v63 = vld [vmem:[#allocation8 + $0x8] sm:$0xff] }
 0x336   :  { %5076 = vmatprep.subr.bf16.mxu0 %v8098_v0  ;;  %v5163_v0 = vld [vmem:[#allocation8 + $0x28] sm:$0xff] }
 0x339   :  { %5077 = vmatpush1.bf16.msra.mxu0 %v8096_v1  ;;  %v6887_v1 = vcombine.high %v5159_v63, %v5163_v0 }
 0x33a   :  { %5078 = vmatprep.subr.bf16.mxu0 %v8101_v2  ;;  %v6886_v2 = vcombine.low %v5159_v63, %v5163_v0  ;;  %v5239_v63 = vld [vmem:[#allocation8 + $0x288] sm:$0xff] }
 0x33b   :  { %6009 = vmatprep.subr.bf16.mxu1 %v6887_v1  ;;  %v5243_v0 = vld [vmem:[#allocation8 + $0x2a8] sm:$0xff]  ;;  %v6958_v1 = vcombine.low %v5231_v59, %v5235_v60  ;;  %v5224_v60 = vld [vmem:[#allocation8 + $0x210] sm:$0xff] }
 0x33d   :  { %5079 = vmatpush1.bf16.msra.mxu0 %v8099_v3  ;;  %v848_v3 = vlaneseq }
 0x33e   :  { %5080 = vmatprep.subr.bf16.mxu0 %v8104_v4 }
 0x33f   :  { %v8414_v4 = vshrl.u32 %v848_v3, 7  ;;  %v5247_v3 = vld [vmem:[#allocation8 + $0x2c8] sm:$0xff] }
 0x341   :  { %5081 = vmatpush1.bf16.msra.mxu0 %v8102_v5  ;;  %v850_v5 = vsub.s32 0, %v8414_v4 }
 0x342   :  { %5082 = vmatprep.subr.bf16.mxu0 %v8107_v6  ;;  %v846_v6 = vld [vmem:[#allocation7] sm:$0x3] }
 0x345   :  { %5083 = vmatpush1.bf16.msra.mxu0 %v8105_v7  ;;  %v854_v7 = vsub.s32 1, %v8414_v4 }
 0x346   :  { %5084 = vmatprep.subr.bf16.mxu0 %v8110_v8  ;;  %v851_v8 = vrot.slane %v846_v6, %v850_v5 }
 0x349   :  { %5085 = vmatpush1.bf16.msra.mxu0 %v8108_v9  ;;  %v855_v9 = vrot.slane %v846_v6, %v854_v7  ;;  %v5251_v6 = vld [vmem:[#allocation8 + $0x2e8] sm:$0xff] }
 0x34a   :  { %5086 = vmatprep.subr.bf16.mxu0 %v8113_v10 }
 0x34d   :  { %5087 = vmatpush1.bf16.msra.mxu0 %v8111_v11 }
 0x34e   :  { %5088 = vmatprep.subr.bf16.mxu0 %v8116_v12 }
 0x351   :  { %5089 = vmatpush1.bf16.msra.mxu0 %v8114_v13 }
 0x352   :  { %5090 = vmatprep.subr.bf16.mxu0 %v8119_v14 }
 0x355   :  { %5091 = vmatpush1.bf16.msra.mxu0 %v8117_v15 }
 0x356   :  { %5092 = vmatprep.subr.bf16.mxu0 %v8122_v16 }
 0x359   :  { %5093 = vmatpush1.bf16.msra.mxu0 %v8120_v17 }
 0x35a   :  { %5103 = vmatprep.subr.bf16.mxu0 %v8125_v19 }
 0x35c   :  { %5095 = vmatmul.mubr.bf16.vlgmr.msra.gmra.mrb[0].mxu0 %v167_v20 }
 0x35d   :  { %5104 = vmatpush1.bf16.msra.mxu0 %v8123_v21  ;;  %5135 = vmatprep.mubr.bf16.mxu0 %v8318_v24 }
 0x35e   :  { %5105 = vmatprep.subr.bf16.mxu0 %v8128_v22 }
 0x361   :  { %5106 = vmatpush1.bf16.msra.mxu0 %v8126_v23 }
 0x368   :  { %6881 = vmatmul.mubr.msk.bf16.vlgmr.msra.gmra.mrb[0].mxu0 %vm4238_vm0, %v169_v26  ;;  %v5171_v26 = vld [vmem:[#allocation8 + $0x68] sm:$0xff] }
 0x369   :  { %v6894_v33 = vcombine.low %v5167_v25, %v5171_v26 }
 0x36e   :  { %v8410_v27 = vpop.f32.mrb[0].mxu1 }
 0x36f   :  { %v8412_v28 = vpop.f32.mrb[1].mxu1  ;;  %v7020_v10 = vadd.f32 %v8410_v27, %v851_v8  ;;  %v6966_v8 = vcombine.low %v5239_v63, %v5243_v0 }
 0x370   :  { %v4608_v29 = vpop.f32.mrb[2].mxu1  ;;  %v7022_v11 = vadd.f32 %v8412_v28, %v855_v9  ;;  %v6975_v9 = vcombine.high %v5247_v3, %v5251_v6 }
 0x371   :  { %v4609_v30 = vpop.f32.mrb[3].mxu1 }
 0x372   :  { %v6895_v30 = vcombine.high %v5167_v25, %v5171_v26  ;;  %v5160_v26 = vld [vmem:[#allocation8 + $0x10] sm:$0xff] }
 0x43b   :  { %v5137_v12 = vpop.f32.mrb[0].mxu0 }
 0x43c   :  { %v7021_v13 = vadd.f32 %v7020_v10, %v5137_v12  ;;  %v5139_v14 = vpop.f32.mrb[1].mxu0  ;;  %v5255_v10 = vld [vmem:[#allocation8 + $0x308] sm:$0xff]  ;;  %v6974_v12 = vcombine.low %v5247_v3, %v5251_v6  ;;  %v5240_v6 = vld [vmem:[#allocation8 + $0x290] sm:$0xff] }
 0x43d   :  { %v7023_v15 = vadd.f32 %v7022_v11, %v5139_v14  ;;  %v5141_v16 = vpop.f32.mrb[2].mxu0  ;;  %v5259_v11 = vld [vmem:[#allocation8 + $0x328] sm:$0xff] }
 0x43e   :  { %v6882_v17 = vmul.f32 -1.442695, %v7021_v13  ;;  %v5142_v18 = vpop.f32.mrb[3].mxu0  ;;  %v6983_v13 = vcombine.high %v5255_v10, %v5259_v11  ;;  %v5263_v14 = vld [vmem:[#allocation8 + $0x348] sm:$0xff]  ;;  %v6982_v16 = vcombine.low %v5255_v10, %v5259_v11  ;;  %v5248_v11 = vld [vmem:[#allocation8 + $0x2d0] sm:$0xff] }
 0x43f   :  { %v6883_v19 = vmul.f32 -1.442695, %v7023_v15  ;;  %v5267_v15 = vld [vmem:[#allocation8 + $0x368] sm:$0xff] }
 0x440   :  { %8129 = vpow2.f32 %v6882_v17  ;;  %v6991_v17 = vcombine.high %v5263_v14, %v5267_v15  ;;  %v5271_v18 = vld [vmem:[#allocation8 + $0x388] sm:$0xff] }
 0x441   :  { %8131 = vpow2.f32 %v6883_v19  ;;  %v5275_v19 = vld [vmem:[#allocation8 + $0x3a8] sm:$0xff] }
 0x44a   :  { %v8130_v20 = vpop.eup %8129 }
 0x44b   :  { %v8132_v21 = vpop.eup %8131  ;;  %v5150_v22 = vadd.f32 1.0, %v8130_v20  ;;  %v6990_v20 = vcombine.low %v5263_v14, %v5267_v15  ;;  %v5256_v15 = vld [vmem:[#allocation8 + $0x310] sm:$0xff] }
 0x44c   :  { %v5151_v23 = vadd.f32 1.0, %v8132_v21  ;;  %v6999_v21 = vcombine.high %v5271_v18, %v5275_v19 }
 0x44d   :  { %8133 = vrcp.f32 %v5150_v22  ;;  %v5279_v22 = vld [vmem:[#allocation8 + $0x3c8] sm:$0xff] }
 0x44e   :  { %8135 = vrcp.f32 %v5151_v23  ;;  %v5283_v23 = vld [vmem:[#allocation8 + $0x3e8] sm:$0xff] }
 0x44f   :  { %v7007_v25 = vcombine.high %v5279_v22, %v5283_v23 }
 0x457   :  { %v8134_v24 = vpop.eup %8133 }
 0x458   :  { %v8136_v27 = vpop.eup %8135  ;;  %v8426_v29 = vpack.c.bf16 %v8134_v24, %v8134_v24  ;;  %v6998_v24 = vcombine.low %v5271_v18, %v5275_v19  ;;  %v5264_v19 = vld [vmem:[#allocation8 + $0x350] sm:$0xff] }
 0x459   :  { %v8424_v28 = vpack.c.bf16 %v8136_v27, %v8136_v27  ;;  %v5164_v27 = vld [vmem:[#allocation8 + $0x30] sm:$0xff] }
 0x45a   :  { %v6889_v31 = vcombine.high %v5160_v26, %v5164_v27 }
 0x45b   :  { %6000 = vmatprep.mubr.bf16.mxu1 %v8424_v28 }
 0x45c   :  { %6001 = vmatmul.mubr.bf16.vlgmr.msra.gmra.mrb[4].mxu1 %v8426_v29 }
 0x45d   :  { %6010 = vmatpush1.bf16.msra.mxu1 %v6886_v2  ;;  %6041 = vmatprep.mubr.bf16.mxu1 %v8424_v28  ;;  %v6967_v2 = vcombine.high %v5239_v63, %v5243_v0  ;;  %v5232_v0 = vld [vmem:[#allocation8 + $0x250] sm:$0xff] }
 0x45e   :  { %6011 = vmatprep.subr.bf16.mxu1 %v6895_v30  ;;  %v7006_v30 = vcombine.low %v5279_v22, %v5283_v23  ;;  %v5272_v23 = vld [vmem:[#allocation8 + $0x390] sm:$0xff] }
 0x461   :  { %6012 = vmatpush1.bf16.msra.mxu1 %v6894_v33  ;;  %v5172_v33 = vld [vmem:[#allocation8 + $0x70] sm:$0xff] }
 0x462   :  { %6013 = vmatprep.subr.bf16.mxu1 %v6903_v34  ;;  %v6888_v34 = vcombine.low %v5160_v26, %v5164_v27  ;;  %v6897_v35 = vcombine.high %v5168_v32, %v5172_v33  ;;  %v5280_v27 = vld [vmem:[#allocation8 + $0x3d0] sm:$0xff] }
 0x465   :  { %6014 = vmatpush1.bf16.msra.mxu1 %v6902_v37  ;;  %v5180_v37 = vld [vmem:[#allocation8 + $0xb0] sm:$0xff] }
 0x466   :  { %6015 = vmatprep.subr.bf16.mxu1 %v6911_v38  ;;  %v6896_v38 = vcombine.low %v5168_v32, %v5172_v33  ;;  %v6905_v39 = vcombine.high %v5176_v36, %v5180_v37  ;;  %v5161_v33 = vld [vmem:[#allocation8 + $0x18] sm:$0xff] }
 0x469   :  { %6016 = vmatpush1.bf16.msra.mxu1 %v6910_v41  ;;  %v5188_v41 = vld [vmem:[#allocation8 + $0xf0] sm:$0xff] }
 0x46a   :  { %6017 = vmatprep.subr.bf16.mxu1 %v6919_v42  ;;  %v6904_v42 = vcombine.low %v5176_v36, %v5180_v37  ;;  %v6913_v43 = vcombine.high %v5184_v40, %v5188_v41  ;;  %v5169_v37 = vld [vmem:[#allocation8 + $0x58] sm:$0xff] }
 0x46d   :  { %6018 = vmatpush1.bf16.msra.mxu1 %v6918_v45  ;;  %v5196_v45 = vld [vmem:[#allocation8 + $0x130] sm:$0xff] }
 0x46e   :  { %6019 = vmatprep.subr.bf16.mxu1 %v6927_v46  ;;  %v6912_v46 = vcombine.low %v5184_v40, %v5188_v41  ;;  %v6921_v47 = vcombine.high %v5192_v44, %v5196_v45  ;;  %v5177_v41 = vld [vmem:[#allocation8 + $0x98] sm:$0xff] }
 0x471   :  { %6020 = vmatpush1.bf16.msra.mxu1 %v6926_v49  ;;  %v5204_v49 = vld [vmem:[#allocation8 + $0x170] sm:$0xff] }
 0x472   :  { %6021 = vmatprep.subr.bf16.mxu1 %v6935_v50  ;;  %v6920_v50 = vcombine.low %v5192_v44, %v5196_v45  ;;  %v6929_v51 = vcombine.high %v5200_v48, %v5204_v49  ;;  %v5185_v45 = vld [vmem:[#allocation8 + $0xd8] sm:$0xff] }
 0x475   :  { %6022 = vmatpush1.bf16.msra.mxu1 %v6934_v53  ;;  %v5212_v53 = vld [vmem:[#allocation8 + $0x1b0] sm:$0xff] }
 0x476   :  { %6023 = vmatprep.subr.bf16.mxu1 %v6943_v54  ;;  %v6928_v54 = vcombine.low %v5200_v48, %v5204_v49  ;;  %v6937_v55 = vcombine.high %v5208_v52, %v5212_v53  ;;  %v5193_v49 = vld [vmem:[#allocation8 + $0x118] sm:$0xff] }
 0x479   :  { %6024 = vmatpush1.bf16.msra.mxu1 %v6942_v57  ;;  %v5220_v57 = vld [vmem:[#allocation8 + $0x1f0] sm:$0xff] }
 0x47a   :  { %6025 = vmatprep.subr.bf16.mxu1 %v6951_v58  ;;  %v6936_v58 = vcombine.low %v5208_v52, %v5212_v53  ;;  %v6945_v59 = vcombine.high %v5216_v56, %v5220_v57  ;;  %v5201_v53 = vld [vmem:[#allocation8 + $0x158] sm:$0xff] }
 0x47d   :  { %6026 = vmatpush1.bf16.msra.mxu1 %v6950_v61  ;;  %v5228_v61 = vld [vmem:[#allocation8 + $0x230] sm:$0xff] }
 0x47e   :  { %6027 = vmatprep.subr.bf16.mxu1 %v6959_v62  ;;  %v6944_v62 = vcombine.low %v5216_v56, %v5220_v57  ;;  %v6953_v63 = vcombine.high %v5224_v60, %v5228_v61  ;;  %v5209_v56 = vld [vmem:[#allocation8 + $0x198] sm:$0xff] }
 0x47f   :  { %v5213_v57 = vld [vmem:[#allocation8 + $0x1b8] sm:$0xff] }
 0x481   :  { %6028 = vmatpush1.bf16.msra.mxu1 %v6958_v1  ;;  %v5236_v1 = vld [vmem:[#allocation8 + $0x270] sm:$0xff] }
 0x482   :  { %6029 = vmatprep.subr.bf16.mxu1 %v6967_v2  ;;  %v6952_v2 = vcombine.low %v5224_v60, %v5228_v61  ;;  %v6961_v3 = vcombine.high %v5232_v0, %v5236_v1  ;;  %v5217_v60 = vld [vmem:[#allocation8 + $0x1d8] sm:$0xff] }
 0x483   :  { %v5221_v61 = vld [vmem:[#allocation8 + $0x1f8] sm:$0xff] }
 0x485   :  { %6030 = vmatpush1.bf16.msra.mxu1 %v6966_v8  ;;  %v5244_v8 = vld [vmem:[#allocation8 + $0x2b0] sm:$0xff] }
 0x486   :  { %6031 = vmatprep.subr.bf16.mxu1 %v6975_v9  ;;  %v6960_v9 = vcombine.low %v5232_v0, %v5236_v1  ;;  %v6969_v10 = vcombine.high %v5240_v6, %v5244_v8  ;;  %v5225_v0 = vld [vmem:[#allocation8 + $0x218] sm:$0xff] }
 0x487   :  { %v5229_v1 = vld [vmem:[#allocation8 + $0x238] sm:$0xff] }
 0x489   :  { %6032 = vmatpush1.bf16.msra.mxu1 %v6974_v12  ;;  %v5252_v12 = vld [vmem:[#allocation8 + $0x2f0] sm:$0xff] }
 0x48a   :  { %6033 = vmatprep.subr.bf16.mxu1 %v6983_v13  ;;  %v6968_v13 = vcombine.low %v5240_v6, %v5244_v8  ;;  %v6977_v14 = vcombine.high %v5248_v11, %v5252_v12  ;;  %v5233_v6 = vld [vmem:[#allocation8 + $0x258] sm:$0xff] }
 0x48b   :  { %v5237_v8 = vld [vmem:[#allocation8 + $0x278] sm:$0xff] }
 0x48d   :  { %6034 = vmatpush1.bf16.msra.mxu1 %v6982_v16  ;;  %v5260_v16 = vld [vmem:[#allocation8 + $0x330] sm:$0xff] }
 0x48e   :  { %6035 = vmatprep.subr.bf16.mxu1 %v6991_v17  ;;  %v6976_v17 = vcombine.low %v5248_v11, %v5252_v12  ;;  %v6985_v18 = vcombine.high %v5256_v15, %v5260_v16  ;;  %v5241_v11 = vld [vmem:[#allocation8 + $0x298] sm:$0xff] }
 0x48f   :  { %v5245_v12 = vld [vmem:[#allocation8 + $0x2b8] sm:$0xff] }
 0x491   :  { %6036 = vmatpush1.bf16.msra.mxu1 %v6990_v20  ;;  %v5268_v20 = vld [vmem:[#allocation8 + $0x370] sm:$0xff] }
 0x492   :  { %6037 = vmatprep.subr.bf16.mxu1 %v6999_v21  ;;  %v6984_v21 = vcombine.low %v5256_v15, %v5260_v16  ;;  %v6993_v22 = vcombine.high %v5264_v19, %v5268_v20  ;;  %v5249_v15 = vld [vmem:[#allocation8 + $0x2d8] sm:$0xff] }
 0x493   :  { %v5253_v16 = vld [vmem:[#allocation8 + $0x2f8] sm:$0xff] }
 0x495   :  { %6038 = vmatpush1.bf16.msra.mxu1 %v6998_v24  ;;  %v5276_v24 = vld [vmem:[#allocation8 + $0x3b0] sm:$0xff] }
 0x496   :  { %6039 = vmatprep.subr.bf16.mxu1 %v7007_v25  ;;  %v6992_v25 = vcombine.low %v5264_v19, %v5268_v20  ;;  %v7001_v26 = vcombine.high %v5272_v23, %v5276_v24  ;;  %v5257_v19 = vld [vmem:[#allocation8 + $0x318] sm:$0xff] }
 0x497   :  { %v5261_v20 = vld [vmem:[#allocation8 + $0x338] sm:$0xff] }
 0x499   :  { %6040 = vmatpush1.bf16.msra.mxu1 %v7006_v30  ;;  %v5284_v30 = vld [vmem:[#allocation8 + $0x3f0] sm:$0xff] }
 0x49a   :  { %6050 = vmatprep.subr.bf16.mxu1 %v6889_v31  ;;  %v7000_v31 = vcombine.low %v5272_v23, %v5276_v24  ;;  %v7009_v32 = vcombine.high %v5280_v27, %v5284_v30  ;;  %v5265_v23 = vld [vmem:[#allocation8 + $0x358] sm:$0xff] }
 0x49b   :  { %v5269_v24 = vld [vmem:[#allocation8 + $0x378] sm:$0xff] }
 0x49c   :  { %6042 = vmatmul.mubr.bf16.vlgmr.msra.gmra.mrb[8].mxu1 %v8426_v29 }
 0x49d   :  { %6051 = vmatpush1.bf16.msra.mxu1 %v6888_v34  ;;  %6082 = vmatprep.mubr.bf16.mxu1 %v8424_v28  ;;  %v5165_v34 = vld [vmem:[#allocation8 + $0x38] sm:$0xff] }
 0x49e   :  { %6052 = vmatprep.subr.bf16.mxu1 %v6897_v35  ;;  %v7008_v35 = vcombine.low %v5280_v27, %v5284_v30  ;;  %v6891_v36 = vcombine.high %v5161_v33, %v5165_v34  ;;  %v5273_v27 = vld [vmem:[#allocation8 + $0x398] sm:$0xff] }
 0x49f   :  { %v5277_v30 = vld [vmem:[#allocation8 + $0x3b8] sm:$0xff] }
 0x4a1   :  { %6053 = vmatpush1.bf16.msra.mxu1 %v6896_v38  ;;  %v5173_v38 = vld [vmem:[#allocation8 + $0x78] sm:$0xff] }
 0x4a2   :  { %6054 = vmatprep.subr.bf16.mxu1 %v6905_v39  ;;  %v6890_v39 = vcombine.low %v5161_v33, %v5165_v34  ;;  %v6899_v40 = vcombine.high %v5169_v37, %v5173_v38  ;;  %v5281_v33 = vld [vmem:[#allocation8 + $0x3d8] sm:$0xff] }
 0x4a3   :  { %v5285_v34 = vld [vmem:[#allocation8 + $0x3f8] sm:$0xff] }
 0x4a5   :  { %6055 = vmatpush1.bf16.msra.mxu1 %v6904_v42  ;;  %v5181_v42 = vld [vmem:[#allocation8 + $0xb8] sm:$0xff] }
 0x4a6   :  { %6056 = vmatprep.subr.bf16.mxu1 %v6913_v43  ;;  %v6898_v43 = vcombine.low %v5169_v37, %v5173_v38  ;;  %v6907_v44 = vcombine.high %v5177_v41, %v5181_v42  ;;  %v7010_v37 = vcombine.low %v5281_v33, %v5285_v34  ;;  %v8436_v38 = vld [vmem:[#allocation10] sm:$0xff] }
 0x4a9   :  { %6057 = vmatpush1.bf16.msra.mxu1 %v6912_v46  ;;  %v5189_v46 = vld [vmem:[#allocation8 + $0xf8] sm:$0xff] }
 0x4aa   :  { %6058 = vmatprep.subr.bf16.mxu1 %v6921_v47  ;;  %v6906_v47 = vcombine.low %v5177_v41, %v5181_v42  ;;  %v6915_v48 = vcombine.high %v5185_v45, %v5189_v46 }
 0x4ad   :  { %6059 = vmatpush1.bf16.msra.mxu1 %v6920_v50  ;;  %v5197_v50 = vld [vmem:[#allocation8 + $0x138] sm:$0xff] }
 0x4ae   :  { %6060 = vmatprep.subr.bf16.mxu1 %v6929_v51  ;;  %v6914_v51 = vcombine.low %v5185_v45, %v5189_v46  ;;  %v6923_v52 = vcombine.high %v5193_v49, %v5197_v50 }
 0x4b1   :  { %6061 = vmatpush1.bf16.msra.mxu1 %v6928_v54  ;;  %v5205_v54 = vld [vmem:[#allocation8 + $0x178] sm:$0xff] }
 0x4b2   :  { %6062 = vmatprep.subr.bf16.mxu1 %v6937_v55  ;;  %v6922_v55 = vcombine.low %v5193_v49, %v5197_v50 }
 0x4b5   :  { %6063 = vmatpush1.bf16.msra.mxu1 %v6936_v58  ;;  %v6930_v58 = vcombine.low %v5201_v53, %v5205_v54 }
 0x4b6   :  { %6064 = vmatprep.subr.bf16.mxu1 %v6945_v59  ;;  %v6939_v59 = vcombine.high %v5209_v56, %v5213_v57 }
 0x4b9   :  { %6065 = vmatpush1.bf16.msra.mxu1 %v6944_v62  ;;  %v6938_v62 = vcombine.low %v5209_v56, %v5213_v57 }
 0x4ba   :  { %6066 = vmatprep.subr.bf16.mxu1 %v6953_v63  ;;  %v6947_v63 = vcombine.high %v5217_v60, %v5221_v61 }
 0x4bd   :  { %6067 = vmatpush1.bf16.msra.mxu1 %v6952_v2  ;;  %v6946_v2 = vcombine.low %v5217_v60, %v5221_v61 }
 0x4be   :  { %6068 = vmatprep.subr.bf16.mxu1 %v6961_v3  ;;  %v6955_v3 = vcombine.high %v5225_v0, %v5229_v1 }
 0x4c1   :  { %6069 = vmatpush1.bf16.msra.mxu1 %v6960_v9  ;;  %v6954_v9 = vcombine.low %v5225_v0, %v5229_v1 }
 0x4c2   :  { %6070 = vmatprep.subr.bf16.mxu1 %v6969_v10  ;;  %v6963_v10 = vcombine.high %v5233_v6, %v5237_v8 }
 0x4c5   :  { %6071 = vmatpush1.bf16.msra.mxu1 %v6968_v13  ;;  %v6962_v13 = vcombine.low %v5233_v6, %v5237_v8  ;;  %v5306_v8 = vsub.s32 4, %v8414_v4 }
 0x4c6   :  { %6072 = vmatprep.subr.bf16.mxu1 %v6977_v14  ;;  %v6971_v14 = vcombine.high %v5241_v11, %v5245_v12 }
 0x4c9   :  { %6073 = vmatpush1.bf16.msra.mxu1 %v6976_v17  ;;  %v6970_v17 = vcombine.low %v5241_v11, %v5245_v12 }
 0x4ca   :  { %6074 = vmatprep.subr.bf16.mxu1 %v6985_v18  ;;  %v6979_v18 = vcombine.high %v5249_v15, %v5253_v16 }
 0x4cd   :  { %6075 = vmatpush1.bf16.msra.mxu1 %v6984_v21  ;;  %v6978_v21 = vcombine.low %v5249_v15, %v5253_v16 }
 0x4ce   :  { %6076 = vmatprep.subr.bf16.mxu1 %v6993_v22  ;;  %v6987_v22 = vcombine.high %v5257_v19, %v5261_v20 }
 0x4d1   :  { %6077 = vmatpush1.bf16.msra.mxu1 %v6992_v25  ;;  %v6986_v25 = vcombine.low %v5257_v19, %v5261_v20 }
 0x4d2   :  { %6078 = vmatprep.subr.bf16.mxu1 %v7001_v26  ;;  %v6995_v26 = vcombine.high %v5265_v23, %v5269_v24 }
 0x4d5   :  { %6079 = vmatpush1.bf16.msra.mxu1 %v7000_v31  ;;  %v6994_v31 = vcombine.low %v5265_v23, %v5269_v24 }
 0x4d6   :  { %6080 = vmatprep.subr.bf16.mxu1 %v7009_v32  ;;  %v7003_v32 = vcombine.high %v5273_v27, %v5277_v30 }
 0x4d9   :  { %6081 = vmatpush1.bf16.msra.mxu1 %v7008_v35  ;;  %v7002_v35 = vcombine.low %v5273_v27, %v5277_v30  ;;  %v5318_v27 = vsub.s32 7, %v8414_v4 }
 0x4da   :  { %6091 = vmatprep.subr.bf16.mxu1 %v6891_v36  ;;  %v7011_v36 = vcombine.high %v5281_v33, %v5285_v34 }
 0x4dc   :  { %6083 = vmatmul.mubr.bf16.vlgmr.msra.gmra.mrb[12].mxu1 %v8426_v29 }
 0x4dd   :  { %6092 = vmatpush1.bf16.msra.mxu1 %v6890_v39  ;;  %6123 = vmatprep.mubr.bf16.mxu1 %v8424_v28  ;;  %v6931_v28 = vcombine.high %v5201_v53, %v5205_v54  ;;  %v5291_v39 = vrot.slane %v8436_v38, %v850_v5  ;;  %v5302_v53 = vsub.s32 3, %v8414_v4 }
 0x4de   :  { %6093 = vmatprep.subr.bf16.mxu1 %v6899_v40  ;;  %v5295_v40 = vrot.slane %v8436_v38, %v854_v7  ;;  %v5298_v7 = vsub.s32 2, %v8414_v4 }
 0x4e0   :  { %v5299_v54 = vrot.slane %v8436_v38, %v5298_v7 }
 0x4e1   :  { %6094 = vmatpush1.bf16.msra.mxu1 %v6898_v43 }
 0x4e2   :  { %6095 = vmatprep.subr.bf16.mxu1 %v6907_v44 }
 0x4e5   :  { %6096 = vmatpush1.bf16.msra.mxu1 %v6906_v47 }
 0x4e6   :  { %6097 = vmatprep.subr.bf16.mxu1 %v6915_v48 }
 0x4e9   :  { %6098 = vmatpush1.bf16.msra.mxu1 %v6914_v51 }
 0x4ea   :  { %6099 = vmatprep.subr.bf16.mxu1 %v6923_v52 }
 0x4ed   :  { %6100 = vmatpush1.bf16.msra.mxu1 %v6922_v55  ;;  %v5303_v55 = vrot.slane %v8436_v38, %v5302_v53 }
 0x4ee   :  { %6101 = vmatprep.subr.bf16.mxu1 %v6931_v28 }
 0x4f1   :  { %6102 = vmatpush1.bf16.msra.mxu1 %v6930_v58 }
 0x4f2   :  { %6103 = vmatprep.subr.bf16.mxu1 %v6939_v59 }
 0x4f5   :  { %6104 = vmatpush1.bf16.msra.mxu1 %v6938_v62 }
 0x4f6   :  { %6105 = vmatprep.subr.bf16.mxu1 %v6947_v63 }
 0x4f9   :  { %6106 = vmatpush1.bf16.msra.mxu1 %v6946_v2 }
 0x4fa   :  { %6107 = vmatprep.subr.bf16.mxu1 %v6955_v3 }
 0x4fd   :  { %6108 = vmatpush1.bf16.msra.mxu1 %v6954_v9  ;;  %v5310_v9 = vsub.s32 5, %v8414_v4 }
 0x4fe   :  { %6109 = vmatprep.subr.bf16.mxu1 %v6963_v10  ;;  %v5307_v10 = vrot.slane %v8436_v38, %v5306_v8 }
 0x4ff   :  { %v5311_v11 = vrot.slane %v8436_v38, %v5310_v9 }
 0x501   :  { %6110 = vmatpush1.bf16.msra.mxu1 %v6962_v13 }
 0x502   :  { %6111 = vmatprep.subr.bf16.mxu1 %v6971_v14 }
 0x505   :  { %6112 = vmatpush1.bf16.msra.mxu1 %v6970_v17 }
 0x506   :  { %6113 = vmatprep.subr.bf16.mxu1 %v6979_v18 }
 0x509   :  { %6114 = vmatpush1.bf16.msra.mxu1 %v6978_v21 }
 0x50a   :  { %6115 = vmatprep.subr.bf16.mxu1 %v6987_v22 }
 0x50d   :  { %6116 = vmatpush1.bf16.msra.mxu1 %v6986_v25 }
 0x50e   :  { %6117 = vmatprep.subr.bf16.mxu1 %v6995_v26  ;;  %v5314_v26 = vsub.s32 6, %v8414_v4 }
 0x510   :  { %v5315_v30 = vrot.slane %v8436_v38, %v5314_v26 }
 0x511   :  { %6118 = vmatpush1.bf16.msra.mxu1 %v6994_v31  ;;  %v5319_v31 = vrot.slane %v8436_v38, %v5318_v27 }
 0x512   :  { %6119 = vmatprep.subr.bf16.mxu1 %v7003_v32 }
 0x515   :  { %6120 = vmatpush1.bf16.msra.mxu1 %v7002_v35 }
 0x516   :  { %6121 = vmatprep.subr.bf16.mxu1 %v7011_v36 }
 0x519   :  { %6122 = vmatpush1.bf16.msra.mxu1 %v7010_v37 }
 0x51c   :  { %6124 = vmatmul.mubr.bf16.vlgmr.msra.gmra.mrb[16].mxu1 %v8426_v29 }
 0x52f   :  { %v6002_v41 = vpop.f32.mrb[4].mxu1 }
 0x530   :  { %v6003_v42 = vadd.f32 %v6002_v41, %v5291_v39  ;;  %v6004_v43 = vpop.f32.mrb[5].mxu1 }
 0x531   :  { %v6005_v44 = vadd.f32 %v6004_v43, %v5295_v40  ;;  %v6006_v45 = vpop.f32.mrb[6].mxu1 }
 0x532   :  { %v7012_v46 = vmul.f32 -1.442695, %v6003_v42  ;;  %v6007_v47 = vpop.f32.mrb[7].mxu1 }
 0x533   :  { %v7013_v48 = vmul.f32 -1.442695, %v6005_v44 }
 0x534   :  { %8137 = vpow2.f32 %v7012_v46 }
 0x535   :  { %8139 = vpow2.f32 %v7013_v48 }
 0x53e   :  { %v8138_v29 = vpop.eup %8137 }
 0x53f   :  { %v8140_v49 = vpop.eup %8139  ;;  %v6156_v50 = vadd.f32 1.0, %v8138_v29 }
 0x540   :  { %v6157_v51 = vadd.f32 1.0, %v8140_v49 }
 0x541   :  { %8141 = vrcp.f32 %v6156_v50 }
 0x542   :  { %8143 = vrcp.f32 %v6157_v51 }
 0x54b   :  { %v8142_v5 = vpop.eup %8141 }
 0x54c   :  { %v8144_v52 = vpop.eup %8143  ;;  %6180 = vst [vmem:[#allocation11] sm:$0xff] %v8142_v5 }
 0x54d   :  { %6181 = vst [vmem:[#allocation11 + $0x8] sm:$0xff] %v8144_v52 }
 0x56f   :  { %v6043_v28 = vpop.f32.mrb[8].mxu1 }
 0x570   :  { %v6044_v56 = vadd.f32 %v6043_v28, %v5299_v54  ;;  %v6045_v57 = vpop.f32.mrb[9].mxu1 }
 0x571   :  { %v6046_v58 = vadd.f32 %v6045_v57, %v5303_v55  ;;  %v6047_v59 = vpop.f32.mrb[10].mxu1 }
 0x572   :  { %v7014_v60 = vmul.f32 -1.442695, %v6044_v56  ;;  %v6048_v61 = vpop.f32.mrb[11].mxu1 }
 0x573   :  { %v7015_v62 = vmul.f32 -1.442695, %v6046_v58 }
 0x574   :  { %8145 = vpow2.f32 %v7014_v60 }
 0x575   :  { %8147 = vpow2.f32 %v7015_v62 }
 0x57e   :  { %v8146_v63 = vpop.eup %8145 }
 0x57f   :  { %v8148_v0 = vpop.eup %8147  ;;  %v6158_v1 = vadd.f32 1.0, %v8146_v63 }
 0x580   :  { %v6159_v2 = vadd.f32 1.0, %v8148_v0 }
 0x581   :  { %8149 = vrcp.f32 %v6158_v1 }
 0x582   :  { %8151 = vrcp.f32 %v6159_v2 }
 0x58b   :  { %v8150_v3 = vpop.eup %8149 }
 0x58c   :  { %v8152_v6 = vpop.eup %8151  ;;  %6182 = vst [vmem:[#allocation11 + $0x10] sm:$0xff] %v8150_v3 }
 0x58d   :  { %6183 = vst [vmem:[#allocation11 + $0x18] sm:$0xff] %v8152_v6 }
 0x5af   :  { %v6084_v12 = vpop.f32.mrb[12].mxu1 }
 0x5b0   :  { %v6085_v13 = vadd.f32 %v6084_v12, %v5307_v10  ;;  %v6086_v14 = vpop.f32.mrb[13].mxu1 }
 0x5b1   :  { %v6087_v15 = vadd.f32 %v6086_v14, %v5311_v11  ;;  %v6088_v16 = vpop.f32.mrb[14].mxu1 }
 0x5b2   :  { %v7016_v17 = vmul.f32 -1.442695, %v6085_v13  ;;  %v6089_v18 = vpop.f32.mrb[15].mxu1 }
 0x5b3   :  { %v7017_v19 = vmul.f32 -1.442695, %v6087_v15 }
 0x5b4   :  { %8153 = vpow2.f32 %v7016_v17 }
 0x5b5   :  { %8155 = vpow2.f32 %v7017_v19 }
 0x5be   :  { %v8154_v20 = vpop.eup %8153 }
 0x5bf   :  { %v8156_v21 = vpop.eup %8155  ;;  %v6160_v22 = vadd.f32 1.0, %v8154_v20 }
 0x5c0   :  { %v6161_v23 = vadd.f32 1.0, %v8156_v21 }
 0x5c1   :  { %8157 = vrcp.f32 %v6160_v22 }
 0x5c2   :  { %8159 = vrcp.f32 %v6161_v23 }
 0x5cb   :  { %v8158_v24 = vpop.eup %8157 }
 0x5cc   :  { %v8160_v25 = vpop.eup %8159  ;;  %6184 = vst [vmem:[#allocation11 + $0x20] sm:$0xff] %v8158_v24 }
 0x5cd   :  { %6185 = vst [vmem:[#allocation11 + $0x28] sm:$0xff] %v8160_v25 }
 0x5ef   :  { %v6125_v32 = vpop.f32.mrb[16].mxu1 }
 0x5f0   :  { %v6126_v33 = vadd.f32 %v6125_v32, %v5315_v30  ;;  %v6127_v34 = vpop.f32.mrb[17].mxu1 }
 0x5f1   :  { %v6128_v35 = vadd.f32 %v6127_v34, %v5319_v31  ;;  %v6129_v36 = vpop.f32.mrb[18].mxu1 }
 0x5f2   :  { %v7018_v37 = vmul.f32 -1.442695, %v6126_v33  ;;  %v6130_v39 = vpop.f32.mrb[19].mxu1 }
 0x5f3   :  { %v7019_v40 = vmul.f32 -1.442695, %v6128_v35 }
 0x5f4   :  { %8161 = vpow2.f32 %v7018_v37 }
 0x5f5   :  { %8163 = vpow2.f32 %v7019_v40 }
 0x5fe   :  { %v8162_v41 = vpop.eup %8161 }
 0x5ff   :  { %v8164_v42 = vpop.eup %8163  ;;  %v6162_v43 = vadd.f32 1.0, %v8162_v41 }
 0x600   :  { %v6163_v44 = vadd.f32 1.0, %v8164_v42 }
 0x601   :  { %8165 = vrcp.f32 %v6162_v43 }
 0x602   :  { %8167 = vrcp.f32 %v6163_v44 }
 0x60b   :  { %v8166_v4 = vpop.eup %8165 }
 0x60c   :  { %v8168_v38 = vpop.eup %8167  ;;  %6186 = vst [vmem:[#allocation11 + $0x30] sm:$0xff] %v8166_v4 }
 0x60d   :  { %6187 = vst [vmem:[#allocation11 + $0x38] sm:$0xff] %v8168_v38 }
 0x60e   :  { %8290 = shalt.err (!%p8287_p2)
}
 0x60f   :  { %s8291_s3 = scalar_lea.hbm %s8473_s5, 1024 }
 0x610   :  { %p8292_p3 = scmp.ne.s32.totalorder %s8473_s5, %s8291_s3  ;;  %p8295_p4 = scmp.lt.u32.totalorder %s8291_s3, %s8473_s5 }
 0x612   :  { %p8297_p5 = pnand %p8295_p4, %p8292_p3 }
 0x614   :  { %8300 = shalt.err (!%p8297_p5)
}
 0x615   :  { %6197 = dma.vmem_to_hbm [thread:$0]  %s6195_s27, 1024, %s8473_s5, [#allocation4]  }
 0x616   :  { %8307 = dma.done.wait [#allocation4], 1024  }
 0x617   :  { %8308 = vsyncadd [#allocation4], 4294966272 }
 0x618   :  { %6201 = vsyncpa [#allocation3], 1 }
 0x619   :  { %6202 = vsyncpa [#allocation6], 1 }
 0x61a   :  { %6203 = vsyncpa [#allocation9], 1 }
 0x61b   :  { %6204 = vsyncpa [#allocation4], 1 }

</bundles_post_ra>
